<compile_context>
chip_gen: v5e
topology: v5e:2x2
jax: 0.10.0
libtpu: 0.0.40
codegen_flags: <defaults>
</compile_context>

<pallas_src>
import jax
import jax.numpy as jnp
from jax.experimental import pallas as pl
from jax.experimental.pallas import tpu as pltpu

Z_DIM = 1
IN_DIM = 784
H1 = 256
H2 = 32
TB = 256                                    # batch tile (MXU-width friendly)
OUT_PAD = max(128, ((2 * Z_DIM + 127) // 128) * 128)  # lane-dense output width


def _round_up(n, m):
    return ((n + m - 1) // m) * m


def encoder_kernel(x_ref, w1_ref, b1_ref, w2_ref, b2_ref, wh_ref, bh_ref,
                   out_ref):
    # fc1: Linear(784 -> 256) + ReLU, f32 accumulation on the MXU.
    h = jnp.dot(x_ref[...], w1_ref[...], preferred_element_type=jnp.float32)
    h = jnp.maximum(h + b1_ref[...], 0.0).astype(w2_ref.dtype)      # (TB, 256)

    # fc2: Linear(256 -> 32) + ReLU.
    h = jnp.dot(h, w2_ref[...], preferred_element_type=jnp.float32)
    h = jnp.maximum(h + b2_ref[...], 0.0).astype(wh_ref.dtype)      # (TB, 32)

    # Fused heads: one lane-dense matmul; col 0 = mu, col 1 = log_var,
    # cols >= 2 are zero padding.  Fused bias already contains bmu/bvar.
    out = jnp.dot(h, wh_ref[...], preferred_element_type=jnp.float32)
    out_ref[...] = (out + bh_ref[...]).astype(out_ref.dtype)        # (TB, 128)


def encoder_forward(x, params, *, compute_dtype=jnp.float32):
    """x: (B, 1, 28, 28) float32 (NCHW, like PyTorch).

    Returns (mu, log_var), each (B, Z_DIM) float32.
    compute_dtype=jnp.bfloat16 halves HBM traffic on v6e/v7x (f32 accumulation
    is kept, so only input/weight rounding changes).
    """
    B = x.shape[0]
    x_flat = x.reshape(B, -1).astype(compute_dtype)                 # (B, 784)
    w1, b1, w2, b2, wmu, bmu, wvar, bvar = params

    # --- fuse + lane-pad the two 1-wide heads into one (H2, 128) weight ---
    wh = jnp.zeros((H2, OUT_PAD), jnp.float32)
    wh = wh.at[:, 0:Z_DIM].set(wmu).at[:, Z_DIM:2 * Z_DIM].set(wvar)
    bh = jnp.zeros((1, OUT_PAD), jnp.float32)
    bh = bh.at[:, 0:Z_DIM].set(bmu).at[:, Z_DIM:2 * Z_DIM].set(bvar)

    w1c = w1.astype(compute_dtype)
    w2c = w2.astype(compute_dtype)
    whc = wh.astype(compute_dtype)
    b1f = b1.astype(jnp.float32)
    b2f = b2.astype(jnp.float32)
    bhf = bh                                                        # f32

    # --- pad batch to a multiple of the (large) batch tile ---
    b_pad = _round_up(max(B, 1), TB)
    if b_pad != B:
        x_flat = jnp.pad(x_flat, ((0, b_pad - B), (0, 0)))

    rep = lambda shape: pl.BlockSpec(shape, lambda i: (0, 0))       # replicated
    grid = (b_pad // TB,)

    out = pl.pallas_call(
        encoder_kernel,
        out_shape=jax.ShapeDtypeStruct((b_pad, OUT_PAD), jnp.float32),
        grid_spec=pltpu.PrefetchScalarGridSpec(
            num_scalar_prefetch=0,
            grid=grid,
            in_specs=[
                pl.BlockSpec((TB, IN_DIM), lambda i: (i, 0)),       # x tile
                rep((IN_DIM, H1)), rep((1, H1)),                    # fc1
                rep((H1, H2)), rep((1, H2)),                        # fc2
                rep((H2, OUT_PAD)), rep((1, OUT_PAD)),              # fused heads
            ],
            out_specs=pl.BlockSpec((TB, OUT_PAD), lambda i: (i, 0)),
        ),
        compiler_params=pltpu.CompilerParams(
            dimension_semantics=("parallel",)),
    )(x_flat, w1c, b1f, w2c, b2f, whc, bhf)

    mu = out[:B, 0:Z_DIM]
    log_var = out[:B, Z_DIM:2 * Z_DIM]
    return mu, log_var


def init_params(key):
    """nn.Linear-style init.  Weights stored (in, out); biases (1, out)."""
    def linear(k, fan_in, fan_out):
        kw, kb = jax.random.split(k)
        bound = 1.0 / jnp.sqrt(fan_in)
        w = jax.random.uniform(kw, (fan_in, fan_out), jnp.float32, -bound, bound)
        b = jax.random.uniform(kb, (1, fan_out), jnp.float32, -bound, bound)
        return w, b

    k1, k2, k3, k4 = jax.random.split(key, 4)
    w1, b1 = linear(k1, IN_DIM, H1)
    w2, b2 = linear(k2, H1, H2)
    wmu, bmu = linear(k3, H2, Z_DIM)
    wvar, bvar = linear(k4, H2, Z_DIM)
    return (w1, b1, w2, b2, wmu, bmu, wvar, bvar)


def reference_forward(x, params, compute_dtype=jnp.float32):
    """Plain-JAX reference mirroring the kernel's cast points."""
    w1, b1, w2, b2, wmu, bmu, wvar, bvar = params
    h = x.reshape(x.shape[0], -1).astype(compute_dtype)
    h = jnp.dot(h, w1.astype(compute_dtype),
                preferred_element_type=jnp.float32) + b1
    h = jnp.maximum(h, 0.0).astype(compute_dtype)
    h = jnp.dot(h, w2.astype(compute_dtype),
                preferred_element_type=jnp.float32) + b2
    h = jnp.maximum(h, 0.0).astype(compute_dtype)
    mu = jnp.dot(h, wmu.astype(compute_dtype),
                 preferred_element_type=jnp.float32) + bmu
    lv = jnp.dot(h, wvar.astype(compute_dtype),
                 preferred_element_type=jnp.float32) + bvar
    return mu, lv


if __name__ == "__main__":
    key = jax.random.PRNGKey(0)
    k_x, k_p = jax.random.split(key)

    B = 8
    x = jax.random.normal(k_x, (B, 1, 28, 28), jnp.float32)   # NCHW like PyTorch
    params = init_params(k_p)

    # f32 path (default): tight check against plain-JAX reference.
    mu, log_var = encoder_forward(x, params)
    mu, log_var = jax.block_until_ready((mu, log_var))
    mu_ref, lv_ref = reference_forward(x, params)
    assert mu.shape == (B, Z_DIM) and log_var.shape == (B, Z_DIM)
    assert jnp.allclose(mu, mu_ref, atol=1e-4, rtol=1e-4)
    assert jnp.allclose(log_var, lv_ref, atol=1e-4, rtol=1e-4)

    # bf16 compute path (v6e/v7x HBM-traffic optimization): looser check
    # against a bf16-matched reference (f32 accumulation in both).
    mu_bf, lv_bf = encoder_forward(x, params, compute_dtype=jnp.bfloat16)
    mu_bf, lv_bf = jax.block_until_ready((mu_bf, lv_bf))
    mu_rb, lv_rb = reference_forward(x, params, compute_dtype=jnp.bfloat16)
    assert jnp.allclose(mu_bf, mu_rb, atol=2e-2, rtol=2e-2)
    assert jnp.allclose(lv_bf, lv_rb, atol=2e-2, rtol=2e-2)

    print("KERNEL_OK")
</pallas_src>

<mosaic_0001>
module attributes {stable_mosaic.version = 11 : i64} {
  func.func @encoder_kernel(%arg0: i32, %arg1: memref<256x784xf32, #tpu.memory_space<vmem>>, %arg2: memref<784x256xf32, #tpu.memory_space<vmem>>, %arg3: memref<1x256xf32, #tpu.memory_space<vmem>>, %arg4: memref<256x32xf32, #tpu.memory_space<vmem>>, %arg5: memref<1x32xf32, #tpu.memory_space<vmem>>, %arg6: memref<32x128xf32, #tpu.memory_space<vmem>>, %arg7: memref<1x128xf32, #tpu.memory_space<vmem>>, %arg8: memref<256x128xf32, #tpu.memory_space<vmem>>) attributes {dimension_semantics = [#tpu.dimension_semantics<parallel>], iteration_bounds = array<i64: 1>, scalar_prefetch = 0 : i64, scratch_operands = 0 : i64, tpu.core_type = #tpu.core_type<tc>, window_params = [{transform_indices = @transform_0, window_bounds = array<i64: 256, 784>}, {pipeline_mode = #tpu.pipeline_mode<synchronous>, transform_indices = @transform_1, window_bounds = array<i64: 784, 256>}, {pipeline_mode = #tpu.pipeline_mode<synchronous>, transform_indices = @transform_2, window_bounds = array<i64: 1, 256>}, {pipeline_mode = #tpu.pipeline_mode<synchronous>, transform_indices = @transform_3, window_bounds = array<i64: 256, 32>}, {pipeline_mode = #tpu.pipeline_mode<synchronous>, transform_indices = @transform_4, window_bounds = array<i64: 1, 32>}, {pipeline_mode = #tpu.pipeline_mode<synchronous>, transform_indices = @transform_5, window_bounds = array<i64: 32, 128>}, {pipeline_mode = #tpu.pipeline_mode<synchronous>, transform_indices = @transform_6, window_bounds = array<i64: 1, 128>}, {transform_indices = @transform_7, window_bounds = array<i64: 256, 128>}]} {
    %c0 = arith.constant 0 : index
    %c0_0 = arith.constant 0 : index
    %0 = vector.load %arg1[%c0, %c0_0] : memref<256x784xf32, #tpu.memory_space<vmem>>, vector<256x784xf32>
    %c0_1 = arith.constant 0 : index
    %c0_2 = arith.constant 0 : index
    %1 = vector.load %arg2[%c0_1, %c0_2] : memref<784x256xf32, #tpu.memory_space<vmem>>, vector<784x256xf32>
    %cst = arith.constant dense<0.000000e+00> : vector<256x256xf32>
    %2 = tpu.matmul %0, %1, %cst {dimension_numbers = #tpu.dot_dimension_numbers<[1], [0], [0], [1], [0, 0, 1, 1], [], []>} : vector<256x784xf32>, vector<784x256xf32>, vector<256x256xf32> -> vector<256x256xf32>
    %c0_3 = arith.constant 0 : index
    %c0_4 = arith.constant 0 : index
    %3 = vector.load %arg3[%c0_3, %c0_4] : memref<1x256xf32, #tpu.memory_space<vmem>>, vector<1x256xf32>
    %4 = vector.broadcast %3 : vector<1x256xf32> to vector<256x256xf32>
    %5 = arith.addf %2, %4 : vector<256x256xf32>
    %cst_5 = arith.constant 0.000000e+00 : f32
    %6 = vector.broadcast %cst_5 : f32 to vector<256x256xf32>
    %7 = arith.maximumf %5, %6 : vector<256x256xf32>
    %c0_6 = arith.constant 0 : index
    %c0_7 = arith.constant 0 : index
    %8 = vector.load %arg4[%c0_6, %c0_7] : memref<256x32xf32, #tpu.memory_space<vmem>>, vector<256x32xf32>
    %cst_8 = arith.constant dense<0.000000e+00> : vector<256x32xf32>
    %9 = tpu.matmul %7, %8, %cst_8 {dimension_numbers = #tpu.dot_dimension_numbers<[1], [0], [0], [1], [0, 0, 1, 1], [], []>} : vector<256x256xf32>, vector<256x32xf32>, vector<256x32xf32> -> vector<256x32xf32>
    %c0_9 = arith.constant 0 : index
    %c0_10 = arith.constant 0 : index
    %10 = vector.load %arg5[%c0_9, %c0_10] : memref<1x32xf32, #tpu.memory_space<vmem>>, vector<1x32xf32>
    %11 = vector.broadcast %10 : vector<1x32xf32> to vector<256x32xf32>
    %12 = arith.addf %9, %11 : vector<256x32xf32>
    %cst_11 = arith.constant 0.000000e+00 : f32
    %13 = vector.broadcast %cst_11 : f32 to vector<256x32xf32>
    %14 = arith.maximumf %12, %13 : vector<256x32xf32>
    %c0_12 = arith.constant 0 : index
    %c0_13 = arith.constant 0 : index
    %15 = vector.load %arg6[%c0_12, %c0_13] : memref<32x128xf32, #tpu.memory_space<vmem>>, vector<32x128xf32>
    %cst_14 = arith.constant dense<0.000000e+00> : vector<256x128xf32>
    %16 = tpu.matmul %14, %15, %cst_14 {dimension_numbers = #tpu.dot_dimension_numbers<[1], [0], [0], [1], [0, 0, 1, 1], [], []>} : vector<256x32xf32>, vector<32x128xf32>, vector<256x128xf32> -> vector<256x128xf32>
    %c0_15 = arith.constant 0 : index
    %c0_16 = arith.constant 0 : index
    %17 = vector.load %arg7[%c0_15, %c0_16] : memref<1x128xf32, #tpu.memory_space<vmem>>, vector<1x128xf32>
    %18 = vector.broadcast %17 : vector<1x128xf32> to vector<256x128xf32>
    %19 = arith.addf %16, %18 : vector<256x128xf32>
    %c0_17 = arith.constant 0 : index
    %c0_18 = arith.constant 0 : index
    %20 = vector.load %arg8[%c0_17, %c0_18] : memref<256x128xf32, #tpu.memory_space<vmem>>, vector<256x128xf32>
    tpu.vector_store %arg8[%c0_17, %c0_18], %19 {strides = array<i32>} : memref<256x128xf32, #tpu.memory_space<vmem>>, vector<256x128xf32>,
    return
  }
  func.func @transform_0(%arg0: i32) -> (i32, i32) {
    %c0_i32 = arith.constant 0 : i32
    %c0_i32_0 = arith.constant 0 : i32
    return %arg0, %c0_i32 : i32, i32
  }
  func.func @transform_1(%arg0: i32) -> (i32, i32) {
    %c0_i32 = arith.constant 0 : i32
    %c0_i32_0 = arith.constant 0 : i32
    %c0_i32_1 = arith.constant 0 : i32
    return %c0_i32, %c0_i32_0 : i32, i32
  }
  func.func @transform_2(%arg0: i32) -> (i32, i32) {
    %c0_i32 = arith.constant 0 : i32
    %c0_i32_0 = arith.constant 0 : i32
    %c0_i32_1 = arith.constant 0 : i32
    return %c0_i32, %c0_i32_0 : i32, i32
  }
  func.func @transform_3(%arg0: i32) -> (i32, i32) {
    %c0_i32 = arith.constant 0 : i32
    %c0_i32_0 = arith.constant 0 : i32
    %c0_i32_1 = arith.constant 0 : i32
    return %c0_i32, %c0_i32_0 : i32, i32
  }
  func.func @transform_4(%arg0: i32) -> (i32, i32) {
    %c0_i32 = arith.constant 0 : i32
    %c0_i32_0 = arith.constant 0 : i32
    %c0_i32_1 = arith.constant 0 : i32
    return %c0_i32, %c0_i32_0 : i32, i32
  }
  func.func @transform_5(%arg0: i32) -> (i32, i32) {
    %c0_i32 = arith.constant 0 : i32
    %c0_i32_0 = arith.constant 0 : i32
    %c0_i32_1 = arith.constant 0 : i32
    return %c0_i32, %c0_i32_0 : i32, i32
  }
  func.func @transform_6(%arg0: i32) -> (i32, i32) {
    %c0_i32 = arith.constant 0 : i32
    %c0_i32_0 = arith.constant 0 : i32
    %c0_i32_1 = arith.constant 0 : i32
    return %c0_i32, %c0_i32_0 : i32, i32
  }
  func.func @transform_7(%arg0: i32) -> (i32, i32) {
    %c0_i32 = arith.constant 0 : i32
    %c0_i32_0 = arith.constant 0 : i32
    return %arg0, %c0_i32 : i32, i32
  }
}

</mosaic_0001>

<bundles_post_ra>
// kernel: tpu_custom_call.1
= control target key start
LH: loop header
LB: loop body
LE: loop exit
PB: predicated region body
PF: predicated region fallthrough
CT: control target
= control target key end

     0   :  { %s6094_s0 = inlined_call_operand.vmem [shape: f32[256,784], index: 0, kind: input, shape index: {}]   ;;  %s6095_s1 = inlined_call_operand.vmem [shape: f32[784,256], index: 1, kind: input, shape index: {}]   ;;  %s6096_s2 = inlined_call_operand.vmem [shape: f32[1,256], index: 2, kind: input, shape index: {}]   ;;  %s6097_s3 = inlined_call_operand.vmem [shape: f32[256,32], index: 3, kind: input, shape index: {}]   ;;  %s6098_s4 = inlined_call_operand.vmem [shape: f32[1,32], index: 4, kind: input, shape index: {}]   ;;  %s6099_s5 = inlined_call_operand.vmem [shape: f32[32,128], index: 5, kind: input, shape index: {}]   ;;  %s6100_s6 = inlined_call_operand.vmem [shape: f32[1,128], index: 6, kind: input, shape index: {}]   ;;  %s6101_s7 = inlined_call_operand.hbm [shape: f32[256,128], index: 7, kind: output, shape index: {}]  }
   0x1   :  { %v281_v0 = vld [vmem:[%s6095_s1 + $0xf0] sm:$0xff]  ;;  %v279_v1 = vld [vmem:[%s6095_s1 + $0xe0] sm:$0xff] }
   0x2   :  { %2854 = vmatpush.msra.mxu1 %v281_v0  ;;  %2855 = vmatpush.msra.mxu2 %v281_v0  ;;  %v277_v2 = vld [vmem:[%s6095_s1 + $0xd0] sm:$0xff]  ;;  %v275_v3 = vld [vmem:[%s6095_s1 + $0xc0] sm:$0xff] }
   0x3   :  { %2856 = vmatpush.msra.mxu3 %v281_v0  ;;  %550 = vmatpush.msra.mxu0 %v281_v0  ;;  %v273_v4 = vld [vmem:[%s6095_s1 + $0xb0] sm:$0xff]  ;;  %v271_v5 = vld [vmem:[%s6095_s1 + $0xa0] sm:$0xff] }
   0x4   :  { %2857 = vmatpush.msra.mxu1 %v279_v1  ;;  %2858 = vmatpush.msra.mxu2 %v279_v1 }
   0x5   :  { %2859 = vmatpush.msra.mxu3 %v279_v1  ;;  %551 = vmatpush.msra.mxu0 %v279_v1 }
   0x6   :  { %2860 = vmatpush.msra.mxu1 %v277_v2  ;;  %2861 = vmatpush.msra.mxu2 %v277_v2 }
   0x7   :  { %2862 = vmatpush.msra.mxu3 %v277_v2  ;;  %552 = vmatpush.msra.mxu0 %v277_v2 }
   0x8   :  { %2863 = vmatpush.msra.mxu1 %v275_v3  ;;  %2864 = vmatpush.msra.mxu2 %v275_v3 }
   0x9   :  { %2865 = vmatpush.msra.mxu3 %v275_v3  ;;  %553 = vmatpush.msra.mxu0 %v275_v3 }
   0xa   :  { %2866 = vmatpush.msra.mxu1 %v273_v4  ;;  %2867 = vmatpush.msra.mxu2 %v273_v4 }
   0xb   :  { %12 = vsyncpa [#allocation3], 0  ;;  %2868 = vmatpush.msra.mxu3 %v273_v4  ;;  %v269_v6 = vld [vmem:[%s6095_s1 + $0x90] sm:$0xff]  ;;  %554 = vmatpush.msra.mxu0 %v273_v4  ;;  %v267_v7 = vld [vmem:[%s6095_s1 + $0x80] sm:$0xff]  ;;  %vm453_vm0 = vcmask 130048   ;;  %vm2498_vm1 = vcmask 261120  }
   0xc   :  { %2869 = vmatpush.msra.mxu1 %v271_v5  ;;  %2870 = vmatpush.msra.mxu2 %v271_v5  ;;  %v265_v8 = vld [vmem:[%s6095_s1 + $0x70] sm:$0xff]  ;;  %v263_v9 = vld [vmem:[%s6095_s1 + $0x60] sm:$0xff]  ;;  %v90_v28 = vld [vmem:[%s6094_s0 + $0x1f8] sm:$0xff]  ;;  %s2746_s29 = sshll.u32 %s6101_s7, 4  ;;  %s3152_s30 = smov 128   ;;  %s2747_s29 = int_to_ptr.hbm [resolvable:$true] %s2746_s29 }
   0xd   :  { %2871 = vmatpush.msra.mxu3 %v271_v5  ;;  %555 = vmatpush.msra.mxu0 %v271_v5  ;;  %v261_v10 = vld [vmem:[%s6095_s1 + $0x50] sm:$0xff]  ;;  %v259_v11 = vld [vmem:[%s6095_s1 + $0x40] sm:$0xff]  ;;  %v146_v29 = vld [vmem:[%s6094_s0 + $0x3b8] sm:$0xff] }
   0xe   :  { %2872 = vmatpush.msra.mxu1 %v269_v6  ;;  %2873 = vmatpush.msra.mxu2 %v269_v6  ;;  %v257_v12 = vld [vmem:[%s6095_s1 + $0x30] sm:$0xff]  ;;  %v255_v13 = vld [vmem:[%s6095_s1 + $0x20] sm:$0xff]  ;;  %v202_v32 = vld [vmem:[%s6094_s0 + $0x578] sm:$0xff] }
   0xf   :  { %2874 = vmatpush.msra.mxu3 %v269_v6  ;;  %556 = vmatpush.msra.mxu0 %v269_v6  ;;  %v253_v14 = vld [vmem:[%s6095_s1 + $0x10] sm:$0xff]  ;;  %v251_v15 = vld [vmem:[%s6095_s1] sm:$0xff]  ;;  %v34_v33 = vld [vmem:[%s6094_s0 + $0x38] sm:$0xff] }
  0x10   :  { %2875 = vmatpush.msra.mxu1 %v267_v7  ;;  %2876 = vmatpush.msra.mxu2 %v267_v7  ;;  %v83_v16 = vld [vmem:[%s6094_s0 + $0x1c0] sm:$0xff]  ;;  %v313_v18 = vld [vmem:[%s6095_s1 + $0x1f0] sm:$0xff]  ;;  %v104_v59 = vld [vmem:[%s6094_s0 + $0x268] sm:$0xff] }
  0x11   :  { %2877 = vmatpush.msra.mxu3 %v267_v7  ;;  %557 = vmatpush.msra.mxu0 %v267_v7  ;;  %v139_v17 = vld [vmem:[%s6094_s0 + $0x380] sm:$0xff]  ;;  %v345_v22 = vld [vmem:[%s6095_s1 + $0x2f0] sm:$0xff]  ;;  %v160_v60 = vld [vmem:[%s6094_s0 + $0x428] sm:$0xff] }
  0x12   :  { %2878 = vmatpush.msra.mxu1 %v265_v8  ;;  %2879 = vmatpush.msra.mxu2 %v265_v8  ;;  %v195_v19 = vld [vmem:[%s6094_s0 + $0x540] sm:$0xff]  ;;  %v309_v23 = vld [vmem:[%s6095_s1 + $0x1d0] sm:$0xff]  ;;  %v216_v63 = vld [vmem:[%s6094_s0 + $0x5e8] sm:$0xff] }
  0x13   :  { %2880 = vmatpush.msra.mxu3 %v265_v8  ;;  %558 = vmatpush.msra.mxu0 %v265_v8  ;;  %v311_v20 = vld [vmem:[%s6095_s1 + $0x1e0] sm:$0xff]  ;;  %v377_v24 = vld [vmem:[%s6095_s1 + $0x3f0] sm:$0xff]  ;;  %v48_v1 = vld [vmem:[%s6094_s0 + $0xa8] sm:$0xff] }
  0x14   :  { %2881 = vmatpush.msra.mxu1 %v263_v9  ;;  %2882 = vmatpush.msra.mxu2 %v263_v9  ;;  %v27_v21 = vld [vmem:[%s6094_s0] sm:$0xff]  ;;  %v305_v30 = vld [vmem:[%s6095_s1 + $0x1b0] sm:$0xff] }
  0x15   :  { %2883 = vmatpush.msra.mxu3 %v263_v9  ;;  %559 = vmatpush.msra.mxu0 %v263_v9  ;;  %v343_v25 = vld [vmem:[%s6095_s1 + $0x2e0] sm:$0xff]  ;;  %v341_v31 = vld [vmem:[%s6095_s1 + $0x2d0] sm:$0xff] }
  0x16   :  { %2884 = vmatpush.msra.mxu1 %v261_v10  ;;  %2885 = vmatpush.msra.mxu2 %v261_v10  ;;  %v375_v26 = vld [vmem:[%s6095_s1 + $0x3e0] sm:$0xff]  ;;  %v373_v36 = vld [vmem:[%s6095_s1 + $0x3d0] sm:$0xff] }
  0x17   :  { %2886 = vmatpush.msra.mxu3 %v261_v10  ;;  %560 = vmatpush.msra.mxu0 %v261_v10  ;;  %v307_v27 = vld [vmem:[%s6095_s1 + $0x1c0] sm:$0xff]  ;;  %v301_v37 = vld [vmem:[%s6095_s1 + $0x190] sm:$0xff] }
  0x18   :  { %2887 = vmatpush.msra.mxu1 %v259_v11  ;;  %2888 = vmatpush.msra.mxu2 %v259_v11  ;;  %v303_v34 = vld [vmem:[%s6095_s1 + $0x1a0] sm:$0xff]  ;;  %v409_v38 = vld [vmem:[%s6095_s1 + $0x4f0] sm:$0xff] }
  0x19   :  { %2889 = vmatpush.msra.mxu3 %v259_v11  ;;  %561 = vmatpush.msra.mxu0 %v259_v11  ;;  %v339_v35 = vld [vmem:[%s6095_s1 + $0x2c0] sm:$0xff]  ;;  %v337_v39 = vld [vmem:[%s6095_s1 + $0x2b0] sm:$0xff] }
  0x1a   :  { %2890 = vmatpush.msra.mxu1 %v257_v12  ;;  %2891 = vmatpush.msra.mxu2 %v257_v12  ;;  %v371_v40 = vld [vmem:[%s6095_s1 + $0x3c0] sm:$0xff]  ;;  %v97_v43 = vld [vmem:[%s6094_s0 + $0x230] sm:$0xff] }
  0x1b   :  { %2892 = vmatpush.msra.mxu3 %v257_v12  ;;  %562 = vmatpush.msra.mxu0 %v257_v12  ;;  %v299_v41 = vld [vmem:[%s6095_s1 + $0x180] sm:$0xff]  ;;  %v153_v44 = vld [vmem:[%s6094_s0 + $0x3f0] sm:$0xff] }
  0x1c   :  { %2893 = vmatpush.msra.mxu1 %v255_v13  ;;  %2894 = vmatpush.msra.mxu2 %v255_v13  ;;  %v407_v42 = vld [vmem:[%s6095_s1 + $0x4e0] sm:$0xff]  ;;  %v297_v45 = vld [vmem:[%s6095_s1 + $0x170] sm:$0xff] }
  0x1d   :  { %2895 = vmatpush.msra.mxu3 %v255_v13  ;;  %563 = vmatpush.msra.mxu0 %v255_v13  ;;  %v335_v46 = vld [vmem:[%s6095_s1 + $0x2a0] sm:$0xff]  ;;  %v209_v47 = vld [vmem:[%s6094_s0 + $0x5b0] sm:$0xff] }
  0x1e   :  { %2896 = vmatpush.msra.mxu1 %v253_v14  ;;  %2897 = vmatpush.msra.mxu2 %v253_v14  ;;  %v405_v48 = vld [vmem:[%s6095_s1 + $0x4d0] sm:$0xff]  ;;  %v295_v50 = vld [vmem:[%s6095_s1 + $0x160] sm:$0xff] }
  0x1f   :  { %2898 = vmatpush.msra.mxu3 %v253_v14  ;;  %564 = vmatpush.msra.mxu0 %v253_v14  ;;  %v41_v49 = vld [vmem:[%s6094_s0 + $0x70] sm:$0xff]  ;;  %v403_v54 = vld [vmem:[%s6095_s1 + $0x4c0] sm:$0xff] }
  0x20   :  { %2899 = vmatpush.msra.mxu1 %v251_v15  ;;  %2900 = vmatpush.msra.mxu2 %v251_v15  ;;  %v369_v51 = vld [vmem:[%s6095_s1 + $0x3b0] sm:$0xff]  ;;  %v367_v55 = vld [vmem:[%s6095_s1 + $0x3a0] sm:$0xff] }
  0x21   :  { %590 = vmatmul.f32.vlgmr.msra.gmra.mxu1 %v83_v16  ;;  %614 = vmatmul.f32.vlgmr.msra.gmra.mxu2 %v139_v17  ;;  %v333_v52 = vld [vmem:[%s6095_s1 + $0x290] sm:$0xff]  ;;  %v331_v56 = vld [vmem:[%s6095_s1 + $0x280] sm:$0xff] }
  0x22   :  { %663 = vmatpush.msrb.mxu1 %v313_v18  ;;  %2901 = vmatpush.msra.mxu3 %v251_v15  ;;  %v293_v53 = vld [vmem:[%s6095_s1 + $0x150] sm:$0xff]  ;;  %v291_v57 = vld [vmem:[%s6095_s1 + $0x140] sm:$0xff] }
  0x23   :  { %638 = vmatmul.f32.vlgmr.msra.gmra.mxu3 %v195_v19  ;;  %565 = vmatpush.msra.mxu0 %v251_v15  ;;  %v401_v58 = vld [vmem:[%s6095_s1 + $0x4b0] sm:$0xff]  ;;  %v363_v2 = vld [vmem:[%s6095_s1 + $0x380] sm:$0xff] }
  0x24   :  { %664 = vmatpush.msrb.mxu1 %v311_v20  ;;  %566 = vmatmul.f32.vlgmr.msra.gmra.mxu0 %v27_v21  ;;  %v365_v61 = vld [vmem:[%s6095_s1 + $0x390] sm:$0xff]  ;;  %v327_v3 = vld [vmem:[%s6095_s1 + $0x260] sm:$0xff] }
  0x25   :  { %776 = vmatpush.msrb.mxu2 %v345_v22  ;;  %889 = vmatpush.msrb.mxu3 %v377_v24  ;;  %v289_v62 = vld [vmem:[%s6095_s1 + $0x130] sm:$0xff]  ;;  %v287_v4 = vld [vmem:[%s6095_s1 + $0x120] sm:$0xff] }
  0x26   :  { %665 = vmatpush.msrb.mxu1 %v309_v23  ;;  %1002 = vmatpush.msrb.mxu0 %v409_v38  ;;  %v329_v0 = vld [vmem:[%s6095_s1 + $0x270] sm:$0xff]  ;;  %v399_v6 = vld [vmem:[%s6095_s1 + $0x4a0] sm:$0xff] }
  0x27   :  { %777 = vmatpush.msrb.mxu2 %v343_v25  ;;  %890 = vmatpush.msrb.mxu3 %v375_v26  ;;  %v361_v5 = vld [vmem:[%s6095_s1 + $0x370] sm:$0xff]  ;;  %v359_v9 = vld [vmem:[%s6095_s1 + $0x360] sm:$0xff] }
  0x28   :  { %666 = vmatpush.msrb.mxu1 %v307_v27  ;;  %1003 = vmatpush.msrb.mxu0 %v407_v42  ;;  %v325_v7 = vld [vmem:[%s6095_s1 + $0x250] sm:$0xff]  ;;  %v111_v11 = vld [vmem:[%s6094_s0 + $0x2a0] sm:$0xff]  ;;  %v118_v27 = vld [vmem:[%s6094_s0 + $0x2d8] sm:$0xff] }
  0x29   :  { %593 = vmatmul.f32.gmra.mxu1 %v90_v28  ;;  %617 = vmatmul.f32.gmra.mxu2 %v146_v29  ;;  %v285_v8 = vld [vmem:[%s6095_s1 + $0x110] sm:$0xff]  ;;  %v167_v12 = vld [vmem:[%s6094_s0 + $0x460] sm:$0xff]  ;;  %v174_v28 = vld [vmem:[%s6094_s0 + $0x498] sm:$0xff] }
  0x2a   :  { %667 = vmatpush.msrb.mxu1 %v305_v30  ;;  %778 = vmatpush.msrb.mxu2 %v341_v31  ;;  %v397_v10 = vld [vmem:[%s6095_s1 + $0x490] sm:$0xff]  ;;  %v323_v13 = vld [vmem:[%s6095_s1 + $0x240] sm:$0xff]  ;;  %v230_v31 = vld [vmem:[%s6094_s0 + $0x658] sm:$0xff] }
  0x2b   :  { %641 = vmatmul.f32.gmra.mxu3 %v202_v32  ;;  %1004 = vmatpush.msrb.mxu0 %v405_v48  ;;  %v357_v14 = vld [vmem:[%s6095_s1 + $0x350] sm:$0xff]  ;;  %v223_v15 = vld [vmem:[%s6094_s0 + $0x620] sm:$0xff]  ;;  %v244_v48 = vld [vmem:[%s6094_s0 + $0x6c8] sm:$0xff] }
  0x2c   :  { %569 = vmatmul.f32.gmra.mxu0 %v34_v33  ;;  %668 = vmatpush.msrb.mxu1 %v303_v34  ;;  %v395_v16 = vld [vmem:[%s6095_s1 + $0x480] sm:$0xff]  ;;  %v321_v18 = vld [vmem:[%s6095_s1 + $0x230] sm:$0xff]  ;;  %v62_v33 = vld [vmem:[%s6094_s0 + $0x118] sm:$0xff] }
  0x2d   :  { %779 = vmatpush.msrb.mxu2 %v339_v35  ;;  %891 = vmatpush.msrb.mxu3 %v373_v36  ;;  %v55_v17 = vld [vmem:[%s6094_s0 + $0xe0] sm:$0xff]  ;;  %v393_v20 = vld [vmem:[%s6095_s1 + $0x470] sm:$0xff] }
  0x2e   :  { %669 = vmatpush.msrb.mxu1 %v301_v37  ;;  %1005 = vmatpush.msrb.mxu0 %v403_v54  ;;  %v355_v19 = vld [vmem:[%s6095_s1 + $0x340] sm:$0xff]  ;;  %v353_v23 = vld [vmem:[%s6095_s1 + $0x330] sm:$0xff] }
  0x2f   :  { %780 = vmatpush.msrb.mxu2 %v337_v39  ;;  %892 = vmatpush.msrb.mxu3 %v371_v40  ;;  %v319_v21 = vld [vmem:[%s6095_s1 + $0x220] sm:$0xff]  ;;  %v317_v25 = vld [vmem:[%s6095_s1 + $0x210] sm:$0xff] }
  0x30   :  { %670 = vmatpush.msrb.mxu1 %v299_v41  ;;  %1006 = vmatpush.msrb.mxu0 %v401_v58  ;;  %v283_v22 = vld [vmem:[%s6095_s1 + $0x100] sm:$0xff]  ;;  %v441_v26 = vld [vmem:[%s6095_s1 + $0x5f0] sm:$0xff]  ;;  %v38_v58 = vld [vmem:[%s6094_s0 + $0x58] sm:$0xff] }
  0x31   :  { %596 = vmatmul.f32.gmra.mxu1 %v97_v43  ;;  %620 = vmatmul.f32.gmra.mxu2 %v153_v44  ;;  %v391_v24 = vld [vmem:[%s6095_s1 + $0x460] sm:$0xff]  ;;  %v389_v32 = vld [vmem:[%s6095_s1 + $0x450] sm:$0xff] }
  0x32   :  { %671 = vmatpush.msrb.mxu1 %v297_v45  ;;  %781 = vmatpush.msrb.mxu2 %v335_v46  ;;  %v351_v29 = vld [vmem:[%s6095_s1 + $0x320] sm:$0xff]  ;;  %v349_v34 = vld [vmem:[%s6095_s1 + $0x310] sm:$0xff]  ;;  %v132_v46 = vld [vmem:[%s6094_s0 + $0x348] sm:$0xff] }
  0x33   :  { %644 = vmatmul.f32.gmra.mxu3 %v209_v47  ;;  %1007 = vmatpush.msrb.mxu0 %v399_v6  ;;  %v315_v30 = vld [vmem:[%s6095_s1 + $0x200] sm:$0xff]  ;;  %v385_v37 = vld [vmem:[%s6095_s1 + $0x430] sm:$0xff]  ;;  %v188_v47 = vld [vmem:[%s6094_s0 + $0x508] sm:$0xff] }
  0x34   :  { %572 = vmatmul.f32.gmra.mxu0 %v41_v49  ;;  %672 = vmatpush.msrb.mxu1 %v295_v50  ;;  %v387_v35 = vld [vmem:[%s6095_s1 + $0x440] sm:$0xff]  ;;  %v125_v38 = vld [vmem:[%s6094_s0 + $0x310] sm:$0xff]  ;;  %v76_v49 = vld [vmem:[%s6094_s0 + $0x188] sm:$0xff] }
  0x35   :  { %893 = vmatpush.msrb.mxu3 %v369_v51  ;;  %782 = vmatpush.msrb.mxu2 %v333_v52  ;;  %v347_v36 = vld [vmem:[%s6095_s1 + $0x300] sm:$0xff]  ;;  %v181_v39 = vld [vmem:[%s6094_s0 + $0x4d0] sm:$0xff]  ;;  %v28_v50 = vld [vmem:[%s6094_s0 + $0x8] sm:$0xff] }
  0x36   :  { %673 = vmatpush.msrb.mxu1 %v293_v53  ;;  %1008 = vmatpush.msrb.mxu0 %v397_v10  ;;  %v383_v40 = vld [vmem:[%s6095_s1 + $0x420] sm:$0xff]  ;;  %v237_v41 = vld [vmem:[%s6094_s0 + $0x690] sm:$0xff]  ;;  %v30_v52 = vld [vmem:[%s6094_s0 + $0x18] sm:$0xff] }
  0x37   :  { %894 = vmatpush.msrb.mxu3 %v367_v55  ;;  %783 = vmatpush.msrb.mxu2 %v331_v56  ;;  %v69_v42 = vld [vmem:[%s6094_s0 + $0x150] sm:$0xff]  ;;  %v439_v43 = vld [vmem:[%s6095_s1 + $0x5e0] sm:$0xff]  ;;  %v36_v56 = vld [vmem:[%s6094_s0 + $0x48] sm:$0xff] }
  0x38   :  { %674 = vmatpush.msrb.mxu1 %v291_v57  ;;  %1009 = vmatpush.msrb.mxu0 %v395_v16  ;;  %v381_v44 = vld [vmem:[%s6095_s1 + $0x410] sm:$0xff]  ;;  %v379_v45 = vld [vmem:[%s6095_s1 + $0x400] sm:$0xff]  ;;  %v58_v6 = vld [vmem:[%s6094_s0 + $0xf8] sm:$0xff] }
  0x39   :  { %599 = vmatmul.f32.gmra.mxu1 %v104_v59  ;;  %623 = vmatmul.f32.gmra.mxu2 %v160_v60  ;;  %v29_v51 = vld [vmem:[%s6094_s0 + $0x10] sm:$0xff]  ;;  %v31_v53 = vld [vmem:[%s6094_s0 + $0x20] sm:$0xff]  ;;  %v42_v59 = vld [vmem:[%s6094_s0 + $0x78] sm:$0xff] }
  0x3a   :  { %895 = vmatpush.msrb.mxu3 %v365_v61  ;;  %675 = vmatpush.msrb.mxu1 %v289_v62  ;;  %v437_v54 = vld [vmem:[%s6095_s1 + $0x5d0] sm:$0xff]  ;;  %v35_v55 = vld [vmem:[%s6094_s0 + $0x40] sm:$0xff]  ;;  %v44_v61 = vld [vmem:[%s6094_s0 + $0x88] sm:$0xff] }
  0x3b   :  { %647 = vmatmul.f32.gmra.mxu3 %v216_v63  ;;  %784 = vmatpush.msrb.mxu2 %v329_v0  ;;  %v37_v57 = vld [vmem:[%s6094_s0 + $0x50] sm:$0xff]  ;;  %v43_v60 = vld [vmem:[%s6094_s0 + $0x80] sm:$0xff]  ;;  %v64_v10 = vld [vmem:[%s6094_s0 + $0x128] sm:$0xff] }
  0x3c   :  { %575 = vmatmul.f32.gmra.mxu0 %v48_v1  ;;  %896 = vmatpush.msrb.mxu3 %v363_v2  ;;  %v45_v62 = vld [vmem:[%s6094_s0 + $0x90] sm:$0xff]  ;;  %v435_v63 = vld [vmem:[%s6095_s1 + $0x5c0] sm:$0xff]  ;;  %v50_v1 = vld [vmem:[%s6094_s0 + $0xb8] sm:$0xff] }
  0x3d   :  { %785 = vmatpush.msrb.mxu2 %v327_v3  ;;  %676 = vmatpush.msrb.mxu1 %v287_v4  ;;  %v49_v0 = vld [vmem:[%s6094_s0 + $0xb0] sm:$0xff]  ;;  %v51_v2 = vld [vmem:[%s6094_s0 + $0xc0] sm:$0xff]  ;;  %v52_v3 = vld [vmem:[%s6094_s0 + $0xc8] sm:$0xff] }
  0x3e   :  { %897 = vmatpush.msrb.mxu3 %v361_v5  ;;  %1010 = vmatpush.msrb.mxu0 %v393_v20  ;;  %v56_v4 = vld [vmem:[%s6094_s0 + $0xe8] sm:$0xff]  ;;  %v57_v5 = vld [vmem:[%s6094_s0 + $0xf0] sm:$0xff]  ;;  %v79_v20 = vld [vmem:[%s6094_s0 + $0x1a0] sm:$0xff] }
  0x3f   :  { %786 = vmatpush.msrb.mxu2 %v325_v7  ;;  %677 = vmatpush.msrb.mxu1 %v285_v8  ;;  %v59_v7 = vld [vmem:[%s6094_s0 + $0x100] sm:$0xff]  ;;  %v433_v8 = vld [vmem:[%s6095_s1 + $0x5b0] sm:$0xff] }
  0x40   :  { %898 = vmatpush.msrb.mxu3 %v359_v9  ;;  %1011 = vmatpush.msrb.mxu0 %v391_v24  ;;  %v63_v9 = vld [vmem:[%s6094_s0 + $0x120] sm:$0xff]  ;;  %v73_v16 = vld [vmem:[%s6094_s0 + $0x170] sm:$0xff] }
  0x41   :  { %602 = vmatmul.f32.gmra.mxu1 %v111_v11  ;;  %626 = vmatmul.f32.gmra.mxu2 %v167_v12  ;;  %v65_v11 = vld [vmem:[%s6094_s0 + $0x130] sm:$0xff]  ;;  %v66_v12 = vld [vmem:[%s6094_s0 + $0x138] sm:$0xff] }
  0x42   :  { %787 = vmatpush.msrb.mxu2 %v323_v13  ;;  %899 = vmatpush.msrb.mxu3 %v357_v14  ;;  %v70_v13 = vld [vmem:[%s6094_s0 + $0x158] sm:$0xff]  ;;  %v71_v14 = vld [vmem:[%s6094_s0 + $0x160] sm:$0xff]  ;;  %v85_v24 = vld [vmem:[%s6094_s0 + $0x1d0] sm:$0xff] }
  0x43   :  { %650 = vmatmul.f32.gmra.mxu3 %v223_v15  ;;  %678 = vmatpush.msrb.mxu1 %v283_v22  ;;  %v72_v15 = vld [vmem:[%s6094_s0 + $0x168] sm:$0xff] }
  0x44   :  { %578 = vmatmul.f32.gmra.mxu0 %v55_v17  ;;  %788 = vmatpush.msrb.mxu2 %v321_v18  ;;  %v431_v17 = vld [vmem:[%s6095_s1 + $0x5a0] sm:$0xff]  ;;  %v77_v18 = vld [vmem:[%s6094_s0 + $0x190] sm:$0xff] }
  0x45   :  { %900 = vmatpush.msrb.mxu3 %v355_v19  ;;  %1115 = vmatpush.msra.mxu1 %v441_v26  ;;  %v78_v19 = vld [vmem:[%s6094_s0 + $0x198] sm:$0xff] }
  0x46   :  { %789 = vmatpush.msrb.mxu2 %v319_v21  ;;  %1012 = vmatpush.msrb.mxu0 %v389_v32  ;;  %v80_v21 = vld [vmem:[%s6094_s0 + $0x1a8] sm:$0xff]  ;;  %v86_v26 = vld [vmem:[%s6094_s0 + $0x1d8] sm:$0xff] }
  0x47   :  { %901 = vmatpush.msrb.mxu3 %v353_v23  ;;  %1116 = vmatpush.msra.mxu1 %v439_v43  ;;  %v84_v23 = vld [vmem:[%s6094_s0 + $0x1c8] sm:$0xff] }
  0x48   :  { %790 = vmatpush.msrb.mxu2 %v317_v25  ;;  %1013 = vmatpush.msrb.mxu0 %v387_v35  ;;  %v447_v25 = vld [vmem:[%s6096_s2] sm:$0x3] }
  0x49   :  { %605 = vmatmul.f32.gmra.mxu1 %v118_v27  ;;  %629 = vmatmul.f32.gmra.mxu2 %v174_v28  ;;  %v87_v28 = vld [vmem:[%s6094_s0 + $0x1e0] sm:$0xff] }
  0x4a   :  { %902 = vmatpush.msrb.mxu3 %v351_v29  ;;  %791 = vmatpush.msrb.mxu2 %v315_v30  ;;  %v429_v29 = vld [vmem:[%s6095_s1 + $0x590] sm:$0xff]  ;;  %v3666_v30 = vperm.slane %v447_v25, 0  ;;  %v91_v35 = vld [vmem:[%s6094_s0 + $0x200] sm:$0xff] }
  0x4b   :  { %653 = vmatmul.f32.gmra.mxu3 %v230_v31  ;;  %1014 = vmatpush.msrb.mxu0 %v385_v37 }
  0x4c   :  { %581 = vmatmul.f32.gmra.mxu0 %v62_v33  ;;  %903 = vmatpush.msrb.mxu3 %v349_v34 }
  0x4d   :  { %1015 = vmatpush.msrb.mxu0 %v383_v40  ;;  %1117 = vmatpush.msra.mxu1 %v437_v54  ;;  %v94_v40 = vld [vmem:[%s6094_s0 + $0x218] sm:$0xff] }
  0x4e   :  { %904 = vmatpush.msrb.mxu3 %v347_v36  ;;  %v92_v36 = vld [vmem:[%s6094_s0 + $0x208] sm:$0xff] }
  0x4f   :  { %1016 = vmatpush.msrb.mxu0 %v381_v44  ;;  %1118 = vmatpush.msra.mxu1 %v435_v63 }
  0x51   :  { %608 = vmatmul.f32.gmra.mxu1 %v125_v38  ;;  %632 = vmatmul.f32.gmra.mxu2 %v181_v39  ;;  %v93_v38 = vld [vmem:[%s6094_s0 + $0x210] sm:$0xff] }
  0x52   :  { %1017 = vmatpush.msrb.mxu0 %v379_v45  ;;  %1119 = vmatpush.msra.mxu1 %v433_v8  ;;  %v98_v45 = vld [vmem:[%s6094_s0 + $0x238] sm:$0xff]  ;;  %v425_v8 = vld [vmem:[%s6095_s1 + $0x570] sm:$0xff] }
  0x53   :  { %656 = vmatmul.f32.gmra.mxu3 %v237_v41 }
  0x54   :  { %584 = vmatmul.f32.gmra.mxu0 %v69_v42  ;;  %1120 = vmatpush.msra.mxu1 %v431_v17 }
  0x56   :  { %1121 = vmatpush.msra.mxu1 %v429_v29 }
  0x59   :  { %611 = vmatmul.f32.gmra.mxu1 %v132_v46  ;;  %635 = vmatmul.f32.gmra.mxu2 %v188_v47  ;;  %v99_v46 = vld [vmem:[%s6094_s0 + $0x240] sm:$0xff] }
  0x5b   :  { %659 = vmatmul.f32.gmra.mxu3 %v244_v48  ;;  %v100_v48 = vld [vmem:[%s6094_s0 + $0x248] sm:$0xff] }
  0x5c   :  { %587 = vmatmul.f32.gmra.mxu0 %v76_v49 }
  0x61   :  { %679 = vmatmul.f32.vlgmr.msrb.gmra.mxu1 %v28_v50  ;;  %792 = vmatmul.f32.vlgmr.msrb.gmra.mxu2 %v29_v51  ;;  %v101_v50 = vld [vmem:[%s6094_s0 + $0x250] sm:$0xff]  ;;  %v427_v51 = vld [vmem:[%s6095_s1 + $0x580] sm:$0xff] }
  0x62   :  { %1122 = vmatpush.msra.mxu1 %v427_v51  ;;  %v135_v51 = vld [vmem:[%s6094_s0 + $0x360] sm:$0xff] }
  0x63   :  { %905 = vmatmul.f32.vlgmr.msrb.gmra.mxu3 %v30_v52 }
  0x64   :  { %1018 = vmatmul.f32.vlgmr.msrb.gmra.mxu0 %v31_v53  ;;  %1123 = vmatpush.msra.mxu1 %v425_v8  ;;  %v143_v8 = vld [vmem:[%s6094_s0 + $0x3a0] sm:$0xff] }
  0x69   :  { %682 = vmatmul.f32.gmra.mxu1 %v35_v55  ;;  %795 = vmatmul.f32.gmra.mxu2 %v36_v56  ;;  %v105_v56 = vld [vmem:[%s6094_s0 + $0x270] sm:$0xff] }
  0x6b   :  { %908 = vmatmul.f32.gmra.mxu3 %v37_v57  ;;  %v106_v57 = vld [vmem:[%s6094_s0 + $0x278] sm:$0xff] }
  0x6c   :  { %1021 = vmatmul.f32.gmra.mxu0 %v38_v58 }
  0x71   :  { %685 = vmatmul.f32.gmra.mxu1 %v42_v59  ;;  %798 = vmatmul.f32.gmra.mxu2 %v43_v60  ;;  %v107_v59 = vld [vmem:[%s6094_s0 + $0x280] sm:$0xff] }
  0x73   :  { %911 = vmatmul.f32.gmra.mxu3 %v44_v61  ;;  %v108_v61 = vld [vmem:[%s6094_s0 + $0x288] sm:$0xff] }
  0x74   :  { %1024 = vmatmul.f32.gmra.mxu0 %v45_v62 }
  0x79   :  { %688 = vmatmul.f32.gmra.mxu1 %v49_v0  ;;  %801 = vmatmul.f32.gmra.mxu2 %v50_v1 }
  0x7b   :  { %914 = vmatmul.f32.gmra.mxu3 %v51_v2  ;;  %v112_v2 = vld [vmem:[%s6094_s0 + $0x2a8] sm:$0xff] }
  0x7c   :  { %1027 = vmatmul.f32.gmra.mxu0 %v52_v3  ;;  %v113_v3 = vld [vmem:[%s6094_s0 + $0x2b0] sm:$0xff] }
  0x81   :  { %691 = vmatmul.f32.gmra.mxu1 %v56_v4  ;;  %804 = vmatmul.f32.gmra.mxu2 %v57_v5  ;;  %v114_v5 = vld [vmem:[%s6094_s0 + $0x2b8] sm:$0xff] }
  0x83   :  { %917 = vmatmul.f32.gmra.mxu3 %v58_v6 }
  0x84   :  { %1030 = vmatmul.f32.gmra.mxu0 %v59_v7  ;;  %v115_v7 = vld [vmem:[%s6094_s0 + $0x2c0] sm:$0xff] }
  0x89   :  { %694 = vmatmul.f32.gmra.mxu1 %v63_v9  ;;  %807 = vmatmul.f32.gmra.mxu2 %v64_v10  ;;  %v445_v9 = vld [vmem:[%s6095_s1 + $0x610] sm:$0xff]  ;;  %v282_v10 = vld [vmem:[%s6095_s1 + $0xf8] sm:$0xff] }
  0x8a   :  { %1242 = vmatpush.msra.mxu2 %v445_v9  ;;  %1341 = vmatpush.msra.mxu3 %v282_v10  ;;  %v421_v9 = vld [vmem:[%s6095_s1 + $0x550] sm:$0xff]  ;;  %v278_v10 = vld [vmem:[%s6095_s1 + $0xd8] sm:$0xff] }
  0x8b   :  { %920 = vmatmul.f32.gmra.mxu3 %v65_v11 }
  0x8c   :  { %1033 = vmatmul.f32.gmra.mxu0 %v66_v12 }
  0x91   :  { %697 = vmatmul.f32.gmra.mxu1 %v70_v13  ;;  %810 = vmatmul.f32.gmra.mxu2 %v71_v14 }
  0x93   :  { %923 = vmatmul.f32.gmra.mxu3 %v72_v15  ;;  %v119_v15 = vld [vmem:[%s6094_s0 + $0x2e0] sm:$0xff] }
  0x94   :  { %1036 = vmatmul.f32.gmra.mxu0 %v73_v16  ;;  %v120_v16 = vld [vmem:[%s6094_s0 + $0x2e8] sm:$0xff] }
  0x99   :  { %700 = vmatmul.f32.gmra.mxu1 %v77_v18  ;;  %813 = vmatmul.f32.gmra.mxu2 %v78_v19  ;;  %v121_v18 = vld [vmem:[%s6094_s0 + $0x2f0] sm:$0xff] }
  0x9b   :  { %926 = vmatmul.f32.gmra.mxu3 %v79_v20  ;;  %v122_v20 = vld [vmem:[%s6094_s0 + $0x2f8] sm:$0xff] }
  0x9c   :  { %1039 = vmatmul.f32.gmra.mxu0 %v80_v21 }
  0x9e   :  { %v3644_v22 = vpop.f32.mrf.mxu1 }
  0xa1   :  { %703 = vmatmul.f32.gmra.mxu1 %v84_v23  ;;  %816 = vmatmul.f32.gmra.mxu2 %v85_v24  ;;  %v3658_v27 = vpop.f32.mrf.mxu0 }
  0xa3   :  { %929 = vmatmul.f32.gmra.mxu3 %v86_v26  ;;  %v126_v26 = vld [vmem:[%s6094_s0 + $0x318] sm:$0xff] }
  0xa4   :  { %v615_v31 = vpop.f32.mrf.mxu2  ;;  %1042 = vmatmul.f32.gmra.mxu0 %v87_v28  ;;  %v127_v28 = vld [vmem:[%s6094_s0 + $0x320] sm:$0xff] }
  0xa5   :  { %v3669_v32 = vadd.f32 %v615_v31, %v3666_v30  ;;  %v128_v31 = vld [vmem:[%s6094_s0 + $0x328] sm:$0xff] }
  0xa6   :  { %v3671_v33 = vpop.f32.mrf.mxu1  ;;  %v639_v34 = vpop.f32.mrf.mxu3 }
  0xa7   :  { %v3680_v37 = vadd.f32 %v639_v34, %v3666_v30 }
  0xa9   :  { %706 = vmatmul.f32.gmra.mxu1 %v91_v35  ;;  %819 = vmatmul.f32.gmra.mxu2 %v92_v36  ;;  %v3685_v39 = vpop.f32.mrf.mxu0  ;;  %v129_v35 = vld [vmem:[%s6094_s0 + $0x330] sm:$0xff]  ;;  %v423_v36 = vld [vmem:[%s6095_s1 + $0x560] sm:$0xff] }
  0xaa   :  { %1124 = vmatpush.msra.mxu1 %v423_v36 }
  0xab   :  { %932 = vmatmul.f32.gmra.mxu3 %v93_v38  ;;  %v280_v38 = vld [vmem:[%s6095_s1 + $0xe8] sm:$0xff] }
  0xac   :  { %v618_v41 = vpop.f32.mrf.mxu2  ;;  %1045 = vmatmul.f32.gmra.mxu0 %v94_v40  ;;  %1342 = vmatpush.msra.mxu3 %v280_v38 }
  0xad   :  { %v3691_v42 = vadd.f32 %v618_v41, %v3666_v30  ;;  %1125 = vmatpush.msra.mxu1 %v421_v9 }
  0xae   :  { %v3693_v43 = vpop.f32.mrf.mxu1  ;;  %v642_v44 = vpop.f32.mrf.mxu3  ;;  %1343 = vmatpush.msra.mxu3 %v278_v10  ;;  %v162_v10 = vld [vmem:[%s6094_s0 + $0x438] sm:$0xff] }
  0xaf   :  { %v3702_v47 = vadd.f32 %v642_v44, %v3666_v30 }
  0xb1   :  { %709 = vmatmul.f32.gmra.mxu1 %v98_v45  ;;  %822 = vmatmul.f32.gmra.mxu2 %v99_v46  ;;  %v3707_v49 = vpop.f32.mrf.mxu0  ;;  %v133_v46 = vld [vmem:[%s6094_s0 + $0x350] sm:$0xff] }
  0xb3   :  { %935 = vmatmul.f32.gmra.mxu3 %v100_v48  ;;  %v134_v48 = vld [vmem:[%s6094_s0 + $0x358] sm:$0xff] }
  0xb4   :  { %v621_v52 = vpop.f32.mrf.mxu2  ;;  %1048 = vmatmul.f32.gmra.mxu0 %v101_v50 }
  0xb5   :  { %v3716_v53 = vadd.f32 %v621_v52, %v3666_v30 }
  0xb6   :  { %v3718_v54 = vpop.f32.mrf.mxu1  ;;  %v645_v55 = vpop.f32.mrf.mxu3 }
  0xb7   :  { %v3727_v58 = vadd.f32 %v645_v55, %v3666_v30  ;;  %v136_v55 = vld [vmem:[%s6094_s0 + $0x368] sm:$0xff] }
  0xb9   :  { %712 = vmatmul.f32.gmra.mxu1 %v105_v56  ;;  %825 = vmatmul.f32.gmra.mxu2 %v106_v57  ;;  %v3732_v60 = vpop.f32.mrf.mxu0 }
  0xbb   :  { %938 = vmatmul.f32.gmra.mxu3 %v107_v59 }
  0xbc   :  { %v624_v62 = vpop.f32.mrf.mxu2  ;;  %1051 = vmatmul.f32.gmra.mxu0 %v108_v61 }
  0xbd   :  { %v3738_v63 = vadd.f32 %v624_v62, %v3666_v30  ;;  %v140_v62 = vld [vmem:[%s6094_s0 + $0x388] sm:$0xff] }
  0xbe   :  { %v3740_v0 = vpop.f32.mrf.mxu1  ;;  %v648_v1 = vpop.f32.mrf.mxu3 }
  0xbf   :  { %v3749_v4 = vadd.f32 %v648_v1, %v3666_v30  ;;  %v141_v1 = vld [vmem:[%s6094_s0 + $0x390] sm:$0xff] }
  0xc1   :  { %715 = vmatmul.f32.gmra.mxu1 %v112_v2  ;;  %828 = vmatmul.f32.gmra.mxu2 %v113_v3  ;;  %v3754_v6 = vpop.f32.mrf.mxu0  ;;  %v568_v2 = vadd.f32 %v3658_v27, %v3666_v30 }
  0xc3   :  { %941 = vmatmul.f32.gmra.mxu3 %v114_v5  ;;  %v142_v5 = vld [vmem:[%s6094_s0 + $0x398] sm:$0xff] }
  0xc4   :  { %v627_v11 = vpop.f32.mrf.mxu2  ;;  %1054 = vmatmul.f32.gmra.mxu0 %v115_v7 }
  0xc5   :  { %v3769_v12 = vadd.f32 %v627_v11, %v3666_v30 }
  0xc6   :  { %v3771_v13 = vpop.f32.mrf.mxu1  ;;  %v651_v14 = vpop.f32.mrf.mxu3 }
  0xc7   :  { %v3780_v17 = vadd.f32 %v651_v14, %v3666_v30 }
  0xc9   :  { %718 = vmatmul.f32.gmra.mxu1 %v119_v15  ;;  %831 = vmatmul.f32.gmra.mxu2 %v120_v16  ;;  %v3785_v19 = vpop.f32.mrf.mxu0 }
  0xcb   :  { %944 = vmatmul.f32.gmra.mxu3 %v121_v18  ;;  %v147_v18 = vld [vmem:[%s6094_s0 + $0x3c0] sm:$0xff] }
  0xcc   :  { %v630_v21 = vpop.f32.mrf.mxu2  ;;  %1057 = vmatmul.f32.gmra.mxu0 %v122_v20  ;;  %v148_v20 = vld [vmem:[%s6094_s0 + $0x3c8] sm:$0xff] }
  0xcd   :  { %v3791_v23 = vadd.f32 %v630_v21, %v3666_v30  ;;  %v571_v21 = vadd.f32 %v3685_v39, %v3666_v30 }
  0xce   :  { %v3793_v24 = vpop.f32.mrf.mxu1  ;;  %v654_v25 = vpop.f32.mrf.mxu3 }
  0xcf   :  { %v3802_v29 = vadd.f32 %v654_v25, %v3666_v30 }
  0xd1   :  { %721 = vmatmul.f32.gmra.mxu1 %v126_v26  ;;  %834 = vmatmul.f32.gmra.mxu2 %v127_v28  ;;  %v3807_v34 = vpop.f32.mrf.mxu0  ;;  %v149_v26 = vld [vmem:[%s6094_s0 + $0x3d0] sm:$0xff] }
  0xd3   :  { %947 = vmatmul.f32.gmra.mxu3 %v128_v31 }
  0xd4   :  { %v633_v40 = vpop.f32.mrf.mxu2  ;;  %1060 = vmatmul.f32.gmra.mxu0 %v129_v35  ;;  %v150_v35 = vld [vmem:[%s6094_s0 + $0x3d8] sm:$0xff] }
  0xd5   :  { %v3819_v41 = vadd.f32 %v633_v40, %v3666_v30 }
  0xd6   :  { %v3821_v44 = vpop.f32.mrf.mxu1  ;;  %v657_v45 = vpop.f32.mrf.mxu3 }
  0xd7   :  { %v3830_v50 = vadd.f32 %v657_v45, %v3666_v30 }
  0xd9   :  { %724 = vmatmul.f32.gmra.mxu1 %v133_v46  ;;  %837 = vmatmul.f32.gmra.mxu2 %v134_v48  ;;  %v3835_v52 = vpop.f32.mrf.mxu0  ;;  %v154_v46 = vld [vmem:[%s6094_s0 + $0x3f8] sm:$0xff]  ;;  %v155_v48 = vld [vmem:[%s6094_s0 + $0x400] sm:$0xff] }
  0xdb   :  { %950 = vmatmul.f32.gmra.mxu3 %v135_v51  ;;  %v574_v51 = vadd.f32 %v3707_v49, %v3666_v30 }
  0xdc   :  { %v636_v56 = vpop.f32.mrf.mxu2  ;;  %1063 = vmatmul.f32.gmra.mxu0 %v136_v55 }
  0xdd   :  { %v3841_v57 = vadd.f32 %v636_v56, %v3666_v30  ;;  %v156_v56 = vld [vmem:[%s6094_s0 + $0x408] sm:$0xff] }
  0xde   :  { %v660_v59 = vpop.f32.mrf.mxu3  ;;  %v680_v61 = vpop.f32.mrf.mxu1 }
  0xdf   :  { %v3852_v3 = vadd.f32 %v660_v59, %v3666_v30  ;;  %v681_v27 = vadd.f32 %v680_v61, %v568_v2  ;;  %v276_v2 = vld [vmem:[%s6095_s1 + $0xc8] sm:$0xff] }
  0xe0   :  { %1344 = vmatpush.msra.mxu3 %v276_v2  ;;  %v176_v2 = vld [vmem:[%s6094_s0 + $0x4a8] sm:$0xff] }
  0xe1   :  { %727 = vmatmul.f32.gmra.mxu1 %v140_v62  ;;  %840 = vmatmul.f32.gmra.mxu2 %v141_v1  ;;  %v1019_v7 = vpop.f32.mrf.mxu0  ;;  %v157_v62 = vld [vmem:[%s6094_s0 + $0x410] sm:$0xff]  ;;  %v419_v1 = vld [vmem:[%s6095_s1 + $0x540] sm:$0xff] }
  0xe2   :  { %1126 = vmatpush.msra.mxu1 %v419_v1 }
  0xe3   :  { %953 = vmatmul.f32.gmra.mxu3 %v142_v5 }
  0xe4   :  { %v793_v11 = vpop.f32.mrf.mxu2  ;;  %1066 = vmatmul.f32.gmra.mxu0 %v143_v8 }
  0xe5   :  { %v794_v14 = vadd.f32 %v793_v11, %v681_v27  ;;  %v161_v27 = vld [vmem:[%s6094_s0 + $0x430] sm:$0xff]  ;;  %v577_v11 = vadd.f32 %v3732_v60, %v3666_v30 }
  0xe6   :  { %v683_v15 = vpop.f32.mrf.mxu1  ;;  %v906_v16 = vpop.f32.mrf.mxu3 }
  0xe7   :  { %v907_v25 = vadd.f32 %v906_v16, %v794_v14  ;;  %v684_v36 = vadd.f32 %v683_v15, %v571_v21  ;;  %v163_v15 = vld [vmem:[%s6094_s0 + $0x440] sm:$0xff] }
  0xe9   :  { %v3877_v28 = vadd.f32 %v1019_v7, %v907_v25  ;;  %730 = vmatmul.f32.gmra.mxu1 %v147_v18  ;;  %843 = vmatmul.f32.gmra.mxu2 %v148_v20  ;;  %v1022_v31 = vpop.f32.mrf.mxu0  ;;  %v164_v20 = vld [vmem:[%s6094_s0 + $0x448] sm:$0xff] }
  0xeb   :  { %956 = vmatmul.f32.gmra.mxu3 %v149_v26 }
  0xec   :  { %v796_v38 = vpop.f32.mrf.mxu2  ;;  %1069 = vmatmul.f32.gmra.mxu0 %v150_v35  ;;  %v168_v35 = vld [vmem:[%s6094_s0 + $0x468] sm:$0xff] }
  0xed   :  { %v797_v40 = vadd.f32 %v796_v38, %v684_v36  ;;  %v169_v36 = vld [vmem:[%s6094_s0 + $0x470] sm:$0xff]  ;;  %v580_v38 = vadd.f32 %v3754_v6, %v3666_v30 }
  0xee   :  { %v686_v39 = vpop.f32.mrf.mxu1  ;;  %v909_v45 = vpop.f32.mrf.mxu3 }
  0xef   :  { %v910_v55 = vadd.f32 %v909_v45, %v797_v40  ;;  %v687_v49 = vadd.f32 %v686_v39, %v574_v51  ;;  %v170_v39 = vld [vmem:[%s6094_s0 + $0x478] sm:$0xff]  ;;  %v417_v51 = vld [vmem:[%s6095_s1 + $0x530] sm:$0xff] }
  0xf0   :  { %1127 = vmatpush.msra.mxu1 %v417_v51 }
  0xf1   :  { %v3893_v59 = vadd.f32 %v1022_v31, %v910_v55  ;;  %733 = vmatmul.f32.gmra.mxu1 %v154_v46  ;;  %846 = vmatmul.f32.gmra.mxu2 %v155_v48  ;;  %v1025_v61 = vpop.f32.mrf.mxu0  ;;  %v171_v48 = vld [vmem:[%s6094_s0 + $0x480] sm:$0xff]  ;;  %v274_v55 = vld [vmem:[%s6095_s1 + $0xb8] sm:$0xff] }
  0xf2   :  { %1345 = vmatpush.msra.mxu3 %v274_v55  ;;  %v190_v55 = vld [vmem:[%s6094_s0 + $0x518] sm:$0xff] }
  0xf3   :  { %959 = vmatmul.f32.gmra.mxu3 %v156_v56 }
  0xf4   :  { %v799_v5 = vpop.f32.mrf.mxu2  ;;  %1072 = vmatmul.f32.gmra.mxu0 %v157_v62 }
  0xf5   :  { %v800_v7 = vadd.f32 %v799_v5, %v687_v49  ;;  %v175_v49 = vld [vmem:[%s6094_s0 + $0x4a0] sm:$0xff]  ;;  %v583_v5 = vadd.f32 %v3785_v19, %v3666_v30 }
  0xf6   :  { %v689_v8 = vpop.f32.mrf.mxu1  ;;  %v912_v9 = vpop.f32.mrf.mxu3 }
  0xf7   :  { %v913_v14 = vadd.f32 %v912_v9, %v800_v7  ;;  %v690_v21 = vadd.f32 %v689_v8, %v577_v11  ;;  %v177_v8 = vld [vmem:[%s6094_s0 + $0x4b0] sm:$0xff] }
  0xf9   :  { %v3915_v16 = vadd.f32 %v1025_v61, %v913_v14  ;;  %736 = vmatmul.f32.gmra.mxu1 %v161_v27  ;;  %849 = vmatmul.f32.gmra.mxu2 %v162_v10  ;;  %v1028_v18 = vpop.f32.mrf.mxu0  ;;  %v178_v10 = vld [vmem:[%s6094_s0 + $0x4b8] sm:$0xff] }
  0xfb   :  { %962 = vmatmul.f32.gmra.mxu3 %v163_v15 }
  0xfc   :  { %v802_v25 = vpop.f32.mrf.mxu2  ;;  %1075 = vmatmul.f32.gmra.mxu0 %v164_v20  ;;  %v182_v20 = vld [vmem:[%s6094_s0 + $0x4d8] sm:$0xff] }
  0xfd   :  { %v803_v26 = vadd.f32 %v802_v25, %v690_v21  ;;  %v183_v21 = vld [vmem:[%s6094_s0 + $0x4e0] sm:$0xff]  ;;  %v586_v25 = vadd.f32 %v3807_v34, %v3666_v30 }
  0xfe   :  { %v692_v60 = vpop.f32.mrf.mxu1  ;;  %v915_v31 = vpop.f32.mrf.mxu3 }
  0xff   :  { %v916_v40 = vadd.f32 %v915_v31, %v803_v26  ;;  %v693_v6 = vadd.f32 %v692_v60, %v580_v38  ;;  %v184_v60 = vld [vmem:[%s6094_s0 + $0x4e8] sm:$0xff]  ;;  %v415_v38 = vld [vmem:[%s6095_s1 + $0x520] sm:$0xff] }
 0x100   :  { %1128 = vmatpush.msra.mxu1 %v415_v38 }
 0x101   :  { %v3931_v45 = vadd.f32 %v1028_v18, %v916_v40  ;;  %739 = vmatmul.f32.gmra.mxu1 %v168_v35  ;;  %852 = vmatmul.f32.gmra.mxu2 %v169_v36  ;;  %v1031_v46 = vpop.f32.mrf.mxu0  ;;  %v185_v36 = vld [vmem:[%s6094_s0 + $0x4f0] sm:$0xff]  ;;  %v272_v40 = vld [vmem:[%s6095_s1 + $0xa8] sm:$0xff] }
 0x102   :  { %1346 = vmatpush.msra.mxu3 %v272_v40  ;;  %v204_v40 = vld [vmem:[%s6094_s0 + $0x588] sm:$0xff] }
 0x103   :  { %965 = vmatmul.f32.gmra.mxu3 %v170_v39 }
 0x104   :  { %v805_v56 = vpop.f32.mrf.mxu2  ;;  %1078 = vmatmul.f32.gmra.mxu0 %v171_v48 }
 0x105   :  { %v806_v61 = vadd.f32 %v805_v56, %v693_v6  ;;  %v189_v6 = vld [vmem:[%s6094_s0 + $0x510] sm:$0xff]  ;;  %v589_v56 = vadd.f32 %v3835_v52, %v3666_v30 }
 0x106   :  { %v695_v62 = vpop.f32.mrf.mxu1  ;;  %v918_v1 = vpop.f32.mrf.mxu3 }
 0x107   :  { %v919_v7 = vadd.f32 %v918_v1, %v806_v61  ;;  %v696_v11 = vadd.f32 %v695_v62, %v583_v5  ;;  %v191_v62 = vld [vmem:[%s6094_s0 + $0x520] sm:$0xff] }
 0x109   :  { %v3953_v9 = vadd.f32 %v1031_v46, %v919_v7  ;;  %742 = vmatmul.f32.gmra.mxu1 %v175_v49  ;;  %855 = vmatmul.f32.gmra.mxu2 %v176_v2  ;;  %v1034_v27 = vpop.f32.mrf.mxu0  ;;  %v192_v2 = vld [vmem:[%s6094_s0 + $0x528] sm:$0xff] }
 0x10b   :  { %968 = vmatmul.f32.gmra.mxu3 %v177_v8 }
 0x10c   :  { %v808_v14 = vpop.f32.mrf.mxu2  ;;  %1081 = vmatmul.f32.gmra.mxu0 %v178_v10  ;;  %v196_v10 = vld [vmem:[%s6094_s0 + $0x548] sm:$0xff] }
 0x10d   :  { %v809_v15 = vadd.f32 %v808_v14, %v696_v11  ;;  %v197_v11 = vld [vmem:[%s6094_s0 + $0x550] sm:$0xff] }
 0x10e   :  { %v698_v19 = vpop.f32.mrf.mxu1  ;;  %v921_v18 = vpop.f32.mrf.mxu3 }
 0x10f   :  { %v922_v26 = vadd.f32 %v921_v18, %v809_v15  ;;  %v699_v34 = vadd.f32 %v698_v19, %v586_v25  ;;  %v198_v15 = vld [vmem:[%s6094_s0 + $0x558] sm:$0xff]  ;;  %v592_v19 = vadd.f32 %v3644_v22, %v3666_v30  ;;  %v413_v25 = vld [vmem:[%s6095_s1 + $0x510] sm:$0xff] }
 0x110   :  { %1129 = vmatpush.msra.mxu1 %v413_v25  ;;  %v270_v22 = vld [vmem:[%s6095_s1 + $0x98] sm:$0xff] }
 0x111   :  { %v3969_v31 = vadd.f32 %v1034_v27, %v922_v26  ;;  %745 = vmatmul.f32.gmra.mxu1 %v182_v20  ;;  %858 = vmatmul.f32.gmra.mxu2 %v183_v21  ;;  %v1037_v35 = vpop.f32.mrf.mxu0  ;;  %v199_v21 = vld [vmem:[%s6094_s0 + $0x560] sm:$0xff] }
 0x112   :  { %1347 = vmatpush.msra.mxu3 %v270_v22 }
 0x113   :  { %971 = vmatmul.f32.gmra.mxu3 %v184_v60 }
 0x114   :  { %v811_v39 = vpop.f32.mrf.mxu2  ;;  %1084 = vmatmul.f32.gmra.mxu0 %v185_v36 }
 0x115   :  { %v812_v46 = vadd.f32 %v811_v39, %v699_v34  ;;  %v203_v34 = vld [vmem:[%s6094_s0 + $0x580] sm:$0xff] }
 0x116   :  { %v701_v48 = vpop.f32.mrf.mxu1  ;;  %v924_v51 = vpop.f32.mrf.mxu3 }
 0x117   :  { %v925_v61 = vadd.f32 %v924_v51, %v812_v46  ;;  %v702_v5 = vadd.f32 %v701_v48, %v589_v56  ;;  %v205_v46 = vld [vmem:[%s6094_s0 + $0x590] sm:$0xff]  ;;  %v595_v48 = vadd.f32 %v3671_v33, %v3666_v30  ;;  %v312_v33 = vld [vmem:[%s6095_s1 + $0x1e8] sm:$0xff] }
 0x119   :  { %v3991_v1 = vadd.f32 %v1037_v35, %v925_v61  ;;  %748 = vmatmul.f32.gmra.mxu1 %v189_v6  ;;  %861 = vmatmul.f32.gmra.mxu2 %v190_v55  ;;  %v1040_v49 = vpop.f32.mrf.mxu0  ;;  %v206_v55 = vld [vmem:[%s6094_s0 + $0x598] sm:$0xff] }
 0x11a   :  { %v314_v61 = vld [vmem:[%s6095_s1 + $0x1f8] sm:$0xff] }
 0x11b   :  { %974 = vmatmul.f32.gmra.mxu3 %v191_v62  ;;  %1454 = vmatpush.msra.mxu0 %v314_v61 }
 0x11c   :  { %v814_v7 = vpop.f32.mrf.mxu2  ;;  %1087 = vmatmul.f32.gmra.mxu0 %v192_v2 }
 0x11d   :  { %v815_v8 = vadd.f32 %v814_v7, %v702_v5  ;;  %v210_v7 = vld [vmem:[%s6094_s0 + $0x5b8] sm:$0xff]  ;;  %1455 = vmatpush.msra.mxu0 %v312_v33  ;;  %v260_v33 = vld [vmem:[%s6095_s1 + $0x48] sm:$0xff] }
 0x11e   :  { %v704_v52 = vpop.f32.mrf.mxu1  ;;  %v927_v27 = vpop.f32.mrf.mxu3 }
 0x11f   :  { %v928_v14 = vadd.f32 %v927_v27, %v815_v8  ;;  %v705_v26 = vadd.f32 %v704_v52, %v592_v19  ;;  %v211_v8 = vld [vmem:[%s6094_s0 + $0x5c0] sm:$0xff]  ;;  %v310_v27 = vld [vmem:[%s6095_s1 + $0x1d8] sm:$0xff]  ;;  %v213_v19 = vld [vmem:[%s6094_s0 + $0x5d0] sm:$0xff] }
 0x120   :  { %1456 = vmatpush.msra.mxu0 %v310_v27  ;;  %v256_v27 = vld [vmem:[%s6095_s1 + $0x28] sm:$0xff] }
 0x121   :  { %v4007_v18 = vadd.f32 %v1040_v49, %v928_v14  ;;  %751 = vmatmul.f32.gmra.mxu1 %v196_v10  ;;  %864 = vmatmul.f32.gmra.mxu2 %v197_v11  ;;  %v1043_v20 = vpop.f32.mrf.mxu0  ;;  %v212_v10 = vld [vmem:[%s6094_s0 + $0x5c8] sm:$0xff]  ;;  %v598_v11 = vadd.f32 %v3693_v43, %v3666_v30 }
 0x122   :  { %v308_v43 = vld [vmem:[%s6095_s1 + $0x1c8] sm:$0xff] }
 0x123   :  { %977 = vmatmul.f32.gmra.mxu3 %v198_v15  ;;  %1457 = vmatpush.msra.mxu0 %v308_v43  ;;  %v443_v43 = vld [vmem:[%s6095_s1 + $0x600] sm:$0xff] }
 0x124   :  { %v817_v60 = vpop.f32.mrf.mxu2  ;;  %1090 = vmatmul.f32.gmra.mxu0 %v199_v21  ;;  %v268_v21 = vld [vmem:[%s6095_s1 + $0x88] sm:$0xff]  ;;  %1243 = vmatpush.msra.mxu2 %v443_v43 }
 0x125   :  { %v818_v35 = vadd.f32 %v817_v60, %v705_v26  ;;  %v266_v26 = vld [vmem:[%s6095_s1 + $0x78] sm:$0xff]  ;;  %1348 = vmatpush.msra.mxu3 %v268_v21 }
 0x126   :  { %v707_v36 = vpop.f32.mrf.mxu1  ;;  %v930_v38 = vpop.f32.mrf.mxu3  ;;  %v306_v60 = vld [vmem:[%s6095_s1 + $0x1b8] sm:$0xff] }
 0x127   :  { %v931_v39 = vadd.f32 %v930_v38, %v818_v35  ;;  %v708_v56 = vadd.f32 %v707_v36, %v595_v48  ;;  %v264_v36 = vld [vmem:[%s6095_s1 + $0x68] sm:$0xff]  ;;  %1349 = vmatpush.msra.mxu3 %v266_v26  ;;  %1458 = vmatpush.msra.mxu0 %v306_v60  ;;  %v298_v21 = vld [vmem:[%s6095_s1 + $0x178] sm:$0xff] }
 0x128   :  { %v304_v48 = vld [vmem:[%s6095_s1 + $0x1a8] sm:$0xff]  ;;  %v226_v26 = vld [vmem:[%s6094_s0 + $0x638] sm:$0xff] }
 0x129   :  { %v4029_v51 = vadd.f32 %v1043_v20, %v931_v39  ;;  %754 = vmatmul.f32.gmra.mxu1 %v203_v34  ;;  %867 = vmatmul.f32.gmra.mxu2 %v204_v40  ;;  %v1046_v6 = vpop.f32.mrf.mxu0  ;;  %v411_v20 = vld [vmem:[%s6095_s1 + $0x500] sm:$0xff]  ;;  %v217_v40 = vld [vmem:[%s6094_s0 + $0x5f0] sm:$0xff]  ;;  %v218_v39 = vld [vmem:[%s6094_s0 + $0x5f8] sm:$0xff] }
 0x12a   :  { %1130 = vmatpush.msra.mxu1 %v411_v20  ;;  %1350 = vmatpush.msra.mxu3 %v264_v36  ;;  %v227_v36 = vld [vmem:[%s6094_s0 + $0x640] sm:$0xff] }
 0x12b   :  { %980 = vmatmul.f32.gmra.mxu3 %v205_v46  ;;  %1459 = vmatpush.msra.mxu0 %v304_v48 }
 0x12c   :  { %v820_v62 = vpop.f32.mrf.mxu2  ;;  %1093 = vmatmul.f32.gmra.mxu0 %v206_v55  ;;  %v219_v55 = vld [vmem:[%s6094_s0 + $0x600] sm:$0xff] }
 0x12d   :  { %v821_v49 = vadd.f32 %v820_v62, %v708_v56  ;;  %v601_v56 = vadd.f32 %v3718_v54, %v3666_v30 }
 0x12e   :  { %v710_v2 = vpop.f32.mrf.mxu1  ;;  %v933_v5 = vpop.f32.mrf.mxu3 }
 0x12f   :  { %v934_v52 = vadd.f32 %v933_v5, %v821_v49  ;;  %v711_v25 = vadd.f32 %v710_v2, %v598_v11  ;;  %v220_v49 = vld [vmem:[%s6094_s0 + $0x608] sm:$0xff]  ;;  %v302_v2 = vld [vmem:[%s6095_s1 + $0x198] sm:$0xff] }
 0x130   :  { %v258_v5 = vld [vmem:[%s6095_s1 + $0x38] sm:$0xff]  ;;  %1460 = vmatpush.msra.mxu0 %v302_v2  ;;  %v233_v2 = vld [vmem:[%s6094_s0 + $0x670] sm:$0xff] }
 0x131   :  { %v4054_v14 = vadd.f32 %v1046_v6, %v934_v52  ;;  %757 = vmatmul.f32.gmra.mxu1 %v210_v7  ;;  %870 = vmatmul.f32.gmra.mxu2 %v211_v8  ;;  %v1049_v15 = vpop.f32.mrf.mxu0  ;;  %v262_v6 = vld [vmem:[%s6095_s1 + $0x58] sm:$0xff]  ;;  %v300_v8 = vld [vmem:[%s6095_s1 + $0x188] sm:$0xff] }
 0x132   :  { %1351 = vmatpush.msra.mxu3 %v262_v6  ;;  %1461 = vmatpush.msra.mxu0 %v300_v8  ;;  %v234_v8 = vld [vmem:[%s6094_s0 + $0x678] sm:$0xff] }
 0x133   :  { %983 = vmatmul.f32.gmra.mxu3 %v212_v10 }
 0x134   :  { %v823_v22 = vpop.f32.mrf.mxu2  ;;  %1096 = vmatmul.f32.gmra.mxu0 %v213_v19  ;;  %1352 = vmatpush.msra.mxu3 %v260_v33  ;;  %v225_v19 = vld [vmem:[%s6094_s0 + $0x630] sm:$0xff]  ;;  %v292_v33 = vld [vmem:[%s6095_s1 + $0x148] sm:$0xff] }
 0x135   :  { %v824_v35 = vadd.f32 %v823_v22, %v711_v25  ;;  %v254_v25 = vld [vmem:[%s6095_s1 + $0x18] sm:$0xff]  ;;  %v604_v22 = vadd.f32 %v3740_v0, %v3666_v30  ;;  %1462 = vmatpush.msra.mxu0 %v298_v21  ;;  %v296_v0 = vld [vmem:[%s6095_s1 + $0x168] sm:$0xff]  ;;  %v239_v21 = vld [vmem:[%s6094_s0 + $0x6a0] sm:$0xff] }
 0x136   :  { %v713_v38 = vpop.f32.mrf.mxu1  ;;  %v936_v34 = vpop.f32.mrf.mxu3  ;;  %1353 = vmatpush.msra.mxu3 %v258_v5 }
 0x137   :  { %v937_v46 = vadd.f32 %v936_v34, %v824_v35  ;;  %v714_v54 = vadd.f32 %v713_v38, %v601_v56  ;;  %v346_v38 = vld [vmem:[%s6095_s1 + $0x2f8] sm:$0xff]  ;;  %v252_v34 = vld [vmem:[%s6095_s1 + $0x8] sm:$0xff]  ;;  %1463 = vmatpush.msra.mxu0 %v296_v0  ;;  %v231_v56 = vld [vmem:[%s6094_s0 + $0x660] sm:$0xff] }
 0x138   :  { %1354 = vmatpush.msra.mxu3 %v256_v27  ;;  %1567 = vmatpush.msrb.mxu1 %v346_v38  ;;  %v241_v38 = vld [vmem:[%s6094_s0 + $0x6b0] sm:$0xff]  ;;  %v284_v0 = vld [vmem:[%s6095_s1 + $0x108] sm:$0xff] }
 0x139   :  { %v4094_v61 = vadd.f32 %v1049_v15, %v937_v46  ;;  %760 = vmatmul.f32.gmra.mxu1 %v217_v40  ;;  %873 = vmatmul.f32.gmra.mxu2 %v218_v39  ;;  %v1052_v62 = vpop.f32.mrf.mxu0  ;;  %v224_v15 = vld [vmem:[%s6094_s0 + $0x628] sm:$0xff]  ;;  %v294_v46 = vld [vmem:[%s6095_s1 + $0x158] sm:$0xff] }
 0x13a   :  { %1355 = vmatpush.msra.mxu3 %v254_v25  ;;  %1464 = vmatpush.msra.mxu0 %v294_v46  ;;  %v286_v25 = vld [vmem:[%s6095_s1 + $0x118] sm:$0xff] }
 0x13b   :  { %986 = vmatmul.f32.gmra.mxu3 %v219_v55 }
 0x13c   :  { %v826_v7 = vpop.f32.mrf.mxu2  ;;  %1099 = vmatmul.f32.gmra.mxu0 %v220_v49  ;;  %1356 = vmatpush.msra.mxu3 %v252_v34  ;;  %v344_v34 = vld [vmem:[%s6095_s1 + $0x2e8] sm:$0xff] }
 0x13d   :  { %v827_v52 = vadd.f32 %v826_v7, %v714_v54  ;;  %v607_v54 = vadd.f32 %v3771_v13, %v3666_v30  ;;  %1465 = vmatpush.msra.mxu0 %v292_v33  ;;  %v288_v13 = vld [vmem:[%s6095_s1 + $0x128] sm:$0xff]  ;;  %1568 = vmatpush.msrb.mxu1 %v344_v34 }
 0x13e   :  { %v716_v10 = vpop.f32.mrf.mxu1  ;;  %v939_v11 = vpop.f32.mrf.mxu3 }
 0x13f   :  { %v940_v20 = vadd.f32 %v939_v11, %v827_v52  ;;  %v717_v40 = vadd.f32 %v716_v10, %v604_v22  ;;  %v290_v52 = vld [vmem:[%s6095_s1 + $0x138] sm:$0xff]  ;;  %v610_v22 = vadd.f32 %v3793_v24, %v3666_v30 }
 0x140   :  { %1466 = vmatpush.msra.mxu0 %v290_v52 }
 0x141   :  { %v4134_v60 = vadd.f32 %v1052_v62, %v940_v20  ;;  %763 = vmatmul.f32.gmra.mxu1 %v224_v15  ;;  %876 = vmatmul.f32.gmra.mxu2 %v225_v19  ;;  %v1055_v35 = vpop.f32.mrf.mxu0  ;;  %v232_v62 = vld [vmem:[%s6094_s0 + $0x668] sm:$0xff]  ;;  %v238_v20 = vld [vmem:[%s6094_s0 + $0x698] sm:$0xff] }
 0x142   :  { %1467 = vmatpush.msra.mxu0 %v288_v13 }
 0x143   :  { %989 = vmatmul.f32.gmra.mxu3 %v226_v26  ;;  %v240_v26 = vld [vmem:[%s6094_s0 + $0x6a8] sm:$0xff] }
 0x144   :  { %v829_v39 = vpop.f32.mrf.mxu2  ;;  %1102 = vmatmul.f32.gmra.mxu0 %v227_v36 }
 0x145   :  { %v830_v48 = vadd.f32 %v829_v39, %v717_v40  ;;  %1468 = vmatpush.msra.mxu0 %v286_v25  ;;  %v2908_v25 = vld [vmem:[%s6094_s0 + $0x8] sm:$0xff] }
 0x146   :  { %v719_v6 = vpop.f32.mrf.mxu1  ;;  %v942_v55 = vpop.f32.mrf.mxu3 }
 0x147   :  { %v943_v49 = vadd.f32 %v942_v55, %v830_v48  ;;  %v720_v27 = vadd.f32 %v719_v6, %v607_v54  ;;  %1469 = vmatpush.msra.mxu0 %v284_v0  ;;  %v245_v6 = vld [vmem:[%s6094_s0 + $0x6d0] sm:$0xff]  ;;  %v246_v55 = vld [vmem:[%s6094_s0 + $0x6d8] sm:$0xff]  ;;  %v248_v54 = vld [vmem:[%s6094_s0 + $0x6e8] sm:$0xff] }
 0x149   :  { %v4165_v5 = vadd.f32 %v1055_v35, %v943_v49  ;;  %766 = vmatmul.f32.gmra.mxu1 %v231_v56  ;;  %879 = vmatmul.f32.gmra.mxu2 %v232_v62  ;;  %v1058_v7 = vpop.f32.mrf.mxu0  ;;  %v247_v62 = vld [vmem:[%s6094_s0 + $0x6e0] sm:$0xff]  ;;  %v613_v49 = vadd.f32 %v3821_v44, %v3666_v30  ;;  %v32_v30 = vld [vmem:[%s6094_s0 + $0x28] sm:$0xff]  ;;  %v33_v44 = vld [vmem:[%s6094_s0 + $0x30] sm:$0xff] }
 0x14b   :  { %992 = vmatmul.f32.gmra.mxu3 %v233_v2 }
 0x14c   :  { %v832_v10 = vpop.f32.mrf.mxu2  ;;  %1105 = vmatmul.f32.gmra.mxu0 %v234_v8 }
 0x14d   :  { %v833_v11 = vadd.f32 %v832_v10, %v720_v27 }
 0x14e   :  { %v722_v15 = vpop.f32.mrf.mxu1  ;;  %v945_v19 = vpop.f32.mrf.mxu3 }
 0x14f   :  { %v946_v43 = vadd.f32 %v945_v19, %v833_v11  ;;  %v723_v24 = vadd.f32 %v722_v15, %v610_v22  ;;  %v342_v19 = vld [vmem:[%s6095_s1 + $0x2d8] sm:$0xff] }
 0x150   :  { %1569 = vmatpush.msrb.mxu1 %v342_v19 }
 0x151   :  { %v4190_v35 = vadd.f32 %v1058_v7, %v946_v43  ;;  %769 = vmatmul.f32.gmra.mxu1 %v238_v20  ;;  %882 = vmatmul.f32.gmra.mxu2 %v239_v21  ;;  %v1061_v36 = vpop.f32.mrf.mxu0  ;;  %v2907_v21 = vld [vmem:[%s6094_s0] sm:$0xff] }
 0x153   :  { %995 = vmatmul.f32.gmra.mxu3 %v240_v26 }
 0x154   :  { %v835_v40 = vpop.f32.mrf.mxu2  ;;  %1108 = vmatmul.f32.gmra.mxu0 %v241_v38  ;;  %v39_v38 = vld [vmem:[%s6094_s0 + $0x60] sm:$0xff] }
 0x155   :  { %v836_v39 = vadd.f32 %v835_v40, %v723_v24 }
 0x156   :  { %v725_v46 = vpop.f32.mrf.mxu1  ;;  %v948_v48 = vpop.f32.mrf.mxu3 }
 0x157   :  { %v949_v56 = vadd.f32 %v948_v48, %v836_v39  ;;  %v726_v7 = vadd.f32 %v725_v46, %v613_v49  ;;  %v2909_v39 = vld [vmem:[%s6094_s0 + $0x38] sm:$0xff]  ;;  %v2910_v48 = vld [vmem:[%s6094_s0 + $0x40] sm:$0xff] }
 0x159   :  { %v4212_v33 = vadd.f32 %v1061_v36, %v949_v56  ;;  %772 = vmatmul.f32.gmra.mxu1 %v245_v6  ;;  %885 = vmatmul.f32.gmra.mxu2 %v246_v55  ;;  %v1064_v2 = vpop.f32.mrf.mxu0 }
 0x15b   :  { %998 = vmatmul.f32.gmra.mxu3 %v247_v62  ;;  %v46_v62 = vld [vmem:[%s6094_s0 + $0x98] sm:$0xff] }
 0x15c   :  { %v838_v8 = vpop.f32.mrf.mxu2  ;;  %1111 = vmatmul.f32.gmra.mxu0 %v248_v54 }
 0x15d   :  { %v839_v52 = vadd.f32 %v838_v8, %v726_v7  ;;  %v340_v7 = vld [vmem:[%s6095_s1 + $0x2c8] sm:$0xff] }
 0x15e   :  { %v728_v27 = vpop.f32.mrf.mxu1  ;;  %v951_v10 = vpop.f32.mrf.mxu3  ;;  %1570 = vmatpush.msrb.mxu1 %v340_v7 }
 0x15f   :  { %v952_v13 = vadd.f32 %v951_v10, %v839_v52  ;;  %v729_v20 = vadd.f32 %v728_v27, %v3669_v32  ;;  %v40_v32 = vld [vmem:[%s6094_s0 + $0x68] sm:$0xff]  ;;  %v2911_v52 = vld [vmem:[%s6094_s0 + $0x70] sm:$0xff]  ;;  %v2912_v10 = vld [vmem:[%s6094_s0 + $0x78] sm:$0xff] }
 0x161   :  { %v4223_v11 = vadd.f32 %v1064_v2, %v952_v13  ;;  %1131 = vmatmul.f32.vlgmr.msra.gmra.mxu1 %v32_v30  ;;  %2758 = vmatmul.msk.f32.vlgmr.msra.gmra.mxu2 %vm453_vm0, %v33_v44  ;;  %v1067_v15 = vpop.f32.mrf.mxu0 }
 0x163   :  { %1357 = vmatmul.f32.vlgmr.msra.gmra.mxu3 %v2907_v21 }
 0x164   :  { %v841_v43 = vpop.f32.mrf.mxu2  ;;  %1470 = vmatmul.f32.vlgmr.msra.gmra.mxu0 %v2908_v25  ;;  %v2913_v25 = vld [vmem:[%s6094_s0 + $0xa8] sm:$0xff] }
 0x165   :  { %v842_v26 = vadd.f32 %v841_v43, %v729_v20 }
 0x166   :  { %v731_v22 = vpop.f32.mrf.mxu1  ;;  %v954_v36 = vpop.f32.mrf.mxu3 }
 0x167   :  { %v955_v34 = vadd.f32 %v954_v36, %v842_v26  ;;  %v732_v40 = vadd.f32 %v731_v22, %v3691_v42  ;;  %v47_v42 = vld [vmem:[%s6094_s0 + $0xa0] sm:$0xff]  ;;  %v2914_v22 = vld [vmem:[%s6094_s0 + $0xb0] sm:$0xff] }
 0x169   :  { %v4242_v0 = vadd.f32 %v1067_v15, %v955_v34  ;;  %1134 = vmatmul.f32.gmra.mxu1 %v39_v38  ;;  %2759 = vmatmul.msk.f32.gmra.mxu2 %vm453_vm0, %v40_v32  ;;  %v1070_v24 = vpop.f32.mrf.mxu0  ;;  %v53_v15 = vld [vmem:[%s6094_s0 + $0xd0] sm:$0xff]  ;;  %v60_v34 = vld [vmem:[%s6094_s0 + $0x108] sm:$0xff] }
 0x16b   :  { %1360 = vmatmul.f32.gmra.mxu3 %v2909_v39 }
 0x16c   :  { %v844_v46 = vpop.f32.mrf.mxu2  ;;  %1473 = vmatmul.f32.gmra.mxu0 %v2910_v48 }
 0x16d   :  { %v845_v6 = vadd.f32 %v844_v46, %v732_v40  ;;  %v338_v46 = vld [vmem:[%s6095_s1 + $0x2b8] sm:$0xff] }
 0x16e   :  { %v734_v55 = vpop.f32.mrf.mxu1  ;;  %v957_v56 = vpop.f32.mrf.mxu3  ;;  %1571 = vmatpush.msrb.mxu1 %v338_v46 }
 0x16f   :  { %v958_v49 = vadd.f32 %v957_v56, %v845_v6  ;;  %v735_v8 = vadd.f32 %v734_v55, %v3716_v53  ;;  %v54_v53 = vld [vmem:[%s6094_s0 + $0xd8] sm:$0xff]  ;;  %v2915_v6 = vld [vmem:[%s6094_s0 + $0xe0] sm:$0xff]  ;;  %v2916_v56 = vld [vmem:[%s6094_s0 + $0xe8] sm:$0xff] }
 0x171   :  { %v4258_v2 = vadd.f32 %v1070_v24, %v958_v49  ;;  %1137 = vmatmul.f32.gmra.mxu1 %v46_v62  ;;  %2760 = vmatmul.msk.f32.gmra.mxu2 %vm453_vm0, %v47_v42  ;;  %v1073_v54 = vpop.f32.mrf.mxu0 }
 0x173   :  { %1363 = vmatmul.f32.gmra.mxu3 %v2911_v52 }
 0x174   :  { %v847_v27 = vpop.f32.mrf.mxu2  ;;  %1476 = vmatmul.f32.gmra.mxu0 %v2912_v10  ;;  %v2917_v10 = vld [vmem:[%s6094_s0 + $0x118] sm:$0xff] }
 0x175   :  { %v848_v30 = vadd.f32 %v847_v27, %v735_v8 }
 0x176   :  { %v737_v44 = vpop.f32.mrf.mxu1  ;;  %v960_v13 = vpop.f32.mrf.mxu3 }
 0x177   :  { %v961_v19 = vadd.f32 %v960_v13, %v848_v30  ;;  %v738_v43 = vadd.f32 %v737_v44, %v3738_v63  ;;  %v61_v63 = vld [vmem:[%s6094_s0 + $0x110] sm:$0xff]  ;;  %v2918_v44 = vld [vmem:[%s6094_s0 + $0x120] sm:$0xff] }
 0x179   :  { %v4277_v20 = vadd.f32 %v1073_v54, %v961_v19  ;;  %1140 = vmatmul.f32.gmra.mxu1 %v53_v15  ;;  %2761 = vmatmul.msk.f32.gmra.mxu2 %vm453_vm0, %v54_v53  ;;  %v1076_v21 = vpop.f32.mrf.mxu0  ;;  %v67_v54 = vld [vmem:[%s6094_s0 + $0x140] sm:$0xff]  ;;  %v74_v19 = vld [vmem:[%s6094_s0 + $0x178] sm:$0xff] }
 0x17b   :  { %1366 = vmatmul.f32.gmra.mxu3 %v2913_v25 }
 0x17c   :  { %v850_v26 = vpop.f32.mrf.mxu2  ;;  %1479 = vmatmul.f32.gmra.mxu0 %v2914_v22 }
 0x17d   :  { %v851_v36 = vadd.f32 %v850_v26, %v738_v43  ;;  %v336_v26 = vld [vmem:[%s6095_s1 + $0x2a8] sm:$0xff] }
 0x17e   :  { %v740_v38 = vpop.f32.mrf.mxu1  ;;  %v963_v32 = vpop.f32.mrf.mxu3  ;;  %1572 = vmatpush.msrb.mxu1 %v336_v26 }
 0x17f   :  { %v964_v24 = vadd.f32 %v963_v32, %v851_v36  ;;  %v741_v48 = vadd.f32 %v740_v38, %v3769_v12  ;;  %v68_v12 = vld [vmem:[%s6094_s0 + $0x148] sm:$0xff]  ;;  %v2919_v36 = vld [vmem:[%s6094_s0 + $0x150] sm:$0xff]  ;;  %v2920_v32 = vld [vmem:[%s6094_s0 + $0x158] sm:$0xff] }
 0x181   :  { %v4293_v40 = vadd.f32 %v1076_v21, %v964_v24  ;;  %1143 = vmatmul.f32.gmra.mxu1 %v60_v34  ;;  %2762 = vmatmul.msk.f32.gmra.mxu2 %vm453_vm0, %v61_v63  ;;  %v1079_v39 = vpop.f32.mrf.mxu0 }
 0x183   :  { %1369 = vmatmul.f32.gmra.mxu3 %v2915_v6 }
 0x184   :  { %v853_v55 = vpop.f32.mrf.mxu2  ;;  %1482 = vmatmul.f32.gmra.mxu0 %v2916_v56  ;;  %v2921_v56 = vld [vmem:[%s6094_s0 + $0x188] sm:$0xff] }
 0x185   :  { %v854_v62 = vadd.f32 %v853_v55, %v741_v48 }
 0x186   :  { %v743_v42 = vpop.f32.mrf.mxu1  ;;  %v966_v49 = vpop.f32.mrf.mxu3 }
 0x187   :  { %v967_v7 = vadd.f32 %v966_v49, %v854_v62  ;;  %v744_v27 = vadd.f32 %v743_v42, %v3791_v23  ;;  %v75_v23 = vld [vmem:[%s6094_s0 + $0x180] sm:$0xff]  ;;  %v2922_v42 = vld [vmem:[%s6094_s0 + $0x190] sm:$0xff] }
 0x189   :  { %v4312_v8 = vadd.f32 %v1079_v39, %v967_v7  ;;  %1146 = vmatmul.f32.gmra.mxu1 %v67_v54  ;;  %2763 = vmatmul.msk.f32.gmra.mxu2 %vm453_vm0, %v68_v12  ;;  %v1082_v52 = vpop.f32.mrf.mxu0  ;;  %v81_v39 = vld [vmem:[%s6094_s0 + $0x1b0] sm:$0xff]  ;;  %v88_v7 = vld [vmem:[%s6094_s0 + $0x1e8] sm:$0xff] }
 0x18b   :  { %1372 = vmatmul.f32.gmra.mxu3 %v2917_v10 }
 0x18c   :  { %v856_v30 = vpop.f32.mrf.mxu2  ;;  %1485 = vmatmul.f32.gmra.mxu0 %v2918_v44 }
 0x18d   :  { %v857_v13 = vadd.f32 %v856_v30, %v744_v27  ;;  %v334_v30 = vld [vmem:[%s6095_s1 + $0x298] sm:$0xff] }
 0x18e   :  { %v746_v15 = vpop.f32.mrf.mxu1  ;;  %v969_v53 = vpop.f32.mrf.mxu3  ;;  %1573 = vmatpush.msrb.mxu1 %v334_v30 }
 0x18f   :  { %v970_v21 = vadd.f32 %v969_v53, %v857_v13  ;;  %v747_v22 = vadd.f32 %v746_v15, %v3819_v41  ;;  %v82_v41 = vld [vmem:[%s6094_s0 + $0x1b8] sm:$0xff]  ;;  %v2923_v13 = vld [vmem:[%s6094_s0 + $0x1c0] sm:$0xff]  ;;  %v2924_v53 = vld [vmem:[%s6094_s0 + $0x1c8] sm:$0xff] }
 0x191   :  { %v4328_v43 = vadd.f32 %v1082_v52, %v970_v21  ;;  %1149 = vmatmul.f32.gmra.mxu1 %v74_v19  ;;  %2764 = vmatmul.msk.f32.gmra.mxu2 %vm453_vm0, %v75_v23  ;;  %v1085_v25 = vpop.f32.mrf.mxu0 }
 0x193   :  { %1375 = vmatmul.f32.gmra.mxu3 %v2919_v36 }
 0x194   :  { %v859_v38 = vpop.f32.mrf.mxu2  ;;  %1488 = vmatmul.f32.gmra.mxu0 %v2920_v32  ;;  %v2925_v32 = vld [vmem:[%s6094_s0 + $0x1f8] sm:$0xff] }
 0x195   :  { %v860_v34 = vadd.f32 %v859_v38, %v747_v22 }
 0x196   :  { %v749_v63 = vpop.f32.mrf.mxu1  ;;  %v972_v24 = vpop.f32.mrf.mxu3 }
 0x197   :  { %v973_v46 = vadd.f32 %v972_v24, %v860_v34  ;;  %v750_v55 = vadd.f32 %v749_v63, %v3841_v57  ;;  %v89_v57 = vld [vmem:[%s6094_s0 + $0x1f0] sm:$0xff]  ;;  %v2926_v63 = vld [vmem:[%s6094_s0 + $0x200] sm:$0xff] }
 0x199   :  { %v4347_v48 = vadd.f32 %v1085_v25, %v973_v46  ;;  %1152 = vmatmul.f32.gmra.mxu1 %v81_v39  ;;  %2765 = vmatmul.msk.f32.gmra.mxu2 %vm453_vm0, %v82_v41  ;;  %v1088_v6 = vpop.f32.mrf.mxu0  ;;  %v95_v25 = vld [vmem:[%s6094_s0 + $0x220] sm:$0xff]  ;;  %v102_v46 = vld [vmem:[%s6094_s0 + $0x258] sm:$0xff] }
 0x19b   :  { %1378 = vmatmul.f32.gmra.mxu3 %v2921_v56 }
 0x19c   :  { %v862_v62 = vpop.f32.mrf.mxu2  ;;  %1491 = vmatmul.f32.gmra.mxu0 %v2922_v42 }
 0x19d   :  { %v863_v49 = vadd.f32 %v862_v62, %v750_v55  ;;  %v332_v62 = vld [vmem:[%s6095_s1 + $0x288] sm:$0xff] }
 0x19e   :  { %v752_v54 = vpop.f32.mrf.mxu1  ;;  %v975_v12 = vpop.f32.mrf.mxu3  ;;  %1574 = vmatpush.msrb.mxu1 %v332_v62 }
 0x19f   :  { %v976_v52 = vadd.f32 %v975_v12, %v863_v49  ;;  %v753_v44 = vadd.f32 %v752_v54, %v3680_v37  ;;  %v96_v37 = vld [vmem:[%s6094_s0 + $0x228] sm:$0xff]  ;;  %v2927_v49 = vld [vmem:[%s6094_s0 + $0x230] sm:$0xff]  ;;  %v2928_v12 = vld [vmem:[%s6094_s0 + $0x238] sm:$0xff] }
 0x1a1   :  { %v4363_v27 = vadd.f32 %v1088_v6, %v976_v52  ;;  %1155 = vmatmul.f32.gmra.mxu1 %v88_v7  ;;  %2766 = vmatmul.msk.f32.gmra.mxu2 %vm453_vm0, %v89_v57  ;;  %v1091_v10 = vpop.f32.mrf.mxu0 }
 0x1a3   :  { %1381 = vmatmul.f32.gmra.mxu3 %v2923_v13 }
 0x1a4   :  { %v865_v15 = vpop.f32.mrf.mxu2  ;;  %1494 = vmatmul.f32.gmra.mxu0 %v2924_v53  ;;  %v2929_v53 = vld [vmem:[%s6094_s0 + $0x268] sm:$0xff] }
 0x1a5   :  { %v866_v19 = vadd.f32 %v865_v15, %v753_v44 }
 0x1a6   :  { %v755_v23 = vpop.f32.mrf.mxu1  ;;  %v978_v21 = vpop.f32.mrf.mxu3 }
 0x1a7   :  { %v979_v26 = vadd.f32 %v978_v21, %v866_v19  ;;  %v756_v38 = vadd.f32 %v755_v23, %v3702_v47  ;;  %v103_v47 = vld [vmem:[%s6094_s0 + $0x260] sm:$0xff]  ;;  %v2930_v23 = vld [vmem:[%s6094_s0 + $0x270] sm:$0xff] }
 0x1a9   :  { %v4382_v22 = vadd.f32 %v1091_v10, %v979_v26  ;;  %1158 = vmatmul.f32.gmra.mxu1 %v95_v25  ;;  %2767 = vmatmul.msk.f32.gmra.mxu2 %vm453_vm0, %v96_v37  ;;  %v1094_v36 = vpop.f32.mrf.mxu0  ;;  %v109_v10 = vld [vmem:[%s6094_s0 + $0x290] sm:$0xff]  ;;  %v116_v26 = vld [vmem:[%s6094_s0 + $0x2c8] sm:$0xff] }
 0x1ab   :  { %1384 = vmatmul.f32.gmra.mxu3 %v2925_v32 }
 0x1ac   :  { %v868_v34 = vpop.f32.mrf.mxu2  ;;  %1497 = vmatmul.f32.gmra.mxu0 %v2926_v63  ;;  %v378_v63 = vld [vmem:[%s6095_s1 + $0x3f8] sm:$0xff] }
 0x1ad   :  { %v869_v24 = vadd.f32 %v868_v34, %v756_v38  ;;  %v330_v34 = vld [vmem:[%s6095_s1 + $0x278] sm:$0xff]  ;;  %1680 = vmatpush.msrb.mxu2 %v378_v63 }
 0x1ae   :  { %v758_v39 = vpop.f32.mrf.mxu1  ;;  %v981_v41 = vpop.f32.mrf.mxu3  ;;  %1575 = vmatpush.msrb.mxu1 %v330_v34 }
 0x1af   :  { %v982_v6 = vadd.f32 %v981_v41, %v869_v24  ;;  %v759_v42 = vadd.f32 %v758_v39, %v3727_v58  ;;  %v110_v58 = vld [vmem:[%s6094_s0 + $0x298] sm:$0xff]  ;;  %v2931_v39 = vld [vmem:[%s6094_s0 + $0x2a0] sm:$0xff] }
 0x1b0   :  { %v410_v41 = vld [vmem:[%s6095_s1 + $0x4f8] sm:$0xff] }
 0x1b1   :  { %v4398_v55 = vadd.f32 %v1094_v36, %v982_v6  ;;  %1161 = vmatmul.f32.gmra.mxu1 %v102_v46  ;;  %2768 = vmatmul.msk.f32.gmra.mxu2 %vm453_vm0, %v103_v47  ;;  %v1097_v56 = vpop.f32.mrf.mxu0  ;;  %v2932_v47 = vld [vmem:[%s6094_s0 + $0x2a8] sm:$0xff] }
 0x1b2   :  { %1793 = vmatpush.msrb.mxu3 %v410_v41 }
 0x1b3   :  { %1387 = vmatmul.f32.gmra.mxu3 %v2927_v49 }
 0x1b4   :  { %v871_v54 = vpop.f32.mrf.mxu2  ;;  %1500 = vmatmul.f32.gmra.mxu0 %v2928_v12 }
 0x1b5   :  { %v872_v7 = vadd.f32 %v871_v54, %v759_v42  ;;  %v124_v42 = vld [vmem:[%s6094_s0 + $0x308] sm:$0xff] }
 0x1b6   :  { %v761_v57 = vpop.f32.mrf.mxu1  ;;  %v984_v52 = vpop.f32.mrf.mxu3 }
 0x1b7   :  { %v985_v30 = vadd.f32 %v984_v52, %v872_v7  ;;  %v762_v15 = vadd.f32 %v761_v57, %v3749_v4  ;;  %v117_v4 = vld [vmem:[%s6094_s0 + $0x2d0] sm:$0xff]  ;;  %v2933_v57 = vld [vmem:[%s6094_s0 + $0x2d8] sm:$0xff] }
 0x1b9   :  { %v4417_v44 = vadd.f32 %v1097_v56, %v985_v30  ;;  %1164 = vmatmul.f32.gmra.mxu1 %v109_v10  ;;  %2769 = vmatmul.msk.f32.gmra.mxu2 %vm453_vm0, %v110_v58  ;;  %v1100_v13 = vpop.f32.mrf.mxu0  ;;  %v2934_v10 = vld [vmem:[%s6094_s0 + $0x2e0] sm:$0xff] }
 0x1bb   :  { %1390 = vmatmul.f32.gmra.mxu3 %v2929_v53 }
 0x1bc   :  { %v874_v19 = vpop.f32.mrf.mxu2  ;;  %1503 = vmatmul.f32.gmra.mxu0 %v2930_v23 }
 0x1bd   :  { %v875_v21 = vadd.f32 %v874_v19, %v762_v15  ;;  %v130_v15 = vld [vmem:[%s6094_s0 + $0x338] sm:$0xff] }
 0x1be   :  { %v764_v25 = vpop.f32.mrf.mxu1  ;;  %v987_v37 = vpop.f32.mrf.mxu3 }
 0x1bf   :  { %v988_v36 = vadd.f32 %v987_v37, %v875_v21  ;;  %v765_v24 = vadd.f32 %v764_v25, %v3780_v17  ;;  %v123_v17 = vld [vmem:[%s6094_s0 + $0x300] sm:$0xff]  ;;  %v328_v21 = vld [vmem:[%s6095_s1 + $0x268] sm:$0xff] }
 0x1c0   :  { %v376_v25 = vld [vmem:[%s6095_s1 + $0x3e8] sm:$0xff]  ;;  %1576 = vmatpush.msrb.mxu1 %v328_v21 }
 0x1c1   :  { %v4433_v38 = vadd.f32 %v1100_v13, %v988_v36  ;;  %1167 = vmatmul.f32.gmra.mxu1 %v116_v26  ;;  %2770 = vmatmul.msk.f32.gmra.mxu2 %vm453_vm0, %v117_v4  ;;  %v1103_v32 = vpop.f32.mrf.mxu0  ;;  %v2935_v26 = vld [vmem:[%s6094_s0 + $0x310] sm:$0xff]  ;;  %v408_v4 = vld [vmem:[%s6095_s1 + $0x4e8] sm:$0xff] }
 0x1c2   :  { %1681 = vmatpush.msrb.mxu2 %v376_v25  ;;  %1794 = vmatpush.msrb.mxu3 %v408_v4  ;;  %v151_v4 = vld [vmem:[%s6094_s0 + $0x3e0] sm:$0xff] }
 0x1c3   :  { %1393 = vmatmul.f32.gmra.mxu3 %v2931_v39  ;;  %v138_v39 = vld [vmem:[%s6094_s0 + $0x378] sm:$0xff] }
 0x1c4   :  { %v877_v46 = vpop.f32.mrf.mxu2  ;;  %1506 = vmatmul.f32.gmra.mxu0 %v2932_v47 }
 0x1c5   :  { %v878_v6 = vadd.f32 %v877_v46, %v765_v24 }
 0x1c6   :  { %v767_v56 = vpop.f32.mrf.mxu1  ;;  %v990_v62 = vpop.f32.mrf.mxu3 }
 0x1c7   :  { %v991_v49 = vadd.f32 %v990_v62, %v878_v6  ;;  %v768_v7 = vadd.f32 %v767_v56, %v3802_v29  ;;  %v131_v29 = vld [vmem:[%s6094_s0 + $0x340] sm:$0xff]  ;;  %v2937_v56 = vld [vmem:[%s6094_s0 + $0x348] sm:$0xff] }
 0x1c9   :  { %v4458_v54 = vadd.f32 %v1103_v32, %v991_v49  ;;  %1170 = vmatmul.f32.gmra.mxu1 %v123_v17  ;;  %2771 = vmatmul.msk.f32.gmra.mxu2 %vm453_vm0, %v124_v42  ;;  %v1106_v12 = vpop.f32.mrf.mxu0  ;;  %v2936_v32 = vld [vmem:[%s6094_s0 + $0x318] sm:$0xff]  ;;  %v2938_v17 = vld [vmem:[%s6094_s0 + $0x350] sm:$0xff] }
 0x1cb   :  { %1396 = vmatmul.f32.gmra.mxu3 %v2933_v57 }
 0x1cc   :  { %v880_v52 = vpop.f32.mrf.mxu2  ;;  %1509 = vmatmul.f32.gmra.mxu0 %v2934_v10 }
 0x1cd   :  { %v881_v58 = vadd.f32 %v880_v52, %v768_v7  ;;  %v144_v7 = vld [vmem:[%s6094_s0 + $0x3a8] sm:$0xff] }
 0x1ce   :  { %v770_v30 = vpop.f32.mrf.mxu1  ;;  %v993_v13 = vpop.f32.mrf.mxu3 }
 0x1cf   :  { %v994_v53 = vadd.f32 %v993_v13, %v881_v58  ;;  %v771_v37 = vadd.f32 %v770_v30, %v3830_v50  ;;  %v137_v50 = vld [vmem:[%s6094_s0 + $0x370] sm:$0xff]  ;;  %v326_v58 = vld [vmem:[%s6095_s1 + $0x258] sm:$0xff] }
 0x1d0   :  { %v374_v30 = vld [vmem:[%s6095_s1 + $0x3d8] sm:$0xff]  ;;  %1577 = vmatpush.msrb.mxu1 %v326_v58 }
 0x1d1   :  { %v4474_v19 = vadd.f32 %v1106_v12, %v994_v53  ;;  %1173 = vmatmul.f32.gmra.mxu1 %v130_v15  ;;  %2772 = vmatmul.msk.f32.gmra.mxu2 %vm453_vm0, %v131_v29  ;;  %v1109_v23 = vpop.f32.mrf.mxu0  ;;  %v2939_v15 = vld [vmem:[%s6094_s0 + $0x380] sm:$0xff] }
 0x1d2   :  { %1682 = vmatpush.msrb.mxu2 %v374_v30  ;;  %v2940_v29 = vld [vmem:[%s6096_s2] sm:$0x3]  ;;  %v2945_v30 = vld [vmem:[%s6094_s0 + $0x3f8] sm:$0xff] }
 0x1d3   :  { %1399 = vmatmul.f32.gmra.mxu3 %v2935_v26  ;;  %v4531_v53 = vperm.slane %v2940_v29, 1  ;;  %v165_v29 = vld [vmem:[%s6094_s0 + $0x450] sm:$0xff] }
 0x1d4   :  { %v883_v36 = vpop.f32.mrf.mxu2  ;;  %1512 = vmatmul.f32.gmra.mxu0 %v2936_v32 }
 0x1d5   :  { %v884_v34 = vadd.f32 %v883_v36, %v771_v37  ;;  %v152_v36 = vld [vmem:[%s6094_s0 + $0x3e8] sm:$0xff] }
 0x1d6   :  { %v773_v63 = vpop.f32.mrf.mxu1  ;;  %v996_v24 = vpop.f32.mrf.mxu3 }
 0x1d7   :  { %v997_v41 = vadd.f32 %v996_v24, %v884_v34  ;;  %v774_v6 = vadd.f32 %v773_v63, %v3852_v3  ;;  %v145_v3 = vld [vmem:[%s6094_s0 + $0x3b0] sm:$0xff] }
 0x1d9   :  { %v4499_v46 = vadd.f32 %v1109_v23, %v997_v41  ;;  %1176 = vmatmul.f32.gmra.mxu1 %v137_v50  ;;  %2773 = vmatmul.msk.f32.gmra.mxu2 %vm453_vm0, %v138_v39  ;;  %v1112_v47 = vpop.f32.mrf.mxu0  ;;  %v406_v23 = vld [vmem:[%s6095_s1 + $0x4d8] sm:$0xff]  ;;  %v2943_v41 = vld [vmem:[%s6094_s0 + $0x3c0] sm:$0xff] }
 0x1da   :  { %1795 = vmatpush.msrb.mxu3 %v406_v23  ;;  %v2942_v50 = vld [vmem:[%s6094_s0 + $0x3b8] sm:$0xff] }
 0x1db   :  { %1402 = vmatmul.f32.gmra.mxu3 %v2937_v56  ;;  %v166_v23 = vld [vmem:[%s6094_s0 + $0x458] sm:$0xff] }
 0x1dc   :  { %v886_v62 = vpop.f32.mrf.mxu2  ;;  %1515 = vmatmul.f32.gmra.mxu0 %v2938_v17 }
 0x1dd   :  { %v887_v42 = vadd.f32 %v886_v62, %v774_v6  ;;  %v158_v62 = vld [vmem:[%s6094_s0 + $0x418] sm:$0xff] }
 0x1de   :  { %v999_v49 = vpop.f32.mrf.mxu3  ;;  %v1132_v12 = vpop.f32.mrf.mxu1 }
 0x1df   :  { %v1000_v57 = vadd.f32 %v999_v49, %v887_v42  ;;  %v1133_v13 = vadd.f32 %v1132_v12, %v3877_v28  ;;  %v2941_v28 = vld [vmem:[%s6094_s0 + $0x388] sm:$0xff] }
 0x1e0   :  { %v324_v12 = vld [vmem:[%s6095_s1 + $0x248] sm:$0xff] }
 0x1e1   :  { %v4515_v52 = vadd.f32 %v1112_v47, %v1000_v57  ;;  %1179 = vmatmul.f32.gmra.mxu1 %v144_v7  ;;  %2774 = vmatmul.msk.f32.gmra.mxu2 %vm453_vm0, %v145_v3  ;;  %v1471_v10 = vpop.f32.mrf.mxu0  ;;  %v372_v7 = vld [vmem:[%s6095_s1 + $0x3c8] sm:$0xff]  ;;  %v2944_v57 = vld [vmem:[%s6094_s0 + $0x3f0] sm:$0xff] }
 0x1e2   :  { %1578 = vmatpush.msrb.mxu1 %v324_v12  ;;  %1683 = vmatpush.msrb.mxu2 %v372_v7  ;;  %v402_v12 = vld [vmem:[%s6095_s1 + $0x4b8] sm:$0xff] }
 0x1e3   :  { %1405 = vmatmul.f32.gmra.mxu3 %v2939_v15 }
 0x1e4   :  { %v1245_v21 = vpop.f32.mrf.mxu2  ;;  %1518 = vmatmul.f32.gmra.mxu0 %v2941_v28 }
 0x1e5   :  { %v4539_v25 = vadd.f32 %v1245_v21, %v1133_v13 }
 0x1e6   :  { %v1135_v37 = vpop.f32.mrf.mxu1  ;;  %v1358_v26 = vpop.f32.mrf.mxu3 }
 0x1e7   :  { %v1359_v32 = vadd.f32 %v1358_v26, %v4531_v53  ;;  %v1136_v24 = vadd.f32 %v1135_v37, %v3893_v59  ;;  %v159_v59 = vld [vmem:[%s6094_s0 + $0x420] sm:$0xff] }
 0x1e9   :  { %v4548_v34 = vadd.f32 %v1471_v10, %v1359_v32  ;;  %1182 = vmatmul.f32.gmra.mxu1 %v151_v4  ;;  %2775 = vmatmul.msk.f32.gmra.mxu2 %vm453_vm0, %v152_v36  ;;  %v1474_v63 = vpop.f32.mrf.mxu0  ;;  %v404_v10 = vld [vmem:[%s6095_s1 + $0x4c8] sm:$0xff]  ;;  %v2947_v32 = vld [vmem:[%s6094_s0 + $0x430] sm:$0xff] }
 0x1ea   :  { %1796 = vmatpush.msrb.mxu3 %v404_v10  ;;  %v2946_v4 = vld [vmem:[%s6094_s0 + $0x428] sm:$0xff] }
 0x1eb   :  { %1408 = vmatmul.f32.gmra.mxu3 %v2942_v50 }
 0x1ec   :  { %v1248_v39 = vpop.f32.mrf.mxu2  ;;  %1521 = vmatmul.f32.gmra.mxu0 %v2943_v41  ;;  %1797 = vmatpush.msrb.mxu3 %v402_v12  ;;  %v2953_v12 = vld [vmem:[%s6094_s0 + $0x4d8] sm:$0xff] }
 0x1ed   :  { %v4558_v47 = vadd.f32 %v1248_v39, %v1136_v24  ;;  %v172_v39 = vld [vmem:[%s6094_s0 + $0x488] sm:$0xff] }
 0x1ee   :  { %v1138_v6 = vpop.f32.mrf.mxu1  ;;  %v1361_v56 = vpop.f32.mrf.mxu3 }
 0x1ef   :  { %v1362_v17 = vadd.f32 %v1361_v56, %v4531_v53  ;;  %v1139_v3 = vadd.f32 %v1138_v6, %v3915_v16 }
 0x1f1   :  { %v4567_v42 = vadd.f32 %v1474_v63, %v1362_v17  ;;  %1185 = vmatmul.f32.gmra.mxu1 %v158_v62  ;;  %2776 = vmatmul.msk.f32.gmra.mxu2 %vm453_vm0, %v159_v59  ;;  %v1477_v49 = vpop.f32.mrf.mxu0  ;;  %v322_v62 = vld [vmem:[%s6095_s1 + $0x238] sm:$0xff] }
 0x1f2   :  { %v370_v59 = vld [vmem:[%s6095_s1 + $0x3b8] sm:$0xff]  ;;  %1579 = vmatpush.msrb.mxu1 %v322_v62 }
 0x1f3   :  { %1411 = vmatmul.f32.gmra.mxu3 %v2944_v57  ;;  %1684 = vmatpush.msrb.mxu2 %v370_v59  ;;  %v2952_v59 = vld [vmem:[%s6094_s0 + $0x4d0] sm:$0xff] }
 0x1f4   :  { %v1251_v58 = vpop.f32.mrf.mxu2  ;;  %1524 = vmatmul.f32.gmra.mxu0 %v2945_v30  ;;  %v180_v30 = vld [vmem:[%s6094_s0 + $0x4c8] sm:$0xff] }
 0x1f5   :  { %v4586_v13 = vadd.f32 %v1251_v58, %v1139_v3  ;;  %v2949_v3 = vld [vmem:[%s6094_s0 + $0x468] sm:$0xff]  ;;  %v179_v58 = vld [vmem:[%s6094_s0 + $0x4c0] sm:$0xff] }
 0x1f6   :  { %v1141_v15 = vpop.f32.mrf.mxu1  ;;  %v1364_v16 = vpop.f32.mrf.mxu3 }
 0x1f7   :  { %v1365_v21 = vadd.f32 %v1364_v16, %v4531_v53  ;;  %v1142_v26 = vadd.f32 %v1141_v15, %v3931_v45  ;;  %v173_v45 = vld [vmem:[%s6094_s0 + $0x490] sm:$0xff] }
 0x1f9   :  { %v4595_v28 = vadd.f32 %v1477_v49, %v1365_v21  ;;  %1188 = vmatmul.f32.gmra.mxu1 %v165_v29  ;;  %2777 = vmatmul.msk.f32.gmra.mxu2 %vm453_vm0, %v166_v23  ;;  %v1480_v37 = vpop.f32.mrf.mxu0  ;;  %v2948_v49 = vld [vmem:[%s6094_s0 + $0x460] sm:$0xff]  ;;  %v2950_v21 = vld [vmem:[%s6094_s0 + $0x498] sm:$0xff] }
 0x1fb   :  { %1414 = vmatmul.f32.gmra.mxu3 %v2946_v4 }
 0x1fc   :  { %v1254_v36 = vpop.f32.mrf.mxu2  ;;  %1527 = vmatmul.f32.gmra.mxu0 %v2947_v32 }
 0x1fd   :  { %v4605_v63 = vadd.f32 %v1254_v36, %v1142_v26  ;;  %v2951_v26 = vld [vmem:[%s6094_s0 + $0x4a0] sm:$0xff] }
 0x1fe   :  { %v1144_v24 = vpop.f32.mrf.mxu1  ;;  %v1367_v50 = vpop.f32.mrf.mxu3 }
 0x1ff   :  { %v1368_v41 = vadd.f32 %v1367_v50, %v4531_v53  ;;  %v1145_v17 = vadd.f32 %v1144_v24, %v3953_v9  ;;  %v186_v24 = vld [vmem:[%s6094_s0 + $0x4f8] sm:$0xff] }
 0x201   :  { %v4614_v6 = vadd.f32 %v1480_v37, %v1368_v41  ;;  %1191 = vmatmul.f32.gmra.mxu1 %v172_v39  ;;  %2778 = vmatmul.msk.f32.gmra.mxu2 %vm453_vm0, %v173_v45  ;;  %v1483_v56 = vpop.f32.mrf.mxu0  ;;  %v320_v41 = vld [vmem:[%s6095_s1 + $0x228] sm:$0xff] }
 0x202   :  { %1580 = vmatpush.msrb.mxu1 %v320_v41  ;;  %v318_v41 = vld [vmem:[%s6095_s1 + $0x218] sm:$0xff] }
 0x203   :  { %1417 = vmatmul.f32.gmra.mxu3 %v2948_v49 }
 0x204   :  { %v1257_v7 = vpop.f32.mrf.mxu2  ;;  %1530 = vmatmul.f32.gmra.mxu0 %v2949_v3  ;;  %1581 = vmatpush.msrb.mxu1 %v318_v41  ;;  %v215_v41 = vld [vmem:[%s6094_s0 + $0x5e0] sm:$0xff] }
 0x205   :  { %v4633_v57 = vadd.f32 %v1257_v7, %v1145_v17  ;;  %v400_v17 = vld [vmem:[%s6095_s1 + $0x4a8] sm:$0xff] }
 0x206   :  { %v1147_v10 = vpop.f32.mrf.mxu1  ;;  %v1370_v9 = vpop.f32.mrf.mxu3  ;;  %1798 = vmatpush.msrb.mxu3 %v400_v17  ;;  %v398_v17 = vld [vmem:[%s6095_s1 + $0x498] sm:$0xff] }
 0x207   :  { %v1371_v15 = vadd.f32 %v1370_v9, %v4531_v53  ;;  %v1148_v23 = vadd.f32 %v1147_v10, %v3969_v31  ;;  %v187_v31 = vld [vmem:[%s6094_s0 + $0x500] sm:$0xff]  ;;  %v193_v10 = vld [vmem:[%s6094_s0 + $0x530] sm:$0xff]  ;;  %v194_v9 = vld [vmem:[%s6094_s0 + $0x538] sm:$0xff] }
 0x208   :  { %1799 = vmatpush.msrb.mxu3 %v398_v17 }
 0x209   :  { %v4642_v16 = vadd.f32 %v1483_v56, %v1371_v15  ;;  %1194 = vmatmul.f32.gmra.mxu1 %v179_v58  ;;  %2779 = vmatmul.msk.f32.gmra.mxu2 %vm453_vm0, %v180_v30  ;;  %v1486_v29 = vpop.f32.mrf.mxu0  ;;  %v368_v56 = vld [vmem:[%s6095_s1 + $0x3a8] sm:$0xff] }
 0x20a   :  { %1685 = vmatpush.msrb.mxu2 %v368_v56  ;;  %v366_v56 = vld [vmem:[%s6095_s1 + $0x398] sm:$0xff] }
 0x20b   :  { %1420 = vmatmul.f32.gmra.mxu3 %v2950_v21 }
 0x20c   :  { %v1260_v37 = vpop.f32.mrf.mxu2  ;;  %1533 = vmatmul.f32.gmra.mxu0 %v2951_v26  ;;  %1686 = vmatpush.msrb.mxu2 %v366_v56 }
 0x20d   :  { %v4652_v4 = vadd.f32 %v1260_v37, %v1148_v23  ;;  %v2954_v23 = vld [vmem:[%s6094_s0 + $0x508] sm:$0xff]  ;;  %v2955_v37 = vld [vmem:[%s6094_s0 + $0x510] sm:$0xff] }
 0x20e   :  { %v1150_v36 = vpop.f32.mrf.mxu1  ;;  %v1373_v32 = vpop.f32.mrf.mxu3 }
 0x20f   :  { %v1374_v50 = vadd.f32 %v1373_v32, %v4531_v53  ;;  %v1151_v62 = vadd.f32 %v1150_v36, %v3991_v1 }
 0x211   :  { %v4661_v39 = vadd.f32 %v1486_v29, %v1374_v50  ;;  %1197 = vmatmul.f32.gmra.mxu1 %v186_v24  ;;  %2780 = vmatmul.msk.f32.gmra.mxu2 %vm453_vm0, %v187_v31  ;;  %v1489_v45 = vpop.f32.mrf.mxu0  ;;  %v200_v24 = vld [vmem:[%s6094_s0 + $0x568] sm:$0xff] }
 0x213   :  { %1423 = vmatmul.f32.gmra.mxu3 %v2952_v59  ;;  %v2956_v59 = vld [vmem:[%s6094_s0 + $0x540] sm:$0xff] }
 0x214   :  { %v1263_v49 = vpop.f32.mrf.mxu2  ;;  %1536 = vmatmul.f32.gmra.mxu0 %v2953_v12  ;;  %v2957_v12 = vld [vmem:[%s6094_s0 + $0x548] sm:$0xff] }
 0x215   :  { %v4680_v7 = vadd.f32 %v1263_v49, %v1151_v62 }
 0x216   :  { %v1153_v3 = vpop.f32.mrf.mxu1  ;;  %v1376_v1 = vpop.f32.mrf.mxu3 }
 0x217   :  { %v1377_v58 = vadd.f32 %v1376_v1, %v4531_v53  ;;  %v1154_v29 = vadd.f32 %v1153_v3, %v4007_v18  ;;  %v201_v18 = vld [vmem:[%s6094_s0 + $0x570] sm:$0xff] }
 0x219   :  { %v4689_v30 = vadd.f32 %v1489_v45, %v1377_v58  ;;  %1200 = vmatmul.f32.gmra.mxu1 %v193_v10  ;;  %2781 = vmatmul.msk.f32.gmra.mxu2 %vm453_vm0, %v194_v9  ;;  %v1492_v15 = vpop.f32.mrf.mxu0  ;;  %v4732_v10 = vld [vmem:[%s6094_s0 + $0x5a0] sm:$0xff]  ;;  %v208_v9 = vld [vmem:[%s6094_s0 + $0x5a8] sm:$0xff] }
 0x21b   :  { %1426 = vmatmul.f32.gmra.mxu3 %v2954_v23 }
 0x21c   :  { %v1266_v21 = vpop.f32.mrf.mxu2  ;;  %1539 = vmatmul.f32.gmra.mxu0 %v2955_v37  ;;  %v442_v37 = vld [vmem:[%s6095_s1 + $0x5f8] sm:$0xff] }
 0x21d   :  { %v4699_v26 = vadd.f32 %v1266_v21, %v1154_v29  ;;  %v2958_v21 = vld [vmem:[%s6094_s0 + $0x578] sm:$0xff]  ;;  %1906 = vmatpush.msrb.mxu0 %v442_v37 }
 0x21e   :  { %v1156_v36 = vpop.f32.mrf.mxu1  ;;  %v1379_v32 = vpop.f32.mrf.mxu3 }
 0x21f   :  { %v1380_v31 = vadd.f32 %v1379_v32, %v4531_v53  ;;  %v1157_v62 = vadd.f32 %v1156_v36, %v4029_v51  ;;  %v2959_v32 = vld [vmem:[%s6094_s0 + $0x580] sm:$0xff] }
 0x221   :  { %v4708_v50 = vadd.f32 %v1492_v15, %v1380_v31  ;;  %1203 = vmatmul.f32.gmra.mxu1 %v200_v24  ;;  %2782 = vmatmul.msk.f32.gmra.mxu2 %vm453_vm0, %v201_v18  ;;  %v1495_v45 = vpop.f32.mrf.mxu0 }
 0x223   :  { %1429 = vmatmul.f32.gmra.mxu3 %v2956_v59  ;;  %v438_v59 = vld [vmem:[%s6095_s1 + $0x5d8] sm:$0xff] }
 0x224   :  { %v1269_v49 = vpop.f32.mrf.mxu2  ;;  %1542 = vmatmul.f32.gmra.mxu0 %v2957_v12  ;;  %v316_v12 = vld [vmem:[%s6095_s1 + $0x208] sm:$0xff] }
 0x225   :  { %v4727_v3 = vadd.f32 %v1269_v49, %v1157_v62  ;;  %v364_v62 = vld [vmem:[%s6095_s1 + $0x388] sm:$0xff]  ;;  %1582 = vmatpush.msrb.mxu1 %v316_v12 }
 0x226   :  { %v1159_v1 = vpop.f32.mrf.mxu1  ;;  %v1382_v51 = vpop.f32.mrf.mxu3  ;;  %1687 = vmatpush.msrb.mxu2 %v364_v62  ;;  %v222_v62 = vld [vmem:[%s6094_s0 + $0x618] sm:$0xff]  ;;  %v432_v12 = vld [vmem:[%s6095_s1 + $0x5a8] sm:$0xff] }
 0x227   :  { %v1383_v58 = vadd.f32 %v1382_v51, %v4531_v53  ;;  %v1160_v23 = vadd.f32 %v1159_v1, %v4054_v14  ;;  %v440_v14 = vld [vmem:[%s6095_s1 + $0x5e8] sm:$0xff]  ;;  %v362_v1 = vld [vmem:[%s6095_s1 + $0x378] sm:$0xff] }
 0x228   :  { %1907 = vmatpush.msrb.mxu0 %v440_v14  ;;  %v396_v51 = vld [vmem:[%s6095_s1 + $0x488] sm:$0xff]  ;;  %1688 = vmatpush.msrb.mxu2 %v362_v1  ;;  %v358_v14 = vld [vmem:[%s6095_s1 + $0x358] sm:$0xff] }
 0x229   :  { %v4738_v15 = vadd.f32 %v1495_v45, %v1383_v58  ;;  %1206 = vmatmul.f32.gmra.mxu1 %v4732_v10  ;;  %2783 = vmatmul.msk.f32.gmra.mxu2 %vm453_vm0, %v208_v9  ;;  %v1498_v29 = vpop.f32.mrf.mxu0  ;;  %v4760_v45 = vld [vmem:[%s6094_s0 + $0x5d8] sm:$0xff]  ;;  %v436_v9 = vld [vmem:[%s6095_s1 + $0x5c8] sm:$0xff] }
 0x22a   :  { %1908 = vmatpush.msrb.mxu0 %v438_v59  ;;  %1800 = vmatpush.msrb.mxu3 %v396_v51  ;;  %v356_v1 = vld [vmem:[%s6095_s1 + $0x348] sm:$0xff] }
 0x22b   :  { %1432 = vmatmul.f32.gmra.mxu3 %v2958_v21  ;;  %v394_v21 = vld [vmem:[%s6095_s1 + $0x478] sm:$0xff] }
 0x22c   :  { %v1272_v36 = vpop.f32.mrf.mxu2  ;;  %1545 = vmatmul.f32.gmra.mxu0 %v2959_v32  ;;  %1801 = vmatpush.msrb.mxu3 %v394_v21  ;;  %v2962_v21 = vld [vmem:[%s6094_s0 + $0x5e8] sm:$0xff] }
 0x22d   :  { %v4752_v24 = vadd.f32 %v1272_v36, %v1160_v23  ;;  %v360_v23 = vld [vmem:[%s6095_s1 + $0x368] sm:$0xff]  ;;  %v2961_v36 = vld [vmem:[%s6094_s0 + $0x5b8] sm:$0xff]  ;;  %1909 = vmatpush.msrb.mxu0 %v436_v9 }
 0x22e   :  { %v1162_v18 = vpop.f32.mrf.mxu1  ;;  %v1385_v31 = vpop.f32.mrf.mxu3  ;;  %1689 = vmatpush.msrb.mxu2 %v360_v23 }
 0x22f   :  { %v1386_v56 = vadd.f32 %v1385_v31, %v4531_v53  ;;  %v1163_v58 = vadd.f32 %v1162_v18, %v4094_v61  ;;  %v434_v61 = vld [vmem:[%s6095_s1 + $0x5b8] sm:$0xff]  ;;  %v392_v18 = vld [vmem:[%s6095_s1 + $0x468] sm:$0xff] }
 0x230   :  { %1910 = vmatpush.msrb.mxu0 %v434_v61  ;;  %1690 = vmatpush.msrb.mxu2 %v358_v14  ;;  %v2963_v61 = vld [vmem:[%s6094_s0 + $0x5f0] sm:$0xff]  ;;  %v352_v14 = vld [vmem:[%s6095_s1 + $0x328] sm:$0xff] }
 0x231   :  { %v4772_v17 = vadd.f32 %v1498_v29, %v1386_v56  ;;  %1209 = vmatmul.f32.gmra.mxu1 %v4760_v45  ;;  %2784 = vmatmul.msk.f32.gmra.mxu2 %vm453_vm0, %v215_v41  ;;  %v1501_v49 = vpop.f32.mrf.mxu0  ;;  %v2960_v29 = vld [vmem:[%s6094_s0 + $0x5b0] sm:$0xff] }
 0x232   :  { %v4815_v56 = vld [vmem:[%s6094_s0 + $0x610] sm:$0xff]  ;;  %1802 = vmatpush.msrb.mxu3 %v392_v18  ;;  %1911 = vmatpush.msrb.mxu0 %v432_v12 }
 0x233   :  { %1435 = vmatmul.f32.gmra.mxu3 %v2960_v29  ;;  %1691 = vmatpush.msrb.mxu2 %v356_v1  ;;  %v430_v29 = vld [vmem:[%s6095_s1 + $0x598] sm:$0xff]  ;;  %v229_v12 = vld [vmem:[%s6094_s0 + $0x650] sm:$0xff] }
 0x234   :  { %v1275_v37 = vpop.f32.mrf.mxu2  ;;  %1548 = vmatmul.f32.gmra.mxu0 %v2961_v36 }
 0x235   :  { %v4804_v32 = vadd.f32 %v1275_v37, %v1163_v58  ;;  %v390_v58 = vld [vmem:[%s6095_s1 + $0x458] sm:$0xff]  ;;  %v388_v37 = vld [vmem:[%s6095_s1 + $0x448] sm:$0xff]  ;;  %1912 = vmatpush.msrb.mxu0 %v430_v29 }
 0x236   :  { %v1165_v31 = vpop.f32.mrf.mxu1  ;;  %v1388_v41 = vpop.f32.mrf.mxu3  ;;  %1803 = vmatpush.msrb.mxu3 %v390_v58  ;;  %v426_v58 = vld [vmem:[%s6095_s1 + $0x578] sm:$0xff] }
 0x237   :  { %v1389_v59 = vadd.f32 %v1388_v41, %v4531_v53  ;;  %v1166_v23 = vadd.f32 %v1165_v31, %v4134_v60  ;;  %v428_v60 = vld [vmem:[%s6095_s1 + $0x588] sm:$0xff]  ;;  %v386_v31 = vld [vmem:[%s6095_s1 + $0x438] sm:$0xff] }
 0x238   :  { %1804 = vmatpush.msrb.mxu3 %v388_v37  ;;  %1913 = vmatpush.msrb.mxu0 %v428_v60  ;;  %v350_v29 = vld [vmem:[%s6095_s1 + $0x318] sm:$0xff]  ;;  %v2964_v60 = vld [vmem:[%s6094_s0 + $0x620] sm:$0xff] }
 0x239   :  { %v4827_v51 = vadd.f32 %v1501_v49, %v1389_v59  ;;  %1212 = vmatmul.f32.gmra.mxu1 %v4815_v56  ;;  %2785 = vmatmul.msk.f32.gmra.mxu2 %vm453_vm0, %v222_v62  ;;  %v1504_v9 = vpop.f32.mrf.mxu0  ;;  %v354_v49 = vld [vmem:[%s6095_s1 + $0x338] sm:$0xff]  ;;  %v4864_v59 = vld [vmem:[%s6094_s0 + $0x648] sm:$0xff] }
 0x23a   :  { %1692 = vmatpush.msrb.mxu2 %v354_v49  ;;  %1805 = vmatpush.msrb.mxu3 %v386_v31  ;;  %v446_v37 = vld [vmem:[%s6095_s1 + $0x618] sm:$0xff] }
 0x23b   :  { %1438 = vmatmul.f32.gmra.mxu3 %v2962_v21  ;;  %v384_v21 = vld [vmem:[%s6095_s1 + $0x428] sm:$0xff]  ;;  %1914 = vmatpush.msrb.mxu0 %v426_v58 }
 0x23c   :  { %v1278_v36 = vpop.f32.mrf.mxu2  ;;  %1551 = vmatmul.f32.gmra.mxu0 %v2963_v61  ;;  %1693 = vmatpush.msrb.mxu2 %v352_v14  ;;  %v382_v14 = vld [vmem:[%s6095_s1 + $0x418] sm:$0xff] }
 0x23d   :  { %v4856_v18 = vadd.f32 %v1278_v36, %v1166_v23  ;;  %v348_v36 = vld [vmem:[%s6095_s1 + $0x308] sm:$0xff]  ;;  %2033 = vmatpush.msra.mxu1 %v446_v37  ;;  %1806 = vmatpush.msrb.mxu3 %v384_v21 }
 0x23e   :  { %v1168_v41 = vpop.f32.mrf.mxu1  ;;  %v1391_v62 = vpop.f32.mrf.mxu3  ;;  %1694 = vmatpush.msrb.mxu2 %v350_v29  ;;  %v4913_v29 = vld [vmem:[%s6094_s0 + $0x680] sm:$0xff]  ;;  %v236_v21 = vld [vmem:[%s6094_s0 + $0x688] sm:$0xff] }
 0x23f   :  { %v1392_v1 = vadd.f32 %v1391_v62, %v4531_v53  ;;  %v1169_v61 = vadd.f32 %v1168_v41, %v4165_v5  ;;  %v2965_v62 = vld [vmem:[%s6094_s0 + $0x628] sm:$0xff]  ;;  %v422_v5 = vld [vmem:[%s6095_s1 + $0x558] sm:$0xff]  ;;  %1807 = vmatpush.msrb.mxu3 %v382_v14 }
 0x240   :  { %1695 = vmatpush.msrb.mxu2 %v348_v36 }
 0x241   :  { %v4876_v49 = vadd.f32 %v1504_v9, %v1392_v1  ;;  %1215 = vmatmul.f32.gmra.mxu1 %v4864_v59  ;;  %2786 = vmatmul.msk.f32.gmra.mxu2 %vm453_vm0, %v229_v12  ;;  %v1507_v23 = vpop.f32.mrf.mxu0  ;;  %v424_v9 = vld [vmem:[%s6095_s1 + $0x568] sm:$0xff] }
 0x242   :  { %1915 = vmatpush.msrb.mxu0 %v424_v9  ;;  %v380_v12 = vld [vmem:[%s6095_s1 + $0x408] sm:$0xff] }
 0x243   :  { %1441 = vmatmul.f32.gmra.mxu3 %v2964_v60  ;;  %v420_v9 = vld [vmem:[%s6095_s1 + $0x548] sm:$0xff]  ;;  %v418_v60 = vld [vmem:[%s6095_s1 + $0x538] sm:$0xff] }
 0x244   :  { %v1281_v31 = vpop.f32.mrf.mxu2  ;;  %1554 = vmatmul.f32.gmra.mxu0 %v2965_v62  ;;  %1808 = vmatpush.msrb.mxu3 %v380_v12 }
 0x245   :  { %v4905_v41 = vadd.f32 %v1281_v31, %v1169_v61  ;;  %1916 = vmatpush.msrb.mxu0 %v422_v5  ;;  %v2966_v31 = vld [vmem:[%s6094_s0 + $0x658] sm:$0xff]  ;;  %v416_v5 = vld [vmem:[%s6095_s1 + $0x528] sm:$0xff] }
 0x246   :  { %v1171_v1 = vpop.f32.mrf.mxu1  ;;  %v1394_v58 = vpop.f32.mrf.mxu3 }
 0x247   :  { %v1395_v37 = vadd.f32 %v1394_v58, %v4531_v53  ;;  %1917 = vmatpush.msrb.mxu0 %v420_v9  ;;  %v1172_v14 = vadd.f32 %v1171_v1, %v4190_v35  ;;  %v4944_v1 = vld [vmem:[%s6094_s0 + $0x6b8] sm:$0xff] }
 0x248   :  { %v414_v9 = vld [vmem:[%s6095_s1 + $0x518] sm:$0xff] }
 0x249   :  { %v4922_v36 = vadd.f32 %v1507_v23, %v1395_v37  ;;  %1218 = vmatmul.f32.gmra.mxu1 %v4913_v29  ;;  %2787 = vmatmul.msk.f32.gmra.mxu2 %vm453_vm0, %v236_v21  ;;  %v1510_v61 = vpop.f32.mrf.mxu0  ;;  %v2967_v23 = vld [vmem:[%s6094_s0 + $0x660] sm:$0xff] }
 0x24a   :  { %1918 = vmatpush.msrb.mxu0 %v418_v60  ;;  %v243_v21 = vld [vmem:[%s6094_s0 + $0x6c0] sm:$0xff] }
 0x24b   :  { %1444 = vmatmul.f32.gmra.mxu3 %v2966_v31  ;;  %v412_v31 = vld [vmem:[%s6095_s1 + $0x508] sm:$0xff] }
 0x24c   :  { %v1284_v62 = vpop.f32.mrf.mxu2  ;;  %1557 = vmatmul.f32.gmra.mxu0 %v2967_v23  ;;  %v2968_v23 = vld [vmem:[%s6094_s0 + $0x690] sm:$0xff] }
 0x24d   :  { %v4939_v12 = vadd.f32 %v1284_v62, %v1172_v14  ;;  %1919 = vmatpush.msrb.mxu0 %v416_v5 }
 0x24e   :  { %v1174_v58 = vpop.f32.mrf.mxu1  ;;  %v1397_v35 = vpop.f32.mrf.mxu3 }
 0x24f   :  { %6102 = vst [vmem:[#allocation5_spill] sm:$0xff] %v4939_v12  ;;  %v1398_v37 = vadd.f32 %v1397_v35, %v4531_v53  ;;  %1920 = vmatpush.msrb.mxu0 %v414_v9  ;;  %v1175_v62 = vadd.f32 %v1174_v58, %v4212_v33  ;;  %v4972_v33 = vld [vmem:[%s6094_s0 + $0x6f0] sm:$0xff]  ;;  %v250_v58 = vld [vmem:[%s6094_s0 + $0x6f8] sm:$0xff] }
 0x251   :  { %v4953_v14 = vadd.f32 %v1510_v61, %v1398_v37  ;;  %1221 = vmatmul.f32.gmra.mxu1 %v4944_v1  ;;  %2788 = vmatmul.msk.f32.gmra.mxu2 %vm453_vm0, %v243_v21  ;;  %v1513_v60 = vpop.f32.mrf.mxu0  ;;  %v2969_v61 = vld [vmem:[%s6094_s0 + $0x698] sm:$0xff] }
 0x252   :  { %1921 = vmatpush.msrb.mxu0 %v412_v31 }
 0x253   :  { %1447 = vmatmul.f32.gmra.mxu3 %v2968_v23 }
 0x254   :  { %v1287_v5 = vpop.f32.mrf.mxu2  ;;  %1560 = vmatmul.f32.gmra.mxu0 %v2969_v61 }
 0x255   :  { %v4967_v35 = vadd.f32 %v1287_v5, %v1175_v62  ;;  %v2970_v5 = vld [vmem:[%s6094_s0 + $0x6c8] sm:$0xff] }
 0x256   :  { %v1177_v21 = vpop.f32.mrf.mxu1  ;;  %v1400_v37 = vpop.f32.mrf.mxu3 }
 0x257   :  { %6103 = vst [vmem:[#allocation6_spill] sm:$0xff] %v4967_v35  ;;  %v1401_v9 = vadd.f32 %v1400_v37, %v4531_v53  ;;  %v1178_v62 = vadd.f32 %v1177_v21, %v4223_v11  ;;  %v2971_v35 = vld [vmem:[%s6094_s0 + $0x6d0] sm:$0xff]  ;;  %v2973_v21 = vld [vmem:[%s6094_s0 + $0x18] sm:$0xff] }
 0x258   :  { %v2972_v11 = vld [vmem:[%s6094_s0 + $0x10] sm:$0xff] }
 0x259   :  { %v4978_v23 = vadd.f32 %v1513_v60, %v1401_v9  ;;  %1224 = vmatmul.f32.gmra.mxu1 %v4972_v33  ;;  %2789 = vmatmul.msk.f32.gmra.mxu2 %vm453_vm0, %v250_v58  ;;  %v1516_v31 = vpop.f32.mrf.mxu0 }
 0x25b   :  { %1450 = vmatmul.f32.gmra.mxu3 %v2970_v5 }
 0x25c   :  { %v1290_v61 = vpop.f32.mrf.mxu2  ;;  %1563 = vmatmul.f32.gmra.mxu0 %v2971_v35 }
 0x25d   :  { %v4989_v60 = vadd.f32 %v1290_v61, %v1178_v62  ;;  %v2974_v62 = vld [vmem:[%s6094_s0 + $0x20] sm:$0xff]  ;;  %v2975_v61 = vld [vmem:[%s6094_s0 + $0x28] sm:$0xff] }
 0x25e   :  { %v1180_v37 = vpop.f32.mrf.mxu1  ;;  %v1403_v9 = vpop.f32.mrf.mxu3 }
 0x25f   :  { %6104 = vst [vmem:[#allocation7_spill] sm:$0xff] %v4989_v60  ;;  %v1404_v58 = vadd.f32 %v1403_v9, %v4531_v53  ;;  %v1181_v35 = vadd.f32 %v1180_v37, %v4242_v0  ;;  %v2976_v0 = vld [vmem:[%s6094_s0 + $0x48] sm:$0xff]  ;;  %v2977_v37 = vld [vmem:[%s6094_s0 + $0x50] sm:$0xff] }
 0x261   :  { %v4992_v12 = vadd.f32 %v1516_v31, %v1404_v58  ;;  %1583 = vmatmul.f32.vlgmr.msrb.gmra.mxu1 %v2972_v11  ;;  %1696 = vmatmul.f32.vlgmr.msrb.gmra.mxu2 %v2973_v21  ;;  %v1519_v5 = vpop.f32.mrf.mxu0 }
 0x263   :  { %1809 = vmatmul.f32.vlgmr.msrb.gmra.mxu3 %v2974_v62 }
 0x264   :  { %v1293_v31 = vpop.f32.mrf.mxu2  ;;  %1922 = vmatmul.f32.vlgmr.msrb.gmra.mxu0 %v2975_v61  ;;  %v2979_v61 = vld [vmem:[%s6094_s0 + $0x60] sm:$0xff] }
 0x265   :  { %v5007_v9 = vadd.f32 %v1293_v31, %v1181_v35  ;;  %v2978_v31 = vld [vmem:[%s6094_s0 + $0x58] sm:$0xff] }
 0x266   :  { %v1183_v58 = vpop.f32.mrf.mxu1  ;;  %v1406_v11 = vpop.f32.mrf.mxu3 }
 0x267   :  { %6105 = vst [vmem:[#allocation8_spill] sm:$0xff] %v5007_v9  ;;  %v1407_v21 = vadd.f32 %v1406_v11, %v4531_v53  ;;  %v1184_v35 = vadd.f32 %v1183_v58, %v4258_v2  ;;  %v2980_v2 = vld [vmem:[%s6094_s0 + $0x80] sm:$0xff]  ;;  %v2981_v58 = vld [vmem:[%s6094_s0 + $0x88] sm:$0xff] }
 0x269   :  { %v5010_v60 = vadd.f32 %v1519_v5, %v1407_v21  ;;  %1586 = vmatmul.f32.gmra.mxu1 %v2976_v0  ;;  %1699 = vmatmul.f32.gmra.mxu2 %v2977_v37  ;;  %v1522_v62 = vpop.f32.mrf.mxu0 }
 0x26b   :  { %1812 = vmatmul.f32.gmra.mxu3 %v2978_v31 }
 0x26c   :  { %v1296_v5 = vpop.f32.mrf.mxu2  ;;  %1925 = vmatmul.f32.gmra.mxu0 %v2979_v61  ;;  %v2983_v61 = vld [vmem:[%s6094_s0 + $0x98] sm:$0xff] }
 0x26d   :  { %v5025_v11 = vadd.f32 %v1296_v5, %v1184_v35  ;;  %v2982_v5 = vld [vmem:[%s6094_s0 + $0x90] sm:$0xff] }
 0x26e   :  { %v1186_v21 = vpop.f32.mrf.mxu1  ;;  %v1409_v0 = vpop.f32.mrf.mxu3 }
 0x26f   :  { %6106 = vst [vmem:[#allocation9_spill] sm:$0xff] %v5025_v11  ;;  %v1410_v37 = vadd.f32 %v1409_v0, %v4531_v53  ;;  %v1187_v35 = vadd.f32 %v1186_v21, %v4277_v20  ;;  %v2984_v20 = vld [vmem:[%s6094_s0 + $0xb8] sm:$0xff]  ;;  %v2985_v21 = vld [vmem:[%s6094_s0 + $0xc0] sm:$0xff] }
 0x271   :  { %v5028_v9 = vadd.f32 %v1522_v62, %v1410_v37  ;;  %1589 = vmatmul.f32.gmra.mxu1 %v2980_v2  ;;  %1702 = vmatmul.f32.gmra.mxu2 %v2981_v58  ;;  %v1525_v31 = vpop.f32.mrf.mxu0 }
 0x273   :  { %1815 = vmatmul.f32.gmra.mxu3 %v2982_v5 }
 0x274   :  { %v1299_v62 = vpop.f32.mrf.mxu2  ;;  %1928 = vmatmul.f32.gmra.mxu0 %v2983_v61  ;;  %v2987_v61 = vld [vmem:[%s6094_s0 + $0xd0] sm:$0xff] }
 0x275   :  { %v5043_v0 = vadd.f32 %v1299_v62, %v1187_v35  ;;  %v2986_v62 = vld [vmem:[%s6094_s0 + $0xc8] sm:$0xff] }
 0x276   :  { %v1189_v37 = vpop.f32.mrf.mxu1  ;;  %v1412_v2 = vpop.f32.mrf.mxu3 }
 0x277   :  { %6107 = vst [vmem:[#allocation10_spill] sm:$0xff] %v5043_v0  ;;  %v1413_v58 = vadd.f32 %v1412_v2, %v4531_v53  ;;  %v1190_v35 = vadd.f32 %v1189_v37, %v4293_v40  ;;  %v2988_v40 = vld [vmem:[%s6094_s0 + $0xf0] sm:$0xff]  ;;  %v2989_v37 = vld [vmem:[%s6094_s0 + $0xf8] sm:$0xff] }
 0x279   :  { %v5046_v11 = vadd.f32 %v1525_v31, %v1413_v58  ;;  %1592 = vmatmul.f32.gmra.mxu1 %v2984_v20  ;;  %1705 = vmatmul.f32.gmra.mxu2 %v2985_v21  ;;  %v1528_v5 = vpop.f32.mrf.mxu0 }
 0x27b   :  { %1818 = vmatmul.f32.gmra.mxu3 %v2986_v62 }
 0x27c   :  { %v1302_v31 = vpop.f32.mrf.mxu2  ;;  %1931 = vmatmul.f32.gmra.mxu0 %v2987_v61  ;;  %v2991_v61 = vld [vmem:[%s6094_s0 + $0x108] sm:$0xff] }
 0x27d   :  { %v5061_v2 = vadd.f32 %v1302_v31, %v1190_v35  ;;  %v2990_v31 = vld [vmem:[%s6094_s0 + $0x100] sm:$0xff] }
 0x27e   :  { %v1192_v58 = vpop.f32.mrf.mxu1  ;;  %v1415_v20 = vpop.f32.mrf.mxu3 }
 0x27f   :  { %6108 = vst [vmem:[#allocation11_spill] sm:$0xff] %v5061_v2  ;;  %v1416_v21 = vadd.f32 %v1415_v20, %v4531_v53  ;;  %v1193_v35 = vadd.f32 %v1192_v58, %v4312_v8  ;;  %v2992_v8 = vld [vmem:[%s6094_s0 + $0x128] sm:$0xff]  ;;  %v2993_v58 = vld [vmem:[%s6094_s0 + $0x130] sm:$0xff] }
 0x281   :  { %v5064_v0 = vadd.f32 %v1528_v5, %v1416_v21  ;;  %1595 = vmatmul.f32.gmra.mxu1 %v2988_v40  ;;  %1708 = vmatmul.f32.gmra.mxu2 %v2989_v37  ;;  %v1531_v62 = vpop.f32.mrf.mxu0 }
 0x283   :  { %1821 = vmatmul.f32.gmra.mxu3 %v2990_v31 }
 0x284   :  { %v1305_v5 = vpop.f32.mrf.mxu2  ;;  %1934 = vmatmul.f32.gmra.mxu0 %v2991_v61  ;;  %v2995_v61 = vld [vmem:[%s6094_s0 + $0x140] sm:$0xff] }
 0x285   :  { %v5079_v20 = vadd.f32 %v1305_v5, %v1193_v35  ;;  %v2994_v5 = vld [vmem:[%s6094_s0 + $0x138] sm:$0xff] }
 0x286   :  { %v1195_v21 = vpop.f32.mrf.mxu1  ;;  %v1418_v40 = vpop.f32.mrf.mxu3 }
 0x287   :  { %6109 = vst [vmem:[#allocation12_spill] sm:$0xff] %v5079_v20  ;;  %v1419_v37 = vadd.f32 %v1418_v40, %v4531_v53  ;;  %v1196_v35 = vadd.f32 %v1195_v21, %v4328_v43  ;;  %v2996_v43 = vld [vmem:[%s6094_s0 + $0x160] sm:$0xff]  ;;  %v2997_v21 = vld [vmem:[%s6094_s0 + $0x168] sm:$0xff] }
 0x289   :  { %v5082_v2 = vadd.f32 %v1531_v62, %v1419_v37  ;;  %1598 = vmatmul.f32.gmra.mxu1 %v2992_v8  ;;  %1711 = vmatmul.f32.gmra.mxu2 %v2993_v58  ;;  %v1534_v31 = vpop.f32.mrf.mxu0 }
 0x28b   :  { %1824 = vmatmul.f32.gmra.mxu3 %v2994_v5 }
 0x28c   :  { %v1308_v62 = vpop.f32.mrf.mxu2  ;;  %1937 = vmatmul.f32.gmra.mxu0 %v2995_v61  ;;  %v2999_v61 = vld [vmem:[%s6094_s0 + $0x178] sm:$0xff] }
 0x28d   :  { %v5097_v40 = vadd.f32 %v1308_v62, %v1196_v35  ;;  %v2998_v62 = vld [vmem:[%s6094_s0 + $0x170] sm:$0xff] }
 0x28e   :  { %v1198_v37 = vpop.f32.mrf.mxu1  ;;  %v1421_v8 = vpop.f32.mrf.mxu3 }
 0x28f   :  { %6110 = vst [vmem:[#allocation13_spill] sm:$0xff] %v5097_v40  ;;  %v1422_v58 = vadd.f32 %v1421_v8, %v4531_v53  ;;  %v1199_v35 = vadd.f32 %v1198_v37, %v4347_v48  ;;  %v3000_v48 = vld [vmem:[%s6094_s0 + $0x198] sm:$0xff]  ;;  %v3001_v37 = vld [vmem:[%s6094_s0 + $0x1a0] sm:$0xff] }
 0x291   :  { %v5100_v20 = vadd.f32 %v1534_v31, %v1422_v58  ;;  %1601 = vmatmul.f32.gmra.mxu1 %v2996_v43  ;;  %1714 = vmatmul.f32.gmra.mxu2 %v2997_v21  ;;  %v1537_v5 = vpop.f32.mrf.mxu0 }
 0x293   :  { %1827 = vmatmul.f32.gmra.mxu3 %v2998_v62 }
 0x294   :  { %v1311_v31 = vpop.f32.mrf.mxu2  ;;  %1940 = vmatmul.f32.gmra.mxu0 %v2999_v61  ;;  %v3003_v61 = vld [vmem:[%s6094_s0 + $0x1b0] sm:$0xff] }
 0x295   :  { %v5115_v8 = vadd.f32 %v1311_v31, %v1199_v35  ;;  %v3002_v31 = vld [vmem:[%s6094_s0 + $0x1a8] sm:$0xff] }
 0x296   :  { %v1201_v58 = vpop.f32.mrf.mxu1  ;;  %v1424_v43 = vpop.f32.mrf.mxu3 }
 0x297   :  { %6111 = vst [vmem:[#allocation14_spill] sm:$0xff] %v5115_v8  ;;  %v1425_v21 = vadd.f32 %v1424_v43, %v4531_v53  ;;  %v1202_v35 = vadd.f32 %v1201_v58, %v4363_v27  ;;  %v3004_v27 = vld [vmem:[%s6094_s0 + $0x1d0] sm:$0xff]  ;;  %v3005_v58 = vld [vmem:[%s6094_s0 + $0x1d8] sm:$0xff] }
 0x299   :  { %v5118_v40 = vadd.f32 %v1537_v5, %v1425_v21  ;;  %1604 = vmatmul.f32.gmra.mxu1 %v3000_v48  ;;  %1717 = vmatmul.f32.gmra.mxu2 %v3001_v37  ;;  %v1540_v62 = vpop.f32.mrf.mxu0 }
 0x29b   :  { %1830 = vmatmul.f32.gmra.mxu3 %v3002_v31 }
 0x29c   :  { %v1314_v5 = vpop.f32.mrf.mxu2  ;;  %1943 = vmatmul.f32.gmra.mxu0 %v3003_v61  ;;  %v3007_v61 = vld [vmem:[%s6094_s0 + $0x1e8] sm:$0xff] }
 0x29d   :  { %v5133_v43 = vadd.f32 %v1314_v5, %v1202_v35  ;;  %v3006_v5 = vld [vmem:[%s6094_s0 + $0x1e0] sm:$0xff] }
 0x29e   :  { %v1204_v21 = vpop.f32.mrf.mxu1  ;;  %v1427_v48 = vpop.f32.mrf.mxu3 }
 0x29f   :  { %6112 = vst [vmem:[#allocation15_spill] sm:$0xff] %v5133_v43  ;;  %v1428_v37 = vadd.f32 %v1427_v48, %v4531_v53  ;;  %v1205_v35 = vadd.f32 %v1204_v21, %v4382_v22  ;;  %v3008_v22 = vld [vmem:[%s6094_s0 + $0x208] sm:$0xff]  ;;  %v3009_v21 = vld [vmem:[%s6094_s0 + $0x210] sm:$0xff] }
 0x2a1   :  { %v5136_v8 = vadd.f32 %v1540_v62, %v1428_v37  ;;  %1607 = vmatmul.f32.gmra.mxu1 %v3004_v27  ;;  %1720 = vmatmul.f32.gmra.mxu2 %v3005_v58  ;;  %v1543_v31 = vpop.f32.mrf.mxu0 }
 0x2a3   :  { %1833 = vmatmul.f32.gmra.mxu3 %v3006_v5 }
 0x2a4   :  { %v1317_v62 = vpop.f32.mrf.mxu2  ;;  %1946 = vmatmul.f32.gmra.mxu0 %v3007_v61  ;;  %v3011_v61 = vld [vmem:[%s6094_s0 + $0x220] sm:$0xff] }
 0x2a5   :  { %v5151_v48 = vadd.f32 %v1317_v62, %v1205_v35  ;;  %v3010_v62 = vld [vmem:[%s6094_s0 + $0x218] sm:$0xff] }
 0x2a6   :  { %v1207_v37 = vpop.f32.mrf.mxu1  ;;  %v1430_v27 = vpop.f32.mrf.mxu3 }
 0x2a7   :  { %6113 = vst [vmem:[#allocation16_spill] sm:$0xff] %v5151_v48  ;;  %v1431_v58 = vadd.f32 %v1430_v27, %v4531_v53  ;;  %v1208_v35 = vadd.f32 %v1207_v37, %v4398_v55  ;;  %v3012_v55 = vld [vmem:[%s6094_s0 + $0x240] sm:$0xff]  ;;  %v3013_v37 = vld [vmem:[%s6094_s0 + $0x248] sm:$0xff] }
 0x2a9   :  { %v5154_v43 = vadd.f32 %v1543_v31, %v1431_v58  ;;  %1610 = vmatmul.f32.gmra.mxu1 %v3008_v22  ;;  %1723 = vmatmul.f32.gmra.mxu2 %v3009_v21  ;;  %v1546_v5 = vpop.f32.mrf.mxu0 }
 0x2ab   :  { %1836 = vmatmul.f32.gmra.mxu3 %v3010_v62 }
 0x2ac   :  { %v1320_v31 = vpop.f32.mrf.mxu2  ;;  %1949 = vmatmul.f32.gmra.mxu0 %v3011_v61  ;;  %v3015_v61 = vld [vmem:[%s6094_s0 + $0x258] sm:$0xff] }
 0x2ad   :  { %v5169_v27 = vadd.f32 %v1320_v31, %v1208_v35  ;;  %v3014_v31 = vld [vmem:[%s6094_s0 + $0x250] sm:$0xff] }
 0x2ae   :  { %v1210_v58 = vpop.f32.mrf.mxu1  ;;  %v1433_v22 = vpop.f32.mrf.mxu3 }
 0x2af   :  { %6114 = vst [vmem:[#allocation17_spill] sm:$0xff] %v5169_v27  ;;  %v1434_v21 = vadd.f32 %v1433_v22, %v4531_v53  ;;  %v1211_v35 = vadd.f32 %v1210_v58, %v4417_v44  ;;  %v3016_v44 = vld [vmem:[%s6094_s0 + $0x278] sm:$0xff]  ;;  %v3017_v58 = vld [vmem:[%s6094_s0 + $0x280] sm:$0xff] }
 0x2b1   :  { %v5172_v48 = vadd.f32 %v1546_v5, %v1434_v21  ;;  %1613 = vmatmul.f32.gmra.mxu1 %v3012_v55  ;;  %1726 = vmatmul.f32.gmra.mxu2 %v3013_v37  ;;  %v1549_v62 = vpop.f32.mrf.mxu0 }
 0x2b3   :  { %1839 = vmatmul.f32.gmra.mxu3 %v3014_v31 }
 0x2b4   :  { %v1323_v5 = vpop.f32.mrf.mxu2  ;;  %1952 = vmatmul.f32.gmra.mxu0 %v3015_v61  ;;  %v3019_v61 = vld [vmem:[%s6094_s0 + $0x290] sm:$0xff] }
 0x2b5   :  { %v5187_v22 = vadd.f32 %v1323_v5, %v1211_v35  ;;  %v3018_v5 = vld [vmem:[%s6094_s0 + $0x288] sm:$0xff] }
 0x2b6   :  { %v1213_v21 = vpop.f32.mrf.mxu1  ;;  %v1436_v55 = vpop.f32.mrf.mxu3 }
 0x2b7   :  { %6115 = vst [vmem:[#allocation18_spill] sm:$0xff] %v5187_v22  ;;  %v1437_v37 = vadd.f32 %v1436_v55, %v4531_v53  ;;  %v1214_v35 = vadd.f32 %v1213_v21, %v4433_v38  ;;  %v3020_v38 = vld [vmem:[%s6094_s0 + $0x2b0] sm:$0xff]  ;;  %v3021_v21 = vld [vmem:[%s6094_s0 + $0x2b8] sm:$0xff] }
 0x2b9   :  { %v5190_v27 = vadd.f32 %v1549_v62, %v1437_v37  ;;  %1616 = vmatmul.f32.gmra.mxu1 %v3016_v44  ;;  %1729 = vmatmul.f32.gmra.mxu2 %v3017_v58  ;;  %v1552_v31 = vpop.f32.mrf.mxu0 }
 0x2bb   :  { %1842 = vmatmul.f32.gmra.mxu3 %v3018_v5 }
 0x2bc   :  { %v1326_v62 = vpop.f32.mrf.mxu2  ;;  %1955 = vmatmul.f32.gmra.mxu0 %v3019_v61  ;;  %v3022_v61 = vld [vmem:[%s6094_s0 + $0x2c0] sm:$0xff] }
 0x2bd   :  { %v5205_v55 = vadd.f32 %v1326_v62, %v1214_v35  ;;  %v444_v35 = vld [vmem:[%s6095_s1 + $0x608] sm:$0xff]  ;;  %s3153_s1 = smov 8  }
 0x2be   :  { %v1216_v37 = vpop.f32.mrf.mxu1  ;;  %v1439_v44 = vpop.f32.mrf.mxu3  ;;  %2034 = vmatpush.msra.mxu1 %v444_v35 }
 0x2bf   :  { %6116 = vst [vmem:[#allocation19_spill] sm:$0xff] %v5205_v55  ;;  %v1440_v58 = vadd.f32 %v1439_v44, %v4531_v53  ;;  %v1217_v62 = vadd.f32 %v1216_v37, %v4458_v54  ;;  %v2227_v44 = vld [vmem:[%s6097_s3 + $0xf8] sm:$0xff]  ;;  %v3025_v55 = vld [vmem:[%s6094_s0 + $0x2f0] sm:$0xff] }
 0x2c0   :  { %2345 = vmatpush.msra.mxu3 %v2227_v44  ;;  %v3026_v44 = vld [vmem:[%s6094_s0 + $0x2f8] sm:$0xff] }
 0x2c1   :  { %v5208_v22 = vadd.f32 %v1552_v31, %v1440_v58  ;;  %1619 = vmatmul.f32.gmra.mxu1 %v3020_v38  ;;  %1732 = vmatmul.f32.gmra.mxu2 %v3021_v21  ;;  %v1555_v5 = vpop.f32.mrf.mxu0  ;;  %v2211_v31 = vld [vmem:[%s6097_s3 + $0x78] sm:$0xff]  ;;  %v3023_v38 = vld [vmem:[%s6094_s0 + $0x2c8] sm:$0xff] }
 0x2c2   :  { %2232 = vmatpush.msra.mxu2 %v2211_v31 }
 0x2c3   :  { %1845 = vmatmul.f32.gmra.mxu3 %v3022_v61  ;;  %v3024_v61 = vld [vmem:[%s6094_s0 + $0x2e8] sm:$0xff] }
 0x2c4   :  { %v1329_v58 = vpop.f32.mrf.mxu2  ;;  %1958 = vmatmul.f32.gmra.mxu0 %v3023_v38 }
 0x2c5   :  { %v5232_v21 = vadd.f32 %v1329_v58, %v1217_v62  ;;  %v3027_v58 = vld [vmem:[%s6094_s0 + $0x300] sm:$0xff] }
 0x2c6   :  { %v1219_v35 = vpop.f32.mrf.mxu1  ;;  %v1442_v54 = vpop.f32.mrf.mxu3 }
 0x2c7   :  { %6117 = vst [vmem:[#allocation20_spill] sm:$0xff] %v5232_v21  ;;  %v1443_v37 = vadd.f32 %v1442_v54, %v4531_v53  ;;  %v1220_v62 = vadd.f32 %v1219_v35, %v4474_v19  ;;  %v3028_v19 = vld [vmem:[%s6094_s0 + $0x320] sm:$0xff]  ;;  %v3029_v35 = vld [vmem:[%s6094_s0 + $0x328] sm:$0xff] }
 0x2c9   :  { %v5235_v31 = vadd.f32 %v1555_v5, %v1443_v37  ;;  %1622 = vmatmul.f32.gmra.mxu1 %v3024_v61  ;;  %1735 = vmatmul.f32.gmra.mxu2 %v3025_v55  ;;  %v1558_v38 = vpop.f32.mrf.mxu0 }
 0x2cb   :  { %1848 = vmatmul.f32.gmra.mxu3 %v3026_v44 }
 0x2cc   :  { %v1332_v5 = vpop.f32.mrf.mxu2  ;;  %1961 = vmatmul.f32.gmra.mxu0 %v3027_v58  ;;  %v2226_v58 = vld [vmem:[%s6097_s3 + $0xf0] sm:$0xff] }
 0x2cd   :  { %v5250_v54 = vadd.f32 %v1332_v5, %v1220_v62  ;;  %v2210_v62 = vld [vmem:[%s6097_s3 + $0x70] sm:$0xff]  ;;  %2346 = vmatpush.msra.mxu3 %v2226_v58  ;;  %v3034_v58 = vld [vmem:[%s6094_s0 + $0x368] sm:$0xff] }
 0x2ce   :  { %v1222_v37 = vpop.f32.mrf.mxu1  ;;  %v1445_v61 = vpop.f32.mrf.mxu3  ;;  %2233 = vmatpush.msra.mxu2 %v2210_v62 }
 0x2cf   :  { %6118 = vst [vmem:[#allocation21_spill] sm:$0xff] %v5250_v54  ;;  %v1446_v55 = vadd.f32 %v1445_v61, %v4531_v53  ;;  %v1223_v5 = vadd.f32 %v1222_v37, %v4499_v46  ;;  %v3033_v54 = vld [vmem:[%s6094_s0 + $0x360] sm:$0xff] }
 0x2d1   :  { %v5253_v21 = vadd.f32 %v1558_v38, %v1446_v55  ;;  %1625 = vmatmul.f32.gmra.mxu1 %v3028_v19  ;;  %1738 = vmatmul.f32.gmra.mxu2 %v3029_v35  ;;  %v1561_v44 = vpop.f32.mrf.mxu0  ;;  %v3030_v38 = vld [vmem:[%s6094_s0 + $0x330] sm:$0xff]  ;;  %v3031_v55 = vld [vmem:[%s6094_s0 + $0x338] sm:$0xff] }
 0x2d3   :  { %1851 = vmatmul.f32.gmra.mxu3 %v3030_v38  ;;  %v3032_v38 = vld [vmem:[%s6094_s0 + $0x358] sm:$0xff] }
 0x2d4   :  { %v1335_v61 = vpop.f32.mrf.mxu2  ;;  %1964 = vmatmul.f32.gmra.mxu0 %v3031_v55 }
 0x2d5   :  { %v5274_v19 = vadd.f32 %v1335_v61, %v1223_v5  ;;  %v3035_v61 = vld [vmem:[%s6094_s0 + $0x370] sm:$0xff] }
 0x2d6   :  { %v1225_v35 = vpop.f32.mrf.mxu1  ;;  %v1448_v46 = vpop.f32.mrf.mxu3 }
 0x2d7   :  { %6119 = vst [vmem:[#allocation22_spill] sm:$0xff] %v5274_v19  ;;  %v1449_v37 = vadd.f32 %v1448_v46, %v4531_v53  ;;  %v1226_v5 = vadd.f32 %v1225_v35, %v4515_v52  ;;  %v3036_v52 = vld [vmem:[%s6094_s0 + $0x390] sm:$0xff]  ;;  %v3037_v35 = vld [vmem:[%s6094_s0 + $0x398] sm:$0xff] }
 0x2d9   :  { %v5277_v62 = vadd.f32 %v1561_v44, %v1449_v37  ;;  %1628 = vmatmul.f32.gmra.mxu1 %v3032_v38  ;;  %1741 = vmatmul.f32.gmra.mxu2 %v3033_v54  ;;  %v1564_v55 = vpop.f32.mrf.mxu0 }
 0x2db   :  { %1854 = vmatmul.f32.gmra.mxu3 %v3034_v58 }
 0x2dc   :  { %v1338_v44 = vpop.f32.mrf.mxu2  ;;  %1967 = vmatmul.f32.gmra.mxu0 %v3035_v61 }
 0x2dd   :  { %v5292_v46 = vadd.f32 %v1338_v44, %v1226_v5  ;;  %v2209_v5 = vld [vmem:[%s6097_s3 + $0x68] sm:$0xff] }
 0x2de   :  { %v1451_v37 = vpop.f32.mrf.mxu3  ;;  %v1584_v38 = vpop.f32.mrf.mxu1  ;;  %2234 = vmatpush.msra.mxu2 %v2209_v5  ;;  %v2225_v44 = vld [vmem:[%s6097_s3 + $0xe8] sm:$0xff] }
 0x2df   :  { %6120 = vst [vmem:[#allocation23_spill] sm:$0xff] %v5292_v46  ;;  %v1452_v54 = vadd.f32 %v1451_v37, %v4531_v53  ;;  %v1585_v53 = vadd.f32 %v1584_v38, %v4548_v34  ;;  %v3039_v37 = vld [vmem:[%s6094_s0 + $0x3a8] sm:$0xff]  ;;  %2347 = vmatpush.msra.mxu3 %v2225_v44  ;;  %v3043_v44 = vld [vmem:[%s6094_s0 + $0x3e0] sm:$0xff] }
 0x2e0   :  { %v3040_v5 = vld [vmem:[%s6094_s0 + $0x3c8] sm:$0xff] }
 0x2e1   :  { %v5295_v19 = vadd.f32 %v1564_v55, %v1452_v54  ;;  %1631 = vmatmul.f32.gmra.mxu1 %v3036_v52  ;;  %1744 = vmatmul.f32.gmra.mxu2 %v3037_v35  ;;  %v1923_v58 = vpop.f32.mrf.mxu0  ;;  %v3038_v55 = vld [vmem:[%s6094_s0 + $0x3a0] sm:$0xff] }
 0x2e3   :  { %1857 = vmatmul.f32.gmra.mxu3 %v3038_v55  ;;  %v3041_v55 = vld [vmem:[%s6094_s0 + $0x3d0] sm:$0xff] }
 0x2e4   :  { %v1697_v61 = vpop.f32.mrf.mxu2  ;;  %1970 = vmatmul.f32.gmra.mxu0 %v3039_v37 }
 0x2e5   :  { %v1698_v54 = vadd.f32 %v1697_v61, %v1585_v53  ;;  %v3042_v53 = vld [vmem:[%s6094_s0 + $0x3d8] sm:$0xff] }
 0x2e6   :  { %v1587_v52 = vpop.f32.mrf.mxu1  ;;  %v1810_v35 = vpop.f32.mrf.mxu3 }
 0x2e7   :  { %v1811_v34 = vadd.f32 %v1810_v35, %v1698_v54  ;;  %v1588_v37 = vadd.f32 %v1587_v52, %v4567_v42  ;;  %v3044_v42 = vld [vmem:[%s6094_s0 + $0x400] sm:$0xff]  ;;  %v3045_v52 = vld [vmem:[%s6094_s0 + $0x408] sm:$0xff] }
 0x2e9   :  { %v5316_v38 = vadd.f32 %v1923_v58, %v1811_v34  ;;  %1634 = vmatmul.f32.gmra.mxu1 %v3040_v5  ;;  %1747 = vmatmul.f32.gmra.mxu2 %v3041_v55  ;;  %v1926_v46 = vpop.f32.mrf.mxu0 }
 0x2eb   :  { %1860 = vmatmul.f32.gmra.mxu3 %v3042_v53 }
 0x2ec   :  { %v1700_v58 = vpop.f32.mrf.mxu2  ;;  %1973 = vmatmul.f32.gmra.mxu0 %v3043_v44 }
 0x2ed   :  { %v1701_v61 = vadd.f32 %v1700_v58, %v1588_v37  ;;  %v2208_v37 = vld [vmem:[%s6097_s3 + $0x60] sm:$0xff] }
 0x2ee   :  { %v1590_v54 = vpop.f32.mrf.mxu1  ;;  %v1813_v35 = vpop.f32.mrf.mxu3  ;;  %2235 = vmatpush.msra.mxu2 %v2208_v37  ;;  %v2224_v58 = vld [vmem:[%s6097_s3 + $0xe0] sm:$0xff] }
 0x2ef   :  { %v1814_v34 = vadd.f32 %v1813_v35, %v1701_v61  ;;  %v1591_v53 = vadd.f32 %v1590_v54, %v4595_v28  ;;  %v3047_v61 = vld [vmem:[%s6094_s0 + $0x418] sm:$0xff]  ;;  %2348 = vmatpush.msra.mxu3 %v2224_v58  ;;  %v3049_v37 = vld [vmem:[%s6094_s0 + $0x440] sm:$0xff]  ;;  %v3051_v58 = vld [vmem:[%s6094_s0 + $0x450] sm:$0xff] }
 0x2f1   :  { %v5331_v5 = vadd.f32 %v1926_v46, %v1814_v34  ;;  %1637 = vmatmul.f32.gmra.mxu1 %v3044_v42  ;;  %1750 = vmatmul.f32.gmra.mxu2 %v3045_v52  ;;  %v1929_v55 = vpop.f32.mrf.mxu0  ;;  %v3046_v46 = vld [vmem:[%s6094_s0 + $0x410] sm:$0xff]  ;;  %v3048_v52 = vld [vmem:[%s6094_s0 + $0x438] sm:$0xff] }
 0x2f3   :  { %1863 = vmatmul.f32.gmra.mxu3 %v3046_v46 }
 0x2f4   :  { %v1703_v44 = vpop.f32.mrf.mxu2  ;;  %1976 = vmatmul.f32.gmra.mxu0 %v3047_v61 }
 0x2f5   :  { %v1704_v35 = vadd.f32 %v1703_v44, %v1591_v53  ;;  %v3050_v53 = vld [vmem:[%s6094_s0 + $0x448] sm:$0xff] }
 0x2f6   :  { %v1593_v34 = vpop.f32.mrf.mxu1  ;;  %v1816_v42 = vpop.f32.mrf.mxu3 }
 0x2f7   :  { %v1817_v28 = vadd.f32 %v1816_v42, %v1704_v35  ;;  %v1594_v61 = vadd.f32 %v1593_v34, %v4614_v6  ;;  %v3052_v6 = vld [vmem:[%s6094_s0 + $0x470] sm:$0xff]  ;;  %v3053_v34 = vld [vmem:[%s6094_s0 + $0x478] sm:$0xff] }
 0x2f9   :  { %v5352_v54 = vadd.f32 %v1929_v55, %v1817_v28  ;;  %1640 = vmatmul.f32.gmra.mxu1 %v3048_v52  ;;  %1753 = vmatmul.f32.gmra.mxu2 %v3049_v37  ;;  %v1932_v46 = vpop.f32.mrf.mxu0 }
 0x2fb   :  { %1866 = vmatmul.f32.gmra.mxu3 %v3050_v53 }
 0x2fc   :  { %v1706_v55 = vpop.f32.mrf.mxu2  ;;  %1979 = vmatmul.f32.gmra.mxu0 %v3051_v58 }
 0x2fd   :  { %v1707_v44 = vadd.f32 %v1706_v55, %v1594_v61  ;;  %v2207_v61 = vld [vmem:[%s6097_s3 + $0x58] sm:$0xff] }
 0x2fe   :  { %v1596_v35 = vpop.f32.mrf.mxu1  ;;  %v1819_v42 = vpop.f32.mrf.mxu3  ;;  %2236 = vmatpush.msra.mxu2 %v2207_v61  ;;  %v2223_v55 = vld [vmem:[%s6097_s3 + $0xd8] sm:$0xff]  ;;  %v3057_v61 = vld [vmem:[%s6094_s0 + $0x4b0] sm:$0xff] }
 0x2ff   :  { %v1820_v28 = vadd.f32 %v1819_v42, %v1707_v44  ;;  %v1597_v53 = vadd.f32 %v1596_v35, %v4642_v16  ;;  %v3055_v44 = vld [vmem:[%s6094_s0 + $0x488] sm:$0xff]  ;;  %2349 = vmatpush.msra.mxu3 %v2223_v55  ;;  %v3059_v55 = vld [vmem:[%s6094_s0 + $0x4c0] sm:$0xff] }
 0x301   :  { %v5367_v52 = vadd.f32 %v1932_v46, %v1820_v28  ;;  %1643 = vmatmul.f32.gmra.mxu1 %v3052_v6  ;;  %1756 = vmatmul.f32.gmra.mxu2 %v3053_v34  ;;  %v1935_v37 = vpop.f32.mrf.mxu0  ;;  %v3054_v46 = vld [vmem:[%s6094_s0 + $0x480] sm:$0xff]  ;;  %v3056_v34 = vld [vmem:[%s6094_s0 + $0x4a8] sm:$0xff] }
 0x303   :  { %1869 = vmatmul.f32.gmra.mxu3 %v3054_v46 }
 0x304   :  { %v1709_v58 = vpop.f32.mrf.mxu2  ;;  %1982 = vmatmul.f32.gmra.mxu0 %v3055_v44 }
 0x305   :  { %v1710_v42 = vadd.f32 %v1709_v58, %v1597_v53  ;;  %v3058_v53 = vld [vmem:[%s6094_s0 + $0x4b8] sm:$0xff] }
 0x306   :  { %v1599_v28 = vpop.f32.mrf.mxu1  ;;  %v1822_v6 = vpop.f32.mrf.mxu3 }
 0x307   :  { %v1823_v16 = vadd.f32 %v1822_v6, %v1710_v42  ;;  %v1600_v44 = vadd.f32 %v1599_v28, %v4661_v39  ;;  %v3060_v39 = vld [vmem:[%s6094_s0 + $0x4e0] sm:$0xff]  ;;  %v3061_v28 = vld [vmem:[%s6094_s0 + $0x4e8] sm:$0xff] }
 0x309   :  { %v5388_v35 = vadd.f32 %v1935_v37, %v1823_v16  ;;  %1646 = vmatmul.f32.gmra.mxu1 %v3056_v34  ;;  %1759 = vmatmul.f32.gmra.mxu2 %v3057_v61  ;;  %v1938_v46 = vpop.f32.mrf.mxu0  ;;  %v2206_v61 = vld [vmem:[%s6097_s3 + $0x50] sm:$0xff] }
 0x30a   :  { %2237 = vmatpush.msra.mxu2 %v2206_v61  ;;  %v3065_v61 = vld [vmem:[%s6094_s0 + $0x520] sm:$0xff] }
 0x30b   :  { %1872 = vmatmul.f32.gmra.mxu3 %v3058_v53 }
 0x30c   :  { %v1712_v37 = vpop.f32.mrf.mxu2  ;;  %1985 = vmatmul.f32.gmra.mxu0 %v3059_v55 }
 0x30d   :  { %v1713_v58 = vadd.f32 %v1712_v37, %v1600_v44  ;;  %v2222_v37 = vld [vmem:[%s6097_s3 + $0xd0] sm:$0xff] }
 0x30e   :  { %v1602_v42 = vpop.f32.mrf.mxu1  ;;  %v1825_v6 = vpop.f32.mrf.mxu3  ;;  %2350 = vmatpush.msra.mxu3 %v2222_v37 }
 0x30f   :  { %v1826_v16 = vadd.f32 %v1825_v6, %v1713_v58  ;;  %v1603_v44 = vadd.f32 %v1602_v42, %v4689_v30  ;;  %v3063_v58 = vld [vmem:[%s6094_s0 + $0x4f8] sm:$0xff] }
 0x311   :  { %v5403_v34 = vadd.f32 %v1938_v46, %v1826_v16  ;;  %1649 = vmatmul.f32.gmra.mxu1 %v3060_v39  ;;  %1762 = vmatmul.f32.gmra.mxu2 %v3061_v28  ;;  %v3062_v46 = vld [vmem:[%s6094_s0 + $0x4f0] sm:$0xff]  ;;  %v1941_v53 = vpop.f32.mrf.mxu0  ;;  %v3064_v28 = vld [vmem:[%s6094_s0 + $0x518] sm:$0xff] }
 0x313   :  { %1875 = vmatmul.f32.gmra.mxu3 %v3062_v46 }
 0x314   :  { %v1715_v55 = vpop.f32.mrf.mxu2  ;;  %1988 = vmatmul.f32.gmra.mxu0 %v3063_v58 }
 0x315   :  { %v1716_v6 = vadd.f32 %v1715_v55, %v1603_v44  ;;  %v3066_v44 = vld [vmem:[%s6094_s0 + $0x528] sm:$0xff] }
 0x316   :  { %v1605_v16 = vpop.f32.mrf.mxu1  ;;  %v1828_v30 = vpop.f32.mrf.mxu3 }
 0x317   :  { %v1829_v42 = vadd.f32 %v1828_v30, %v1716_v6  ;;  %v1606_v46 = vadd.f32 %v1605_v16, %v4708_v50  ;;  %v3068_v50 = vld [vmem:[%s6094_s0 + $0x550] sm:$0xff]  ;;  %v3069_v16 = vld [vmem:[%s6094_s0 + $0x558] sm:$0xff] }
 0x319   :  { %v5424_v39 = vadd.f32 %v1941_v53, %v1829_v42  ;;  %1652 = vmatmul.f32.gmra.mxu1 %v3064_v28  ;;  %1765 = vmatmul.f32.gmra.mxu2 %v3065_v61  ;;  %v3067_v53 = vld [vmem:[%s6094_s0 + $0x530] sm:$0xff]  ;;  %v1944_v58 = vpop.f32.mrf.mxu0  ;;  %v2205_v61 = vld [vmem:[%s6097_s3 + $0x48] sm:$0xff] }
 0x31a   :  { %2238 = vmatpush.msra.mxu2 %v2205_v61 }
 0x31b   :  { %1878 = vmatmul.f32.gmra.mxu3 %v3066_v44  ;;  %v3070_v44 = vld [vmem:[%s6094_s0 + $0x560] sm:$0xff] }
 0x31c   :  { %v1718_v37 = vpop.f32.mrf.mxu2  ;;  %1991 = vmatmul.f32.gmra.mxu0 %v3067_v53 }
 0x31d   :  { %v1719_v55 = vadd.f32 %v1718_v37, %v1606_v46  ;;  %v2221_v37 = vld [vmem:[%s6097_s3 + $0xc8] sm:$0xff] }
 0x31e   :  { %v1608_v6 = vpop.f32.mrf.mxu1  ;;  %v1831_v30 = vpop.f32.mrf.mxu3  ;;  %2351 = vmatpush.msra.mxu3 %v2221_v37  ;;  %v3076_v37 = vld [vmem:[%s6094_s0 + $0x5c8] sm:$0xff] }
 0x31f   :  { %v1832_v42 = vadd.f32 %v1831_v30, %v1719_v55  ;;  %v1609_v46 = vadd.f32 %v1608_v6, %v4738_v15  ;;  %v3071_v55 = vld [vmem:[%s6094_s0 + $0x568] sm:$0xff]  ;;  %v3073_v6 = vld [vmem:[%s6094_s0 + $0x590] sm:$0xff] }
 0x320   :  { %v3072_v15 = vld [vmem:[%s6094_s0 + $0x588] sm:$0xff] }
 0x321   :  { %v5439_v28 = vadd.f32 %v1944_v58, %v1832_v42  ;;  %1655 = vmatmul.f32.gmra.mxu1 %v3068_v50  ;;  %1768 = vmatmul.f32.gmra.mxu2 %v3069_v16  ;;  %v3074_v50 = vld [vmem:[%s6094_s0 + $0x598] sm:$0xff] }
 0x323   :  { %1881 = vmatmul.f32.gmra.mxu3 %v3070_v44  ;;  %v2204_v44 = vld [vmem:[%s6097_s3 + $0x40] sm:$0xff] }
 0x324   :  { %v1721_v53 = vpop.f32.mrf.mxu2  ;;  %1994 = vmatmul.f32.gmra.mxu0 %v3071_v55  ;;  %2239 = vmatpush.msra.mxu2 %v2204_v44  ;;  %v3077_v55 = vld [vmem:[%s6094_s0 + $0x5d0] sm:$0xff]  ;;  %v2199_v44 = vld [vmem:[%s6097_s3 + $0x18] sm:$0xff] }
 0x325   :  { %v5460_v58 = vadd.f32 %v1721_v53, %v1609_v46 }
 0x326   :  { %v1611_v30 = vpop.f32.mrf.mxu1 }
 0x327   :  { %v1612_v42 = vadd.f32 %v1611_v30, %v4772_v17  ;;  %v3075_v17 = vld [vmem:[%s6094_s0 + $0x5c0] sm:$0xff] }
 0x328   :  { %v2220_v30 = vld [vmem:[%s6097_s3 + $0xc0] sm:$0xff] }
 0x329   :  { %1658 = vmatmul.f32.gmra.mxu1 %v3072_v15  ;;  %1771 = vmatmul.f32.gmra.mxu2 %v3073_v6  ;;  %v2202_v15 = vld [vmem:[%s6097_s3 + $0x30] sm:$0xff] }
 0x32a   :  { %2352 = vmatpush.msra.mxu3 %v2220_v30  ;;  %v2197_v30 = vld [vmem:[%s6097_s3 + $0x8] sm:$0xff] }
 0x32b   :  { %1884 = vmatmul.f32.gmra.mxu3 %v3074_v50 }
 0x32c   :  { %v1724_v16 = vpop.f32.mrf.mxu2  ;;  %1997 = vmatmul.f32.gmra.mxu0 %v4732_v10  ;;  %v2203_v10 = vld [vmem:[%s6097_s3 + $0x38] sm:$0xff] }
 0x32d   :  { %v5473_v61 = vadd.f32 %v1724_v16, %v1612_v42  ;;  %2240 = vmatpush.msra.mxu2 %v2203_v10  ;;  %v2200_v16 = vld [vmem:[%s6097_s3 + $0x20] sm:$0xff]  ;;  %v2198_v10 = vld [vmem:[%s6097_s3 + $0x10] sm:$0xff] }
 0x32e   :  { %v1614_v46 = vpop.f32.mrf.mxu1 }
 0x32f   :  { %v1615_v53 = vadd.f32 %v1614_v46, %v4827_v51  ;;  %2241 = vmatpush.msra.mxu2 %v2202_v15  ;;  %v2201_v51 = vld [vmem:[%s6097_s3 + $0x28] sm:$0xff]  ;;  %v3078_v46 = vld [vmem:[%s6094_s0 + $0x5f8] sm:$0xff]  ;;  %v2196_v15 = vld [vmem:[%s6097_s3] sm:$0xff] }
 0x331   :  { %1661 = vmatmul.f32.gmra.mxu1 %v3075_v17  ;;  %1774 = vmatmul.f32.gmra.mxu2 %v3076_v37  ;;  %v3080_v37 = vld [vmem:[%s6094_s0 + $0x608] sm:$0xff] }
 0x332   :  { %2242 = vmatpush.msra.mxu2 %v2201_v51  ;;  %v2219_v51 = vld [vmem:[%s6097_s3 + $0xb8] sm:$0xff] }
 0x333   :  { %1887 = vmatmul.f32.gmra.mxu3 %v3077_v55 }
 0x334   :  { %v1727_v6 = vpop.f32.mrf.mxu2  ;;  %2000 = vmatmul.f32.gmra.mxu0 %v4760_v45  ;;  %v3079_v45 = vld [vmem:[%s6094_s0 + $0x600] sm:$0xff]  ;;  %2243 = vmatpush.msra.mxu2 %v2200_v16 }
 0x335   :  { %v5498_v42 = vadd.f32 %v1727_v6, %v1615_v53  ;;  %v3081_v6 = vld [vmem:[%s6094_s0 + $0x630] sm:$0xff]  ;;  %2353 = vmatpush.msra.mxu3 %v2219_v51  ;;  %v3083_v16 = vld [vmem:[%s6094_s0 + $0x640] sm:$0xff] }
 0x336   :  { %v1617_v50 = vpop.f32.mrf.mxu1  ;;  %2244 = vmatpush.msra.mxu2 %v2199_v44 }
 0x337   :  { %v1618_v17 = vadd.f32 %v1617_v50, %v4876_v49 }
 0x338   :  { %2245 = vmatpush.msra.mxu2 %v2198_v10  ;;  %v3086_v10 = vld [vmem:[%s6094_s0 + $0x678] sm:$0xff] }
 0x339   :  { %1664 = vmatmul.f32.gmra.mxu1 %v3078_v46  ;;  %1777 = vmatmul.f32.gmra.mxu2 %v3079_v45 }
 0x33a   :  { %2246 = vmatpush.msra.mxu2 %v2197_v30 }
 0x33b   :  { %1890 = vmatmul.f32.gmra.mxu3 %v3080_v37  ;;  %v2493_v37 = vld [vmem:[%s6099_s5 + $0x18] sm:$0xff] }
 0x33c   :  { %v1730_v53 = vpop.f32.mrf.mxu2  ;;  %2003 = vmatmul.f32.gmra.mxu0 %v4815_v56  ;;  %v3082_v56 = vld [vmem:[%s6094_s0 + $0x638] sm:$0xff]  ;;  %2247 = vmatpush.msra.mxu2 %v2196_v15  ;;  %v3087_v15 = vld [vmem:[%s6094_s0 + $0x6a0] sm:$0xff] }
 0x33d   :  { %v5523_v55 = vadd.f32 %v1730_v53, %v1618_v17  ;;  %v3084_v17 = vld [vmem:[%s6094_s0 + $0x668] sm:$0xff]  ;;  %2607 = vmatpush.msra.mxu0 %v2493_v37 }
 0x33e   :  { %v1620_v49 = vpop.f32.mrf.mxu1 }
 0x33f   :  { %v1621_v50 = vadd.f32 %v1620_v49, %v4922_v36  ;;  %v3085_v36 = vld [vmem:[%s6094_s0 + $0x670] sm:$0xff] }
 0x341   :  { %1667 = vmatmul.f32.gmra.mxu1 %v3081_v6  ;;  %1780 = vmatmul.f32.gmra.mxu2 %v3082_v56  ;;  %v2218_v6 = vld [vmem:[%s6097_s3 + $0xb0] sm:$0xff] }
 0x342   :  { %2354 = vmatpush.msra.mxu3 %v2218_v6  ;;  %v3089_v56 = vld [vmem:[%s6094_s0 + $0x6b0] sm:$0xff] }
 0x343   :  { %1893 = vmatmul.f32.gmra.mxu3 %v3083_v16 }
 0x344   :  { %v1733_v46 = vpop.f32.mrf.mxu2  ;;  %2006 = vmatmul.f32.gmra.mxu0 %v4864_v59 }
 0x345   :  { %v5545_v45 = vadd.f32 %v1733_v46, %v1621_v50  ;;  %v3090_v46 = vld [vmem:[%s6094_s0 + $0x6d8] sm:$0xff] }
 0x346   :  { %v1623_v44 = vpop.f32.mrf.mxu1 }
 0x347   :  { %v1624_v59 = vadd.f32 %v1623_v44, %v4953_v14  ;;  %v3088_v14 = vld [vmem:[%s6094_s0 + $0x6a8] sm:$0xff] }
 0x349   :  { %1670 = vmatmul.f32.gmra.mxu1 %v3084_v17  ;;  %1783 = vmatmul.f32.gmra.mxu2 %v3085_v36  ;;  %v3092_v17 = vld [vmem:[%s6094_s0 + $0x6e8] sm:$0xff] }
 0x34b   :  { %1896 = vmatmul.f32.gmra.mxu3 %v3086_v10  ;;  %v3093_v10 = vld [vmem:[%s6094_s0 + $0x30] sm:$0xff] }
 0x34c   :  { %v1736_v53 = vpop.f32.mrf.mxu2  ;;  %2009 = vmatmul.f32.gmra.mxu0 %v4913_v29 }
 0x34d   :  { %v5561_v30 = vadd.f32 %v1736_v53, %v1624_v59  ;;  %v2132_v59 = vmax.f32 %v4539_v25, 0.0  ;;  %v2134_v25 = vmax.f32 %v4558_v47, 0.0  ;;  %v2216_v47 = vld [vmem:[%s6097_s3 + $0xa0] sm:$0xff] }
 0x34e   :  { %v1626_v49 = vpop.f32.mrf.mxu1 }
 0x34f   :  { %v1627_v29 = vadd.f32 %v1626_v49, %v4978_v23  ;;  %v3091_v23 = vld [vmem:[%s6094_s0 + $0x6e0] sm:$0xff] }
 0x351   :  { %1673 = vmatmul.f32.gmra.mxu1 %v3087_v15  ;;  %1786 = vmatmul.f32.gmra.mxu2 %v3088_v14  ;;  %v3094_v14 = vld [vmem:[%s6094_s0 + $0x68] sm:$0xff] }
 0x353   :  { %1899 = vmatmul.f32.gmra.mxu3 %v3089_v56 }
 0x354   :  { %v1739_v51 = vpop.f32.mrf.mxu2  ;;  %2012 = vmatmul.f32.gmra.mxu0 %v4944_v1 }
 0x355   :  { %v5577_v50 = vadd.f32 %v1739_v51, %v1627_v29 }
 0x356   :  { %v1629_v16 = vpop.f32.mrf.mxu1 }
 0x357   :  { %v1630_v44 = vadd.f32 %v1629_v16, %v4992_v12  ;;  %v2217_v12 = vld [vmem:[%s6097_s3 + $0xa8] sm:$0xff]  ;;  %v3095_v16 = vld [vmem:[%s6094_s0 + $0xa0] sm:$0xff] }
 0x358   :  { %2355 = vmatpush.msra.mxu3 %v2217_v12  ;;  %v2140_v12 = vmax.f32 %v4633_v57, 0.0 }
 0x359   :  { %1676 = vmatmul.f32.gmra.mxu1 %v3090_v46  ;;  %1789 = vmatmul.f32.gmra.mxu2 %v3091_v23 }
 0x35a   :  { %2356 = vmatpush.msra.mxu3 %v2216_v47  ;;  %v2144_v47 = vmax.f32 %v4680_v7, 0.0 }
 0x35b   :  { %1902 = vmatmul.f32.gmra.mxu3 %v3092_v17  ;;  %v5623_v17 = vpop.f32.mrf.mxu3 }
 0x35c   :  { %v1742_v1 = vpop.f32.mrf.mxu2  ;;  %2015 = vmatmul.f32.gmra.mxu0 %v4972_v33 }
 0x35d   :  { %v5590_v36 = vadd.f32 %v1742_v1, %v1630_v44  ;;  %v3096_v1 = vld [vmem:[%s6094_s0 + $0xd8] sm:$0xff] }
 0x35e   :  { %v1632_v37 = vpop.f32.mrf.mxu1 }
 0x35f   :  { %v1633_v53 = vadd.f32 %v1632_v37, %v5010_v60  ;;  %v2136_v60 = vmax.f32 %v4586_v13, 0.0  ;;  %v2138_v13 = vmax.f32 %v4605_v63, 0.0  ;;  %v3097_v63 = vld [vmem:[%s6094_s0 + $0x110] sm:$0xff] }
 0x361   :  { %2790 = vmatmul.msk.f32.vlgmr.msra.gmra.mxu1 %vm453_vm0, %v3093_v10  ;;  %2248 = vmatmul.f32.vlgmr.msra.gmra.mxu2 %v2132_v59 }
 0x364   :  { %v1745_v33 = vpop.f32.mrf.mxu2 }
 0x365   :  { %v5601_v49 = vadd.f32 %v1745_v33, %v1633_v53  ;;  %v2215_v53 = vld [vmem:[%s6097_s3 + $0x98] sm:$0xff]  ;;  %v5640_v33 = vpop.f32.mrf.mxu3 }
 0x366   :  { %v1635_v15 = vpop.f32.mrf.mxu1  ;;  %2357 = vmatpush.msra.mxu3 %v2215_v53  ;;  %v2148_v53 = vmax.f32 %v4727_v3, 0.0 }
 0x367   :  { %v1636_v6 = vadd.f32 %v1635_v15, %v5028_v9 }
 0x369   :  { %2791 = vmatmul.msk.f32.gmra.mxu1 %vm453_vm0, %v3094_v14  ;;  %2251 = vmatmul.f32.gmra.mxu2 %v2134_v25  ;;  %v2142_v14 = vmax.f32 %v4652_v4, 0.0 }
 0x36c   :  { %v1748_v29 = vpop.f32.mrf.mxu2 }
 0x36d   :  { %v5609_v56 = vadd.f32 %v1748_v29, %v1636_v6  ;;  %v3098_v6 = vld [vmem:[%s6094_s0 + $0x148] sm:$0xff]  ;;  %v2492_v29 = vld [vmem:[%s6099_s5 + $0x10] sm:$0xff] }
 0x36e   :  { %v1638_v51 = vpop.f32.mrf.mxu1  ;;  %2608 = vmatpush.msra.mxu0 %v2492_v29  ;;  %v3102_v29 = vld [vmem:[%s6094_s0 + $0x228] sm:$0xff] }
 0x36f   :  { %v1639_v9 = vadd.f32 %v1638_v51, %v5046_v11  ;;  %v5654_v51 = vpop.f32.mrf.mxu3 }
 0x371   :  { %2792 = vmatmul.msk.f32.gmra.mxu1 %vm453_vm0, %v3095_v16  ;;  %2254 = vmatmul.f32.gmra.mxu2 %v2136_v60 }
 0x374   :  { %v1751_v46 = vpop.f32.mrf.mxu2 }
 0x375   :  { %v5620_v23 = vadd.f32 %v1751_v46, %v1639_v9  ;;  %v3099_v9 = vld [vmem:[%s6094_s0 + $0x180] sm:$0xff]  ;;  %v2214_v46 = vld [vmem:[%s6097_s3 + $0x90] sm:$0xff] }
 0x376   :  { %v1641_v44 = vpop.f32.mrf.mxu1  ;;  %2358 = vmatpush.msra.mxu3 %v2214_v46  ;;  %v2212_v46 = vld [vmem:[%s6097_s3 + $0x80] sm:$0xff] }
 0x377   :  { %v1642_v37 = vadd.f32 %v1641_v44, %v5064_v0 }
 0x379   :  { %2793 = vmatmul.msk.f32.gmra.mxu1 %vm453_vm0, %v3096_v1  ;;  %2257 = vmatmul.f32.gmra.mxu2 %v2138_v13  ;;  %v5669_v1 = vpop.f32.mrf.mxu3 }
 0x37c   :  { %v1754_v59 = vpop.f32.mrf.mxu2 }
 0x37d   :  { %v5630_v10 = vadd.f32 %v1754_v59, %v1642_v37  ;;  %v2146_v37 = vmax.f32 %v4699_v26, 0.0  ;;  %v3100_v59 = vld [vmem:[%s6094_s0 + $0x1b8] sm:$0xff]  ;;  %v3101_v26 = vld [vmem:[%s6094_s0 + $0x1f0] sm:$0xff] }
 0x37e   :  { %v1644_v11 = vpop.f32.mrf.mxu1 }
 0x37f   :  { %v1645_v0 = vadd.f32 %v1644_v11, %v5082_v2 }
 0x381   :  { %2794 = vmatmul.msk.f32.gmra.mxu1 %vm453_vm0, %v3097_v63  ;;  %2260 = vmatmul.f32.gmra.mxu2 %v2140_v12 }
 0x384   :  { %v1757_v15 = vpop.f32.mrf.mxu2 }
 0x385   :  { %v5643_v25 = vadd.f32 %v1757_v15, %v1645_v0  ;;  %v5680_v0 = vpop.f32.mrf.mxu3  ;;  %v2213_v15 = vld [vmem:[%s6097_s3 + $0x88] sm:$0xff] }
 0x386   :  { %v1647_v57 = vpop.f32.mrf.mxu1  ;;  %2359 = vmatpush.msra.mxu3 %v2213_v15 }
 0x387   :  { %v1648_v2 = vadd.f32 %v1647_v57, %v5100_v20 }
 0x388   :  { %2360 = vmatpush.msra.mxu3 %v2212_v46 }
 0x389   :  { %2795 = vmatmul.msk.f32.gmra.mxu1 %vm453_vm0, %v3098_v6  ;;  %2263 = vmatmul.f32.gmra.mxu2 %v2142_v14  ;;  %v2150_v6 = vmax.f32 %v4752_v24, 0.0  ;;  %v3103_v24 = vld [vmem:[%s6094_s0 + $0x260] sm:$0xff] }
 0x38c   :  { %v1760_v60 = vpop.f32.mrf.mxu2 }
 0x38d   :  { %v5656_v16 = vadd.f32 %v1760_v60, %v1648_v2  ;;  %v5697_v2 = vpop.f32.mrf.mxu3 }
 0x38e   :  { %v1650_v4 = vpop.f32.mrf.mxu1 }
 0x38f   :  { %v1651_v20 = vadd.f32 %v1650_v4, %v5118_v40 }
 0x391   :  { %2796 = vmatmul.msk.f32.gmra.mxu1 %vm453_vm0, %v3099_v9  ;;  %2266 = vmatmul.f32.gmra.mxu2 %v2144_v47  ;;  %v2152_v9 = vmax.f32 %v4804_v32, 0.0 }
 0x394   :  { %v1763_v44 = vpop.f32.mrf.mxu2 }
 0x395   :  { %v5667_v13 = vadd.f32 %v1763_v44, %v1651_v20  ;;  %v5711_v20 = vpop.f32.mrf.mxu3 }
 0x396   :  { %v1653_v7 = vpop.f32.mrf.mxu1 }
 0x397   :  { %v1654_v11 = vadd.f32 %v1653_v7, %v5136_v8 }
 0x399   :  { %2797 = vmatmul.msk.f32.gmra.mxu1 %vm453_vm0, %v3100_v59  ;;  %2269 = vmatmul.f32.gmra.mxu2 %v2146_v37  ;;  %v2154_v37 = vmax.f32 %v4856_v18, 0.0  ;;  %v3104_v59 = vld [vmem:[%s6094_s0 + $0x298] sm:$0xff]  ;;  %v3105_v18 = vld [vmem:[%s6094_s0 + $0x2d0] sm:$0xff] }
 0x39c   :  { %v1766_v12 = vpop.f32.mrf.mxu2 }
 0x39d   :  { %v5677_v63 = vadd.f32 %v1766_v12, %v1654_v11 }
 0x39e   :  { %v1656_v40 = vpop.f32.mrf.mxu1 }
 0x39f   :  { %v1657_v8 = vadd.f32 %v1656_v40, %v5154_v43 }
 0x3a1   :  { %2798 = vmatmul.msk.f32.gmra.mxu1 %vm453_vm0, %v3101_v26  ;;  %2272 = vmatmul.f32.gmra.mxu2 %v2148_v53  ;;  %v2156_v26 = vmax.f32 %v4905_v41, 0.0  ;;  %v3106_v41 = vld [vmem:[%s6094_s0 + $0x308] sm:$0xff] }
 0x3a4   :  { %v1769_v57 = vpop.f32.mrf.mxu2 }
 0x3a5   :  { %v5690_v14 = vadd.f32 %v1769_v57, %v1657_v8 }
 0x3a6   :  { %v1659_v3 = vpop.f32.mrf.mxu1 }
 0x3a7   :  { %v1660_v60 = vadd.f32 %v1659_v3, %v5172_v48  ;;  %v6121_v3 = vld [vmem:[#allocation5_spill] sm:$0xff] }
 0x3a9   :  { %2799 = vmatmul.msk.f32.gmra.mxu1 %vm453_vm0, %v3102_v29  ;;  %2275 = vmatmul.f32.gmra.mxu2 %v2150_v6  ;;  %v2158_v6 = vmax.f32 %v6121_v3, 0.0 }
 0x3ac   :  { %v1772_v4 = vpop.f32.mrf.mxu2 }
 0x3ad   :  { %v5700_v47 = vadd.f32 %v1772_v4, %v1660_v60 }
 0x3ae   :  { %v1662_v43 = vpop.f32.mrf.mxu1 }
 0x3af   :  { %v1663_v48 = vadd.f32 %v1662_v43, %v5190_v27  ;;  %v5723_v27 = vpop.f32.mrf.mxu3 }
 0x3b1   :  { %2800 = vmatmul.msk.f32.gmra.mxu1 %vm453_vm0, %v3103_v24  ;;  %2278 = vmatmul.f32.gmra.mxu2 %v2152_v9  ;;  %v6122_v24 = vld [vmem:[#allocation6_spill] sm:$0xff] }
 0x3b2   :  { %v2160_v46 = vmax.f32 %v6122_v24, 0.0 }
 0x3b4   :  { %v1775_v44 = vpop.f32.mrf.mxu2 }
 0x3b5   :  { %v5713_v7 = vadd.f32 %v1775_v44, %v1663_v48  ;;  %v3107_v48 = vld [vmem:[%s6094_s0 + $0x340] sm:$0xff] }
 0x3b6   :  { %v1665_v32 = vpop.f32.mrf.mxu1 }
 0x3b7   :  { %v1666_v11 = vadd.f32 %v1665_v32, %v5208_v22  ;;  %v5734_v29 = vpop.f32.mrf.mxu3 }
 0x3b9   :  { %2801 = vmatmul.msk.f32.gmra.mxu1 %vm453_vm0, %v3104_v59  ;;  %2281 = vmatmul.f32.gmra.mxu2 %v2154_v37 }
 0x3bc   :  { %v1778_v12 = vpop.f32.mrf.mxu2 }
 0x3bd   :  { %v5721_v40 = vadd.f32 %v1778_v12, %v1666_v11  ;;  %v6123_v11 = vld [vmem:[#allocation7_spill] sm:$0xff] }
 0x3be   :  { %v1668_v53 = vpop.f32.mrf.mxu1  ;;  %v2162_v12 = vmax.f32 %v6123_v11, 0.0 }
 0x3bf   :  { %v1669_v15 = vadd.f32 %v1668_v53, %v5235_v31  ;;  %v2491_v31 = vld [vmem:[%s6099_s5 + $0x8] sm:$0xff]  ;;  %v5751_v44 = vpop.f32.mrf.mxu3  ;;  %v3108_v53 = vld [vmem:[%s6094_s0 + $0x378] sm:$0xff] }
 0x3c0   :  { %2609 = vmatpush.msra.mxu0 %v2491_v31 }
 0x3c1   :  { %2802 = vmatmul.msk.f32.gmra.mxu1 %vm453_vm0, %v3105_v18  ;;  %2284 = vmatmul.f32.gmra.mxu2 %v2156_v26 }
 0x3c4   :  { %v1781_v8 = vpop.f32.mrf.mxu2 }
 0x3c5   :  { %v5731_v57 = vadd.f32 %v1781_v8, %v1669_v15 }
 0x3c6   :  { %v1671_v22 = vpop.f32.mrf.mxu1 }
 0x3c7   :  { %v1672_v60 = vadd.f32 %v1671_v22, %v5253_v21  ;;  %v5762_v18 = vpop.f32.mrf.mxu3  ;;  %v6124_v22 = vld [vmem:[#allocation8_spill] sm:$0xff] }
 0x3c8   :  { %v2164_v3 = vmax.f32 %v6124_v22, 0.0 }
 0x3c9   :  { %2803 = vmatmul.msk.f32.gmra.mxu1 %vm453_vm0, %v3106_v41  ;;  %2287 = vmatmul.f32.gmra.mxu2 %v2158_v6 }
 0x3cc   :  { %v1784_v4 = vpop.f32.mrf.mxu2 }
 0x3cd   :  { %v5744_v43 = vadd.f32 %v1784_v4, %v1672_v60  ;;  %v3109_v60 = vld [vmem:[%s6094_s0 + $0x3b0] sm:$0xff]  ;;  %v6125_v4 = vld [vmem:[#allocation9_spill] sm:$0xff] }
 0x3ce   :  { %v1674_v9 = vpop.f32.mrf.mxu1 }
 0x3cf   :  { %v1675_v21 = vadd.f32 %v1674_v9, %v5277_v62  ;;  %v2166_v9 = vmax.f32 %v6125_v4, 0.0 }
 0x3d1   :  { %2804 = vmatmul.msk.f32.gmra.mxu1 %vm453_vm0, %v3107_v48  ;;  %2290 = vmatmul.f32.gmra.mxu2 %v2160_v46  ;;  %v5780_v48 = vpop.f32.mrf.mxu0 }
 0x3d4   :  { %v1787_v32 = vpop.f32.mrf.mxu2 }
 0x3d5   :  { %v5754_v37 = vadd.f32 %v1787_v32, %v1675_v21  ;;  %v6126_v32 = vld [vmem:[#allocation10_spill] sm:$0xff] }
 0x3d6   :  { %v1677_v59 = vpop.f32.mrf.mxu1 }
 0x3d7   :  { %v1678_v26 = vadd.f32 %v1677_v59, %v5295_v19  ;;  %v5772_v19 = vpop.f32.mrf.mxu3  ;;  %v2168_v59 = vmax.f32 %v6126_v32, 0.0  ;;  %v6129_v32 = vld [vmem:[#allocation13_spill] sm:$0xff] }
 0x3d9   :  { %2805 = vmatmul.msk.f32.gmra.mxu1 %vm453_vm0, %v3108_v53  ;;  %2293 = vmatmul.f32.gmra.mxu2 %v2162_v12 }
 0x3dc   :  { %v1790_v15 = vpop.f32.mrf.mxu2 }
 0x3dd   :  { %v5764_v8 = vadd.f32 %v1790_v15, %v1678_v26  ;;  %v5790_v26 = vpop.f32.mrf.mxu0 }
 0x3de   :  { %v2036_v62 = vpop.f32.mrf.mxu1 }
 0x3df   :  { %v2037_v6 = vadd.f32 %v2036_v62, %v5316_v38  ;;  %v3110_v38 = vld [vmem:[%s6094_s0 + $0x3e8] sm:$0xff]  ;;  %v5784_v12 = vpop.f32.mrf.mxu3  ;;  %v6127_v62 = vld [vmem:[#allocation11_spill] sm:$0xff] }
 0x3e0   :  { %v2170_v22 = vmax.f32 %v6127_v62, 0.0 }
 0x3e1   :  { %v2133_v41 = vmax.f32 %v2037_v6, 0.0  ;;  %2806 = vmatmul.msk.f32.gmra.mxu1 %vm453_vm0, %v3109_v60  ;;  %2296 = vmatmul.f32.gmra.mxu2 %v2164_v3 }
 0x3e3   :  { %2361 = vmatmul.f32.vlgmr.msra.gmra.mxu3 %v2133_v41 }
 0x3e6   :  { %v2039_v31 = vpop.f32.mrf.mxu1 }
 0x3e7   :  { %v2040_v24 = vadd.f32 %v2039_v31, %v5331_v5  ;;  %v3111_v5 = vld [vmem:[%s6094_s0 + $0x420] sm:$0xff]  ;;  %v5798_v41 = vpop.f32.mrf.mxu3  ;;  %v6128_v31 = vld [vmem:[#allocation12_spill] sm:$0xff] }
 0x3e8   :  { %v2172_v4 = vmax.f32 %v6128_v31, 0.0 }
 0x3e9   :  { %v2135_v46 = vmax.f32 %v2040_v24, 0.0  ;;  %2807 = vmatmul.msk.f32.gmra.mxu1 %vm453_vm0, %v3110_v38  ;;  %2299 = vmatmul.f32.gmra.mxu2 %v2166_v9  ;;  %v5801_v9 = vpop.f32.mrf.mxu0 }
 0x3eb   :  { %2364 = vmatmul.f32.gmra.mxu3 %v2135_v46 }
 0x3ee   :  { %v2042_v21 = vpop.f32.mrf.mxu1 }
 0x3ef   :  { %v2043_v11 = vadd.f32 %v2042_v21, %v5352_v54  ;;  %v3112_v54 = vld [vmem:[%s6094_s0 + $0x458] sm:$0xff]  ;;  %v5808_v38 = vpop.f32.mrf.mxu3 }
 0x3f1   :  { %v2137_v53 = vmax.f32 %v2043_v11, 0.0  ;;  %2808 = vmatmul.msk.f32.gmra.mxu1 %vm453_vm0, %v3111_v5  ;;  %2302 = vmatmul.f32.gmra.mxu2 %v2168_v59  ;;  %v2174_v59 = vmax.f32 %v6129_v32, 0.0 }
 0x3f3   :  { %2367 = vmatmul.f32.gmra.mxu3 %v2137_v53  ;;  %v5812_v53 = vpop.f32.mrf.mxu0 }
 0x3f6   :  { %v2045_v15 = vpop.f32.mrf.mxu1 }
 0x3f7   :  { %v2046_v3 = vadd.f32 %v2045_v15, %v5367_v52  ;;  %v3113_v52 = vld [vmem:[%s6094_s0 + $0x490] sm:$0xff]  ;;  %v2490_v15 = vld [vmem:[%s6099_s5] sm:$0xff]  ;;  %v5821_v62 = vpop.f32.mrf.mxu3 }
 0x3f8   :  { %2610 = vmatpush.msra.mxu0 %v2490_v15 }
 0x3f9   :  { %v2139_v6 = vmax.f32 %v2046_v3, 0.0  ;;  %2809 = vmatmul.msk.f32.gmra.mxu1 %vm453_vm0, %v3112_v54  ;;  %2305 = vmatmul.f32.gmra.mxu2 %v2170_v22 }
 0x3fb   :  { %2370 = vmatmul.f32.gmra.mxu3 %v2139_v6  ;;  %v5829_v31 = vpop.f32.mrf.mxu0 }
 0x3fe   :  { %v2048_v60 = vpop.f32.mrf.mxu1 }
 0x3ff   :  { %v2049_v24 = vadd.f32 %v2048_v60, %v5388_v35  ;;  %v3114_v35 = vld [vmem:[%s6094_s0 + $0x4c8] sm:$0xff]  ;;  %v3115_v60 = vld [vmem:[%s6094_s0 + $0x500] sm:$0xff]  ;;  %v5835_v32 = vpop.f32.mrf.mxu3 }
 0x401   :  { %v2141_v46 = vmax.f32 %v2049_v24, 0.0  ;;  %2810 = vmatmul.msk.f32.gmra.mxu1 %vm453_vm0, %v3113_v52  ;;  %2308 = vmatmul.f32.gmra.mxu2 %v2172_v4  ;;  %v5831_v4 = vpop.f32.mrf.mxu2 }
 0x403   :  { %2373 = vmatmul.f32.gmra.mxu3 %v2141_v46  ;;  %v6131_v46 = vld [vmem:[#allocation15_spill] sm:$0xff] }
 0x404   :  { %v2178_v52 = vmax.f32 %v6131_v46, 0.0 }
 0x406   :  { %v2051_v21 = vpop.f32.mrf.mxu1 }
 0x407   :  { %v2052_v11 = vadd.f32 %v2051_v21, %v5403_v34  ;;  %v6130_v34 = vld [vmem:[#allocation14_spill] sm:$0xff] }
 0x408   :  { %v2176_v3 = vmax.f32 %v6130_v34, 0.0 }
 0x409   :  { %v2143_v5 = vmax.f32 %v2052_v11, 0.0  ;;  %2811 = vmatmul.msk.f32.gmra.mxu1 %vm453_vm0, %v3114_v35  ;;  %2311 = vmatmul.f32.gmra.mxu2 %v2174_v59  ;;  %v3116_v11 = vld [vmem:[%s6094_s0 + $0x538] sm:$0xff]  ;;  %v1962_v35 = vpop.f32.mrf.mxu0  ;;  %v5844_v15 = vpop.f32.mrf.mxu2 }
 0x40b   :  { %2376 = vmatmul.f32.gmra.mxu3 %v2143_v5 }
 0x40e   :  { %v2054_v22 = vpop.f32.mrf.mxu1 }
 0x40f   :  { %v2055_v6 = vadd.f32 %v2054_v22, %v5424_v39  ;;  %v1835_v39 = vadd.f32 %v5623_v17, %v5460_v58  ;;  %v6132_v22 = vld [vmem:[#allocation16_spill] sm:$0xff]  ;;  %v1838_v58 = vadd.f32 %v5640_v33, %v5473_v61  ;;  %v1841_v33 = vadd.f32 %v5654_v51, %v5498_v42 }
 0x410   :  { %v2180_v34 = vmax.f32 %v6132_v22, 0.0  ;;  %v1844_v42 = vadd.f32 %v5669_v1, %v5523_v55  ;;  %v1847_v1 = vadd.f32 %v5680_v0, %v5545_v45  ;;  %v1850_v45 = vadd.f32 %v5697_v2, %v5561_v30 }
 0x411   :  { %v2145_v54 = vmax.f32 %v2055_v6, 0.0  ;;  %2812 = vmatmul.msk.f32.gmra.mxu1 %vm453_vm0, %v3115_v60  ;;  %2314 = vmatmul.f32.gmra.mxu2 %v2176_v3  ;;  %v1948_v5 = vadd.f32 %v5780_v48, %v1835_v39  ;;  %v3117_v6 = vld [vmem:[%s6094_s0 + $0x570] sm:$0xff]  ;;  %v1951_v48 = vadd.f32 %v5790_v26, %v1838_v58  ;;  %v1853_v30 = vadd.f32 %v5711_v20, %v5577_v50 }
 0x412   :  { %v1856_v50 = vadd.f32 %v5723_v27, %v5590_v36 }
 0x413   :  { %2379 = vmatmul.f32.gmra.mxu3 %v2145_v54  ;;  %v5853_v54 = vpop.f32.mrf.mxu3 }
 0x416   :  { %v2057_v24 = vpop.f32.mrf.mxu1 }
 0x417   :  { %v2058_v21 = vadd.f32 %v2057_v24, %v5439_v28  ;;  %v6133_v24 = vld [vmem:[#allocation17_spill] sm:$0xff] }
 0x418   :  { %v2182_v46 = vmax.f32 %v6133_v24, 0.0 }
 0x419   :  { %v2147_v59 = vmax.f32 %v2058_v21, 0.0  ;;  %2813 = vmatmul.msk.f32.gmra.mxu1 %vm453_vm0, %v3116_v11  ;;  %2317 = vmatmul.f32.gmra.mxu2 %v2178_v52  ;;  %v1965_v52 = vpop.f32.mrf.mxu0  ;;  %v5857_v21 = vpop.f32.mrf.mxu2  ;;  %v1954_v11 = vadd.f32 %v5801_v9, %v1841_v33  ;;  %v1957_v9 = vadd.f32 %v5812_v53, %v1844_v42  ;;  %v1960_v53 = vadd.f32 %v5829_v31, %v1847_v1 }
 0x41a   :  { %v1963_v42 = vadd.f32 %v1962_v35, %v1850_v45  ;;  %v1966_v35 = vadd.f32 %v1965_v52, %v1853_v30 }
 0x41b   :  { %2382 = vmatmul.f32.gmra.mxu3 %v2147_v59  ;;  %v3118_v59 = vld [vmem:[%s6094_s0 + $0x5a8] sm:$0xff]  ;;  %v5865_v26 = vpop.f32.mrf.mxu3 }
 0x41e   :  { %v2060_v28 = vpop.f32.mrf.mxu1 }
 0x41f   :  { %v2061_v3 = vadd.f32 %v2060_v28, %v1948_v5  ;;  %v6134_v28 = vld [vmem:[#allocation18_spill] sm:$0xff] }
 0x420   :  { %v2184_v22 = vmax.f32 %v6134_v28, 0.0 }
 0x421   :  { %v2149_v17 = vmax.f32 %v2061_v3, 0.0  ;;  %2814 = vmatmul.msk.f32.gmra.mxu1 %vm453_vm0, %v3117_v6  ;;  %2320 = vmatmul.f32.gmra.mxu2 %v2180_v34  ;;  %v1968_v51 = vpop.f32.mrf.mxu0  ;;  %v5871_v3 = vpop.f32.mrf.mxu2 }
 0x423   :  { %2385 = vmatmul.f32.gmra.mxu3 %v2149_v17  ;;  %v3119_v17 = vld [vmem:[%s6094_s0 + $0x5e0] sm:$0xff]  ;;  %v5878_v6 = vpop.f32.mrf.mxu3 }
 0x426   :  { %v2063_v60 = vpop.f32.mrf.mxu1 }
 0x427   :  { %v2064_v61 = vadd.f32 %v2063_v60, %v1951_v48  ;;  %v6135_v60 = vld [vmem:[#allocation19_spill] sm:$0xff] }
 0x428   :  { %v2186_v24 = vmax.f32 %v6135_v60, 0.0 }
 0x429   :  { %v2151_v39 = vmax.f32 %v2064_v61, 0.0  ;;  %2815 = vmatmul.msk.f32.gmra.mxu1 %vm453_vm0, %v3118_v59  ;;  %2323 = vmatmul.f32.gmra.mxu2 %v2182_v46  ;;  %v3120_v61 = vld [vmem:[%s6094_s0 + $0x618] sm:$0xff]  ;;  %v1971_v33 = vpop.f32.mrf.mxu0 }
 0x42b   :  { %2388 = vmatmul.f32.gmra.mxu3 %v2151_v39  ;;  %v5887_v39 = vpop.f32.mrf.mxu2 }
 0x42e   :  { %v2066_v5 = vpop.f32.mrf.mxu1 }
 0x42f   :  { %v2067_v34 = vadd.f32 %v2066_v5, %v1954_v11  ;;  %v6136_v11 = vld [vmem:[#allocation20_spill] sm:$0xff] }
 0x430   :  { %v2188_v5 = vmax.f32 %v6136_v11, 0.0 }
 0x431   :  { %v2153_v58 = vmax.f32 %v2067_v34, 0.0  ;;  %2816 = vmatmul.msk.f32.gmra.mxu1 %vm453_vm0, %v3119_v17  ;;  %2326 = vmatmul.f32.gmra.mxu2 %v2184_v22  ;;  %v5891_v22 = vpop.f32.mrf.mxu3  ;;  %v3121_v34 = vld [vmem:[%s6094_s0 + $0x650] sm:$0xff]  ;;  %v1974_v31 = vpop.f32.mrf.mxu0 }
 0x433   :  { %2391 = vmatmul.f32.gmra.mxu3 %v2153_v58  ;;  %v5899_v58 = vpop.f32.mrf.mxu2 }
 0x436   :  { %v2069_v48 = vpop.f32.mrf.mxu1 }
 0x437   :  { %v2070_v55 = vadd.f32 %v2069_v48, %v1957_v9  ;;  %v6137_v9 = vld [vmem:[#allocation21_spill] sm:$0xff] }
 0x438   :  { %v2190_v48 = vmax.f32 %v6137_v9, 0.0 }
 0x439   :  { %v2155_v46 = vmax.f32 %v2070_v55, 0.0  ;;  %2817 = vmatmul.msk.f32.gmra.mxu1 %vm453_vm0, %v3120_v61  ;;  %2329 = vmatmul.f32.gmra.mxu2 %v2186_v24  ;;  %v3122_v24 = vld [vmem:[%s6094_s0 + $0x688] sm:$0xff]  ;;  %v5908_v55 = vpop.f32.mrf.mxu3 }
 0x43b   :  { %2394 = vmatmul.f32.gmra.mxu3 %v2155_v46  ;;  %v6138_v46 = vld [vmem:[#allocation22_spill] sm:$0xff] }
 0x43c   :  { %v2192_v61 = vmax.f32 %v6138_v46, 0.0 }
 0x43e   :  { %v2072_v59 = vpop.f32.mrf.mxu1 }
 0x43f   :  { %v2073_v28 = vadd.f32 %v2072_v59, %v1960_v53  ;;  %v1977_v53 = vpop.f32.mrf.mxu0  ;;  %v5911_v59 = vpop.f32.mrf.mxu2 }
 0x441   :  { %v2157_v0 = vmax.f32 %v2073_v28, 0.0  ;;  %2818 = vmatmul.msk.f32.gmra.mxu1 %vm453_vm0, %v3121_v34  ;;  %2332 = vmatmul.f32.gmra.mxu2 %v2188_v5  ;;  %v3123_v5 = vld [vmem:[%s6094_s0 + $0x6c0] sm:$0xff]  ;;  %v5919_v52 = vpop.f32.mrf.mxu3  ;;  %v1969_v28 = vadd.f32 %v1968_v51, %v1856_v50 }
 0x443   :  { %2397 = vmatmul.f32.gmra.mxu3 %v2157_v0  ;;  %v6139_v0 = vld [vmem:[#allocation23_spill] sm:$0xff] }
 0x444   :  { %v2194_v34 = vmax.f32 %v6139_v0, 0.0 }
 0x446   :  { %v2075_v17 = vpop.f32.mrf.mxu1 }
 0x447   :  { %v2076_v60 = vadd.f32 %v2075_v17, %v1963_v42  ;;  %v1859_v17 = vadd.f32 %v5734_v29, %v5601_v49  ;;  %v1980_v36 = vpop.f32.mrf.mxu0  ;;  %v5924_v27 = vpop.f32.mrf.mxu2  ;;  %v1862_v49 = vadd.f32 %v5751_v44, %v5609_v56  ;;  %v5937_v29 = vld [vmem:[%s6098_s4] ss:$0 sm:$0xff]  ;;  %v1865_v56 = vadd.f32 %v5762_v18, %v5620_v23 }
 0x448   :  { %v2250_v46 = vadd.f32 %v5937_v29, %v5831_v4 }
 0x449   :  { %v2159_v2 = vmax.f32 %v2076_v60, 0.0  ;;  %2819 = vmatmul.msk.f32.gmra.mxu1 %vm453_vm0, %v3122_v24  ;;  %2335 = vmatmul.f32.gmra.mxu2 %v2190_v48  ;;  %v3124_v48 = vld [vmem:[%s6094_s0 + $0x6f8] sm:$0xff]  ;;  %v1972_v51 = vadd.f32 %v1971_v33, %v1859_v17  ;;  %v5930_v60 = vpop.f32.mrf.mxu3 }
 0x44b   :  { %2400 = vmatmul.f32.gmra.mxu3 %v2159_v2 }
 0x44e   :  { %v2078_v1 = vpop.f32.mrf.mxu1 }
 0x44f   :  { %v2079_v11 = vadd.f32 %v2078_v1, %v1966_v35  ;;  %v1983_v35 = vpop.f32.mrf.mxu0  ;;  %v1975_v1 = vadd.f32 %v1974_v31, %v1862_v49  ;;  %v2253_v31 = vadd.f32 %v5937_v29, %v5844_v15  ;;  %v5948_v23 = vpop.f32.mrf.mxu2  ;;  %v1871_v49 = vadd.f32 %v5784_v12, %v5643_v25 }
 0x451   :  { %v2161_v20 = vmax.f32 %v2079_v11, 0.0  ;;  %2820 = vmatmul.msk.f32.gmra.mxu1 %vm453_vm0, %v3123_v5  ;;  %2338 = vmatmul.f32.gmra.mxu2 %v2192_v61  ;;  %v1978_v5 = vadd.f32 %v1977_v53, %v1865_v56  ;;  %v2256_v53 = vadd.f32 %v5937_v29, %v5857_v21 }
 0x453   :  { %2403 = vmatmul.f32.gmra.mxu3 %v2161_v20 }
 0x456   :  { %v2081_v45 = vpop.f32.mrf.mxu1 }
 0x457   :  { %v2082_v42 = vadd.f32 %v2081_v45, %v1969_v28  ;;  %v1986_v28 = vpop.f32.mrf.mxu0 }
 0x459   :  { %v2163_v9 = vmax.f32 %v2082_v42, 0.0  ;;  %2821 = vmatmul.msk.f32.gmra.mxu1 %vm453_vm0, %v3124_v48  ;;  %2341 = vmatmul.f32.gmra.mxu2 %v2194_v34  ;;  %v1868_v42 = vadd.f32 %v5772_v19, %v5630_v10 }
 0x45b   :  { %2406 = vmatmul.f32.gmra.mxu3 %v2163_v9  ;;  %v1981_v18 = vadd.f32 %v1980_v36, %v1868_v42  ;;  %v2259_v36 = vadd.f32 %v5937_v29, %v5871_v3 }
 0x45e   :  { %v2084_v30 = vpop.f32.mrf.mxu1 }
 0x45f   :  { %v2085_v2 = vadd.f32 %v2084_v30, %v1972_v51  ;;  %v1989_v51 = vpop.f32.mrf.mxu0 }
 0x461   :  { %v2165_v24 = vmax.f32 %v2085_v2, 0.0 }
 0x463   :  { %2409 = vmatmul.f32.gmra.mxu3 %v2165_v24  ;;  %v1984_v24 = vadd.f32 %v1983_v35, %v1871_v49  ;;  %v2262_v35 = vadd.f32 %v5937_v29, %v5887_v39  ;;  %v1883_v49 = vadd.f32 %v5835_v32, %v5690_v14 }
 0x466   :  { %v2087_v33 = vpop.f32.mrf.mxu1  ;;  %v2362_v61 = vpop.f32.mrf.mxu3 }
 0x467   :  { %v2088_v11 = vadd.f32 %v2087_v33, %v1975_v1  ;;  %v2363_v50 = vadd.f32 %v2362_v61, %v2250_v46  ;;  %v5958_v1 = vpop.f32.mrf.mxu2 }
 0x469   :  { %v2167_v44 = vmax.f32 %v2088_v11, 0.0  ;;  %v2458_v20 = vmax.f32 %v2363_v50, 0.0  ;;  %v1874_v11 = vadd.f32 %v5798_v41, %v5656_v16  ;;  %v1992_v50 = vpop.f32.mrf.mxu0 }
 0x46b   :  { %2412 = vmatmul.f32.gmra.mxu3 %v2167_v44  ;;  %2822 = vmatmul.msk.f32.vlgmr.msra.gmra.mxu0 %vm2498_vm1, %v2458_v20  ;;  %v1987_v56 = vadd.f32 %v1986_v28, %v1874_v11  ;;  %v2265_v28 = vadd.f32 %v5937_v29, %v5899_v58 }
 0x46e   :  { %v2090_v45 = vpop.f32.mrf.mxu1  ;;  %v2365_v4 = vpop.f32.mrf.mxu3 }
 0x46f   :  { %v2091_v0 = vadd.f32 %v2090_v45, %v1978_v5  ;;  %v2366_v34 = vadd.f32 %v2365_v4, %v2253_v31  ;;  %v5965_v20 = vpop.f32.mrf.mxu2  ;;  %v1877_v45 = vadd.f32 %v5808_v38, %v5667_v13 }
 0x471   :  { %v2169_v17 = vmax.f32 %v2091_v0, 0.0  ;;  %v2459_v9 = vmax.f32 %v2366_v34, 0.0  ;;  %v1995_v4 = vpop.f32.mrf.mxu0  ;;  %v1990_v0 = vadd.f32 %v1989_v51, %v1877_v45 }
 0x473   :  { %2415 = vmatmul.f32.gmra.mxu3 %v2169_v17  ;;  %2823 = vmatmul.msk.f32.gmra.mxu0 %vm2498_vm1, %v2459_v9  ;;  %v1880_v9 = vadd.f32 %v5821_v62, %v5677_v63 }
 0x476   :  { %v2093_v48 = vpop.f32.mrf.mxu1  ;;  %v2368_v15 = vpop.f32.mrf.mxu3 }
 0x477   :  { %v2094_v30 = vadd.f32 %v2093_v48, %v1981_v18  ;;  %v2369_v2 = vadd.f32 %v2368_v15, %v2256_v53  ;;  %v5974_v18 = vpop.f32.mrf.mxu2  ;;  %v1993_v53 = vadd.f32 %v1992_v50, %v1880_v9  ;;  %v2268_v15 = vadd.f32 %v5937_v29, %v5911_v59 }
 0x478   :  { %v2274_v50 = vadd.f32 %v5937_v29, %v5948_v23 }
 0x479   :  { %v2171_v10 = vmax.f32 %v2094_v30, 0.0  ;;  %v2460_v19 = vmax.f32 %v2369_v2, 0.0  ;;  %v1998_v48 = vpop.f32.mrf.mxu0 }
 0x47b   :  { %2418 = vmatmul.f32.gmra.mxu3 %v2171_v10  ;;  %2824 = vmatmul.msk.f32.gmra.mxu0 %vm2498_vm1, %v2460_v19  ;;  %v1996_v19 = vadd.f32 %v1995_v4, %v1883_v49 }
 0x47e   :  { %v2096_v21 = vpop.f32.mrf.mxu1  ;;  %v2371_v46 = vpop.f32.mrf.mxu3 }
 0x47f   :  { %v2097_v33 = vadd.f32 %v2096_v21, %v1984_v24  ;;  %v2372_v61 = vadd.f32 %v2371_v46, %v2259_v36  ;;  %v5981_v10 = vpop.f32.mrf.mxu2  ;;  %v2271_v24 = vadd.f32 %v5937_v29, %v5924_v27 }
 0x481   :  { %v2173_v25 = vmax.f32 %v2097_v33, 0.0  ;;  %v2461_v12 = vmax.f32 %v2372_v61, 0.0  ;;  %v2001_v21 = vpop.f32.mrf.mxu0  ;;  %v1886_v61 = vadd.f32 %v5853_v54, %v5700_v47 }
 0x483   :  { %2421 = vmatmul.f32.gmra.mxu3 %v2173_v25  ;;  %2825 = vmatmul.msk.f32.gmra.mxu0 %vm2498_vm1, %v2461_v12  ;;  %v1999_v11 = vadd.f32 %v1998_v48, %v1886_v61 }
 0x486   :  { %v2099_v3 = vpop.f32.mrf.mxu1  ;;  %v2374_v44 = vpop.f32.mrf.mxu3 }
 0x487   :  { %v2100_v5 = vadd.f32 %v2099_v3, %v1987_v56  ;;  %v2375_v31 = vadd.f32 %v2374_v44, %v2262_v35  ;;  %v2288_v25 = vpop.f32.mrf.mxu2  ;;  %v1889_v3 = vadd.f32 %v5865_v26, %v5713_v7 }
 0x489   :  { %v2175_v16 = vmax.f32 %v2100_v5, 0.0  ;;  %v2462_v41 = vmax.f32 %v2375_v31, 0.0  ;;  %v2004_v44 = vpop.f32.mrf.mxu0  ;;  %v2002_v54 = vadd.f32 %v2001_v21, %v1889_v3  ;;  %v2277_v31 = vadd.f32 %v5937_v29, %v5958_v1 }
 0x48a   :  { %v1901_v21 = vadd.f32 %v5919_v52, %v5754_v37 }
 0x48b   :  { %2424 = vmatmul.f32.gmra.mxu3 %v2175_v16  ;;  %2826 = vmatmul.msk.f32.gmra.mxu0 %vm2498_vm1, %v2462_v41 }
 0x48e   :  { %v2102_v39 = vpop.f32.mrf.mxu1  ;;  %v2377_v34 = vpop.f32.mrf.mxu3 }
 0x48f   :  { %v2103_v42 = vadd.f32 %v2102_v39, %v1990_v0  ;;  %v2378_v17 = vadd.f32 %v2377_v34, %v2265_v28  ;;  %v2291_v16 = vpop.f32.mrf.mxu2  ;;  %v1892_v0 = vadd.f32 %v5878_v6, %v5721_v40  ;;  %v2280_v34 = vadd.f32 %v5937_v29, %v5965_v20 }
 0x490   :  { %v2292_v52 = vadd.f32 %v5937_v29, %v2291_v16 }
 0x491   :  { %v2177_v13 = vmax.f32 %v2103_v42, 0.0  ;;  %v2463_v38 = vmax.f32 %v2378_v17, 0.0  ;;  %v2007_v26 = vpop.f32.mrf.mxu0  ;;  %v2005_v39 = vadd.f32 %v2004_v44, %v1892_v0 }
 0x493   :  { %2427 = vmatmul.f32.gmra.mxu3 %v2177_v13  ;;  %2827 = vmatmul.msk.f32.gmra.mxu0 %vm2498_vm1, %v2463_v38  ;;  %v1895_v13 = vadd.f32 %v5891_v22, %v5731_v57 }
 0x495   :  { %v2008_v6 = vadd.f32 %v2007_v26, %v1895_v13 }
 0x496   :  { %v2105_v58 = vpop.f32.mrf.mxu1  ;;  %v2380_v51 = vpop.f32.mrf.mxu3 }
 0x497   :  { %v2106_v30 = vadd.f32 %v2105_v58, %v1993_v53  ;;  %v2381_v2 = vadd.f32 %v2380_v51, %v2268_v15  ;;  %v2294_v38 = vpop.f32.mrf.mxu2  ;;  %v2283_v15 = vadd.f32 %v5937_v29, %v5974_v18 }
 0x499   :  { %v2179_v63 = vmax.f32 %v2106_v30, 0.0  ;;  %v2464_v62 = vmax.f32 %v2381_v2, 0.0  ;;  %v2010_v48 = vpop.f32.mrf.mxu0  ;;  %v1898_v2 = vadd.f32 %v5908_v55, %v5744_v43 }
 0x49b   :  { %2430 = vmatmul.f32.gmra.mxu3 %v2179_v63  ;;  %2828 = vmatmul.msk.f32.gmra.mxu0 %vm2498_vm1, %v2464_v62  ;;  %v2011_v63 = vadd.f32 %v2010_v48, %v1898_v2  ;;  %v2286_v62 = vadd.f32 %v5937_v29, %v5981_v10 }
 0x49e   :  { %v2108_v36 = vpop.f32.mrf.mxu1  ;;  %v2383_v59 = vpop.f32.mrf.mxu3 }
 0x49f   :  { %v2109_v46 = vadd.f32 %v2108_v36, %v1996_v19  ;;  %v2384_v33 = vadd.f32 %v2383_v59, %v2271_v24  ;;  %v2297_v22 = vpop.f32.mrf.mxu2 }
 0x4a0   :  { %v2298_v16 = vadd.f32 %v5937_v29, %v2297_v22 }
 0x4a1   :  { %v2181_v14 = vmax.f32 %v2109_v46, 0.0  ;;  %v2465_v32 = vmax.f32 %v2384_v33, 0.0  ;;  %v2013_v59 = vpop.f32.mrf.mxu0  ;;  %v2289_v33 = vadd.f32 %v5937_v29, %v2288_v25 }
 0x4a2   :  { %v2014_v55 = vadd.f32 %v2013_v59, %v1901_v21 }
 0x4a3   :  { %2433 = vmatmul.f32.gmra.mxu3 %v2181_v14  ;;  %2829 = vmatmul.msk.f32.gmra.mxu0 %vm2498_vm1, %v2465_v32 }
 0x4a6   :  { %v2111_v12 = vpop.f32.mrf.mxu1  ;;  %v2386_v27 = vpop.f32.mrf.mxu3 }
 0x4a7   :  { %v2112_v56 = vadd.f32 %v2111_v12, %v1999_v11  ;;  %v2387_v35 = vadd.f32 %v2386_v27, %v2274_v50  ;;  %v2300_v61 = vpop.f32.mrf.mxu2  ;;  %v1904_v50 = vadd.f32 %v5930_v60, %v5764_v8  ;;  %v2295_v8 = vadd.f32 %v5937_v29, %v2294_v38 }
 0x4a9   :  { %v2183_v5 = vmax.f32 %v2112_v56, 0.0  ;;  %v2466_v47 = vmax.f32 %v2387_v35, 0.0  ;;  %v2016_v56 = vpop.f32.mrf.mxu0 }
 0x4aa   :  { %v2017_v37 = vadd.f32 %v2016_v56, %v1904_v50 }
 0x4ab   :  { %2436 = vmatmul.f32.gmra.mxu3 %v2183_v5  ;;  %2830 = vmatmul.msk.f32.gmra.mxu0 %vm2498_vm1, %v2466_v47 }
 0x4ae   :  { %v2114_v45 = vpop.f32.mrf.mxu1  ;;  %v2389_v23 = vpop.f32.mrf.mxu3 }
 0x4af   :  { %v2115_v41 = vadd.f32 %v2114_v45, %v2002_v54  ;;  %v2390_v4 = vadd.f32 %v2389_v23, %v2277_v31  ;;  %v2303_v5 = vpop.f32.mrf.mxu2 }
 0x4b0   :  { %v2304_v38 = vadd.f32 %v5937_v29, %v2303_v5 }
 0x4b1   :  { %v2185_v28 = vmax.f32 %v2115_v41, 0.0  ;;  %v2467_v7 = vmax.f32 %v2390_v4, 0.0  ;;  %v6026_v41 = vld [vmem:[%s6100_s6] ss:$0 sm:$0xff]  ;;  %s3151_s6 = smov [#allocation2]  }
 0x4b2   :  { %s2744_s26 = sshll.u32 %s3151_s6, 4  ;;  %s2745_s26 = int_to_ptr.vmem [resolvable:$true] %s2744_s26 }
 0x4b3   :  { %2439 = vmatmul.f32.gmra.mxu3 %v2185_v28  ;;  %2831 = vmatmul.msk.f32.gmra.mxu0 %vm2498_vm1, %v2467_v7 }
 0x4b6   :  { %v2117_v42 = vpop.f32.mrf.mxu1  ;;  %v2392_v1 = vpop.f32.mrf.mxu3 }
 0x4b7   :  { %v2118_v17 = vadd.f32 %v2117_v42, %v2005_v39  ;;  %v2393_v9 = vadd.f32 %v2392_v1, %v2280_v34  ;;  %v2306_v23 = vpop.f32.mrf.mxu2  ;;  %v2301_v34 = vadd.f32 %v5937_v29, %v2300_v61 }
 0x4b9   :  { %v2187_v53 = vmax.f32 %v2118_v17, 0.0  ;;  %v2468_v40 = vmax.f32 %v2393_v9, 0.0 }
 0x4bb   :  { %2442 = vmatmul.f32.gmra.mxu3 %v2187_v53  ;;  %2832 = vmatmul.msk.f32.gmra.mxu0 %vm2498_vm1, %v2468_v40 }
 0x4be   :  { %v2120_v58 = vpop.f32.mrf.mxu1  ;;  %v2395_v20 = vpop.f32.mrf.mxu3 }
 0x4bf   :  { %v2121_v51 = vadd.f32 %v2120_v58, %v2008_v6  ;;  %v2396_v30 = vadd.f32 %v2395_v20, %v2283_v15  ;;  %v2309_v39 = vpop.f32.mrf.mxu2  ;;  %v2307_v20 = vadd.f32 %v5937_v29, %v2306_v23 }
 0x4c1   :  { %v2189_v49 = vmax.f32 %v2121_v51, 0.0  ;;  %v2469_v57 = vmax.f32 %v2396_v30, 0.0 }
 0x4c3   :  { %2445 = vmatmul.f32.gmra.mxu3 %v2189_v49  ;;  %2833 = vmatmul.msk.f32.gmra.mxu0 %vm2498_vm1, %v2469_v57 }
 0x4c6   :  { %v2123_v19 = vpop.f32.mrf.mxu1  ;;  %v2398_v24 = vpop.f32.mrf.mxu3 }
 0x4c7   :  { %v2124_v18 = vadd.f32 %v2123_v19, %v2011_v63  ;;  %v2399_v36 = vadd.f32 %v2398_v24, %v2286_v62  ;;  %v2312_v53 = vpop.f32.mrf.mxu2  ;;  %v2310_v63 = vadd.f32 %v5937_v29, %v2309_v39 }
 0x4c8   :  { %v2313_v21 = vadd.f32 %v5937_v29, %v2312_v53 }
 0x4c9   :  { %v2191_v46 = vmax.f32 %v2124_v18, 0.0  ;;  %v2470_v43 = vmax.f32 %v2399_v36, 0.0 }
 0x4cb   :  { %2448 = vmatmul.f32.gmra.mxu3 %v2191_v46  ;;  %2834 = vmatmul.msk.f32.gmra.mxu0 %vm2498_vm1, %v2470_v43 }
 0x4ce   :  { %v2126_v14 = vpop.f32.mrf.mxu1  ;;  %v2401_v32 = vpop.f32.mrf.mxu3 }
 0x4cf   :  { %v2127_v10 = vadd.f32 %v2126_v14, %v2014_v55  ;;  %v2402_v11 = vadd.f32 %v2401_v32, %v2289_v33  ;;  %v2315_v2 = vpop.f32.mrf.mxu2 }
 0x4d0   :  { %v2316_v32 = vadd.f32 %v5937_v29, %v2315_v2 }
 0x4d1   :  { %v2193_v12 = vmax.f32 %v2127_v10, 0.0  ;;  %v2471_v27 = vmax.f32 %v2402_v11, 0.0 }
 0x4d3   :  { %2451 = vmatmul.f32.gmra.mxu3 %v2193_v12  ;;  %2835 = vmatmul.msk.f32.gmra.mxu0 %vm2498_vm1, %v2471_v27 }
 0x4d6   :  { %v2129_v35 = vpop.f32.mrf.mxu1  ;;  %v2404_v3 = vpop.f32.mrf.mxu3 }
 0x4d7   :  { %v2130_v25 = vadd.f32 %v2129_v35, %v2017_v37  ;;  %v2405_v44 = vadd.f32 %v2404_v3, %v2292_v52  ;;  %v2318_v59 = vpop.f32.mrf.mxu2 }
 0x4d8   :  { %v2319_v56 = vadd.f32 %v5937_v29, %v2318_v59 }
 0x4d9   :  { %v2195_v47 = vmax.f32 %v2130_v25, 0.0  ;;  %v2472_v54 = vmax.f32 %v2405_v44, 0.0 }
 0x4db   :  { %2454 = vmatmul.f32.gmra.mxu3 %v2195_v47  ;;  %2836 = vmatmul.msk.f32.gmra.mxu0 %vm2498_vm1, %v2472_v54 }
 0x4de   :  { %v2407_v60 = vpop.f32.mrf.mxu3 }
 0x4df   :  { %v2408_v31 = vadd.f32 %v2407_v60, %v2295_v8  ;;  %v2321_v14 = vpop.f32.mrf.mxu2 }
 0x4e0   :  { %v2322_v5 = vadd.f32 %v5937_v29, %v2321_v14 }
 0x4e1   :  { %v2473_v45 = vmax.f32 %v2408_v31, 0.0 }
 0x4e3   :  { %2837 = vmatmul.msk.f32.gmra.mxu0 %vm2498_vm1, %v2473_v45 }
 0x4e6   :  { %v2410_v4 = vpop.f32.mrf.mxu3 }
 0x4e7   :  { %v2411_v0 = vadd.f32 %v2410_v4, %v2298_v16  ;;  %v2324_v37 = vpop.f32.mrf.mxu2 }
 0x4e8   :  { %v2612_v28 = vpop.f32.mrf.mxu0  ;;  %v2325_v23 = vadd.f32 %v5937_v29, %v2324_v37 }
 0x4e9   :  { %v2474_v7 = vmax.f32 %v2411_v0, 0.0  ;;  %v2613_v26 = vadd.f32 %v6026_v41, %v2612_v28 }
 0x4eb   :  { %2708 = vst [vmem:[#allocation2] sm:$0xff] %v2613_v26  ;;  %2838 = vmatmul.msk.f32.gmra.mxu0 %vm2498_vm1, %v2474_v7 }
 0x4ee   :  { %v2413_v42 = vpop.f32.mrf.mxu3 }
 0x4ef   :  { %v2414_v1 = vadd.f32 %v2413_v42, %v2301_v34  ;;  %v2327_v8 = vpop.f32.mrf.mxu2 }
 0x4f0   :  { %v2615_v17 = vpop.f32.mrf.mxu0  ;;  %v2328_v39 = vadd.f32 %v5937_v29, %v2327_v8 }
 0x4f1   :  { %v2475_v9 = vmax.f32 %v2414_v1, 0.0  ;;  %v2616_v13 = vadd.f32 %v6026_v41, %v2615_v17 }
 0x4f3   :  { %2709 = vst [vmem:[#allocation2 + $0x8] sm:$0xff] %v2616_v13  ;;  %2839 = vmatmul.msk.f32.gmra.mxu0 %vm2498_vm1, %v2475_v9 }
 0x4f6   :  { %v2416_v40 = vpop.f32.mrf.mxu3 }
 0x4f7   :  { %v2417_v6 = vadd.f32 %v2416_v40, %v2304_v38  ;;  %v2330_v26 = vpop.f32.mrf.mxu2 }
 0x4f8   :  { %v2618_v48 = vpop.f32.mrf.mxu0  ;;  %v2331_v38 = vadd.f32 %v5937_v29, %v2330_v26 }
 0x4f9   :  { %v2476_v15 = vmax.f32 %v2417_v6, 0.0  ;;  %v2619_v58 = vadd.f32 %v6026_v41, %v2618_v48 }
 0x4fb   :  { %2710 = vst [vmem:[#allocation2 + $0x10] sm:$0xff] %v2619_v58  ;;  %2840 = vmatmul.msk.f32.gmra.mxu0 %vm2498_vm1, %v2476_v15 }
 0x4fe   :  { %v2419_v51 = vpop.f32.mrf.mxu3 }
 0x4ff   :  { %v2420_v30 = vadd.f32 %v2419_v51, %v2307_v20  ;;  %v2333_v13 = vpop.f32.mrf.mxu2 }
 0x500   :  { %v2621_v49 = vpop.f32.mrf.mxu0  ;;  %v2334_v58 = vadd.f32 %v5937_v29, %v2333_v13 }
 0x501   :  { %v2477_v57 = vmax.f32 %v2420_v30, 0.0  ;;  %v2622_v22 = vadd.f32 %v6026_v41, %v2621_v49 }
 0x503   :  { %2711 = vst [vmem:[#allocation2 + $0x18] sm:$0xff] %v2622_v22  ;;  %2841 = vmatmul.msk.f32.gmra.mxu0 %vm2498_vm1, %v2477_v57 }
 0x506   :  { %v2422_v62 = vpop.f32.mrf.mxu3 }
 0x507   :  { %v2423_v19 = vadd.f32 %v2422_v62, %v2310_v63  ;;  %v2336_v20 = vpop.f32.mrf.mxu2 }
 0x508   :  { %v2624_v24 = vpop.f32.mrf.mxu0  ;;  %v2337_v22 = vadd.f32 %v5937_v29, %v2336_v20 }
 0x509   :  { %v2478_v18 = vmax.f32 %v2423_v19, 0.0  ;;  %v2625_v36 = vadd.f32 %v6026_v41, %v2624_v24 }
 0x50b   :  { %2712 = vst [vmem:[#allocation2 + $0x20] sm:$0xff] %v2625_v36  ;;  %2842 = vmatmul.msk.f32.gmra.mxu0 %vm2498_vm1, %v2478_v18 }
 0x50e   :  { %v2425_v46 = vpop.f32.mrf.mxu3 }
 0x50f   :  { %v2426_v43 = vadd.f32 %v2425_v46, %v2313_v21  ;;  %v2339_v19 = vpop.f32.mrf.mxu2 }
 0x510   :  { %v2627_v55 = vpop.f32.mrf.mxu0  ;;  %v2340_v59 = vadd.f32 %v5937_v29, %v2339_v19 }
 0x511   :  { %v2479_v33 = vmax.f32 %v2426_v43, 0.0  ;;  %v2628_v61 = vadd.f32 %v6026_v41, %v2627_v55 }
 0x513   :  { %2713 = vst [vmem:[#allocation2 + $0x28] sm:$0xff] %v2628_v61  ;;  %2843 = vmatmul.msk.f32.gmra.mxu0 %vm2498_vm1, %v2479_v33 }
 0x516   :  { %v2428_v10 = vpop.f32.mrf.mxu3 }
 0x517   :  { %v2429_v11 = vadd.f32 %v2428_v10, %v2316_v32  ;;  %v2342_v61 = vpop.f32.mrf.mxu2 }
 0x518   :  { %v2630_v50 = vpop.f32.mrf.mxu0  ;;  %v2343_v14 = vadd.f32 %v5937_v29, %v2342_v61 }
 0x519   :  { %v2480_v12 = vmax.f32 %v2429_v11, 0.0  ;;  %v2631_v27 = vadd.f32 %v6026_v41, %v2630_v50 }
 0x51b   :  { %2714 = vst [vmem:[#allocation2 + $0x30] sm:$0xff] %v2631_v27  ;;  %2844 = vmatmul.msk.f32.gmra.mxu0 %vm2498_vm1, %v2480_v12 }
 0x51e   :  { %v2431_v52 = vpop.f32.mrf.mxu3 }
 0x51f   :  { %v2432_v35 = vadd.f32 %v2431_v52, %v2319_v56 }
 0x520   :  { %v2633_v3 = vpop.f32.mrf.mxu0 }
 0x521   :  { %v2481_v25 = vmax.f32 %v2432_v35, 0.0  ;;  %v2634_v44 = vadd.f32 %v6026_v41, %v2633_v3 }
 0x523   :  { %2715 = vst [vmem:[#allocation2 + $0x38] sm:$0xff] %v2634_v44  ;;  %2845 = vmatmul.msk.f32.gmra.mxu0 %vm2498_vm1, %v2481_v25 }
 0x526   :  { %v2434_v47 = vpop.f32.mrf.mxu3 }
 0x527   :  { %v2435_v54 = vadd.f32 %v2434_v47, %v2322_v5 }
 0x528   :  { %v2636_v60 = vpop.f32.mrf.mxu0 }
 0x529   :  { %v2482_v31 = vmax.f32 %v2435_v54, 0.0  ;;  %v2637_v45 = vadd.f32 %v6026_v41, %v2636_v60 }
 0x52b   :  { %2716 = vst [vmem:[#allocation2 + $0x40] sm:$0xff] %v2637_v45  ;;  %2846 = vmatmul.msk.f32.gmra.mxu0 %vm2498_vm1, %v2482_v31 }
 0x52e   :  { %v2437_v16 = vpop.f32.mrf.mxu3 }
 0x52f   :  { %v2438_v4 = vadd.f32 %v2437_v16, %v2325_v23 }
 0x530   :  { %v2639_v0 = vpop.f32.mrf.mxu0 }
 0x531   :  { %v2483_v28 = vmax.f32 %v2438_v4, 0.0  ;;  %v2640_v7 = vadd.f32 %v6026_v41, %v2639_v0 }
 0x533   :  { %2717 = vst [vmem:[#allocation2 + $0x48] sm:$0xff] %v2640_v7  ;;  %2847 = vmatmul.msk.f32.gmra.mxu0 %vm2498_vm1, %v2483_v28 }
 0x536   :  { %v2440_v34 = vpop.f32.mrf.mxu3 }
 0x537   :  { %v2441_v42 = vadd.f32 %v2440_v34, %v2328_v39 }
 0x538   :  { %v2642_v1 = vpop.f32.mrf.mxu0 }
 0x539   :  { %v2484_v17 = vmax.f32 %v2441_v42, 0.0  ;;  %v2643_v9 = vadd.f32 %v6026_v41, %v2642_v1 }
 0x53b   :  { %2718 = vst [vmem:[#allocation2 + $0x50] sm:$0xff] %v2643_v9  ;;  %2848 = vmatmul.msk.f32.gmra.mxu0 %vm2498_vm1, %v2484_v17 }
 0x53e   :  { %v2443_v53 = vpop.f32.mrf.mxu3 }
 0x53f   :  { %v2444_v40 = vadd.f32 %v2443_v53, %v2331_v38 }
 0x540   :  { %v2645_v6 = vpop.f32.mrf.mxu0 }
 0x541   :  { %v2485_v48 = vmax.f32 %v2444_v40, 0.0  ;;  %v2646_v15 = vadd.f32 %v6026_v41, %v2645_v6 }
 0x543   :  { %2719 = vst [vmem:[#allocation2 + $0x58] sm:$0xff] %v2646_v15  ;;  %2849 = vmatmul.msk.f32.gmra.mxu0 %vm2498_vm1, %v2485_v48 }
 0x546   :  { %v2446_v51 = vpop.f32.mrf.mxu3 }
 0x547   :  { %v2447_v30 = vadd.f32 %v2446_v51, %v2334_v58 }
 0x548   :  { %v2648_v2 = vpop.f32.mrf.mxu0 }
 0x549   :  { %v2486_v49 = vmax.f32 %v2447_v30, 0.0  ;;  %v2649_v57 = vadd.f32 %v6026_v41, %v2648_v2 }
 0x54b   :  { %2720 = vst [vmem:[#allocation2 + $0x60] sm:$0xff] %v2649_v57  ;;  %2850 = vmatmul.msk.f32.gmra.mxu0 %vm2498_vm1, %v2486_v49 }
 0x54e   :  { %v2449_v63 = vpop.f32.mrf.mxu3 }
 0x54f   :  { %v2450_v62 = vadd.f32 %v2449_v63, %v2337_v22 }
 0x550   :  { %v2651_v24 = vpop.f32.mrf.mxu0 }
 0x551   :  { %v2487_v18 = vmax.f32 %v2450_v62, 0.0  ;;  %v2652_v36 = vadd.f32 %v6026_v41, %v2651_v24 }
 0x553   :  { %2721 = vst [vmem:[#allocation2 + $0x68] sm:$0xff] %v2652_v36  ;;  %2851 = vmatmul.msk.f32.gmra.mxu0 %vm2498_vm1, %v2487_v18 }
 0x556   :  { %v2452_v21 = vpop.f32.mrf.mxu3 }
 0x557   :  { %v2453_v46 = vadd.f32 %v2452_v21, %v2340_v59 }
 0x558   :  { %v2654_v43 = vpop.f32.mrf.mxu0 }
 0x559   :  { %v2488_v55 = vmax.f32 %v2453_v46, 0.0  ;;  %v2655_v33 = vadd.f32 %v6026_v41, %v2654_v43 }
 0x55b   :  { %2722 = vst [vmem:[#allocation2 + $0x70] sm:$0xff] %v2655_v33  ;;  %2852 = vmatmul.msk.f32.gmra.mxu0 %vm2498_vm1, %v2488_v55 }
 0x55e   :  { %v2455_v32 = vpop.f32.mrf.mxu3 }
 0x55f   :  { %v2456_v10 = vadd.f32 %v2455_v32, %v2343_v14 }
 0x560   :  { %v2657_v11 = vpop.f32.mrf.mxu0 }
 0x561   :  { %v2489_v50 = vmax.f32 %v2456_v10, 0.0  ;;  %v2658_v12 = vadd.f32 %v6026_v41, %v2657_v11 }
 0x563   :  { %2723 = vst [vmem:[#allocation2 + $0x78] sm:$0xff] %v2658_v12  ;;  %2853 = vmatmul.msk.f32.gmra.mxu0 %vm2498_vm1, %v2489_v50 }
 0x568   :  { %v2660_v27 = vpop.f32.mrf.mxu0 }
 0x569   :  { %v2661_v56 = vadd.f32 %v6026_v41, %v2660_v27 }
 0x56b   :  { %2724 = vst [vmem:[#allocation2 + $0x80] sm:$0xff] %v2661_v56 }
 0x570   :  { %v2663_v37 = vpop.f32.mrf.mxu0 }
 0x571   :  { %v2664_v52 = vadd.f32 %v6026_v41, %v2663_v37 }
 0x573   :  { %2725 = vst [vmem:[#allocation2 + $0x88] sm:$0xff] %v2664_v52 }
 0x578   :  { %v2666_v35 = vpop.f32.mrf.mxu0 }
 0x579   :  { %v2667_v29 = vadd.f32 %v6026_v41, %v2666_v35 }
 0x57b   :  { %2726 = vst [vmem:[#allocation2 + $0x90] sm:$0xff] %v2667_v29 }
 0x580   :  { %v2669_v3 = vpop.f32.mrf.mxu0 }
 0x581   :  { %v2670_v25 = vadd.f32 %v6026_v41, %v2669_v3 }
 0x583   :  { %2727 = vst [vmem:[#allocation2 + $0x98] sm:$0xff] %v2670_v25 }
 0x588   :  { %v2672_v44 = vpop.f32.mrf.mxu0 }
 0x589   :  { %v2673_v5 = vadd.f32 %v6026_v41, %v2672_v44 }
 0x58b   :  { %2728 = vst [vmem:[#allocation2 + $0xa0] sm:$0xff] %v2673_v5 }
 0x590   :  { %v2675_v47 = vpop.f32.mrf.mxu0 }
 0x591   :  { %v2676_v54 = vadd.f32 %v6026_v41, %v2675_v47 }
 0x593   :  { %2729 = vst [vmem:[#allocation2 + $0xa8] sm:$0xff] %v2676_v54 }
 0x598   :  { %v2678_v8 = vpop.f32.mrf.mxu0 }
 0x599   :  { %v2679_v60 = vadd.f32 %v6026_v41, %v2678_v8 }
 0x59b   :  { %2730 = vst [vmem:[#allocation2 + $0xb0] sm:$0xff] %v2679_v60 }
 0x5a0   :  { %v2681_v31 = vpop.f32.mrf.mxu0 }
 0x5a1   :  { %v2682_v45 = vadd.f32 %v6026_v41, %v2681_v31 }
 0x5a3   :  { %2731 = vst [vmem:[#allocation2 + $0xb8] sm:$0xff] %v2682_v45 }
 0x5a8   :  { %v2684_v23 = vpop.f32.mrf.mxu0 }
 0x5a9   :  { %v2685_v16 = vadd.f32 %v6026_v41, %v2684_v23 }
 0x5ab   :  { %2732 = vst [vmem:[#allocation2 + $0xc0] sm:$0xff] %v2685_v16 }
 0x5b0   :  { %v2687_v4 = vpop.f32.mrf.mxu0 }
 0x5b1   :  { %v2688_v0 = vadd.f32 %v6026_v41, %v2687_v4 }
 0x5b3   :  { %2733 = vst [vmem:[#allocation2 + $0xc8] sm:$0xff] %v2688_v0 }
 0x5b8   :  { %v2690_v28 = vpop.f32.mrf.mxu0 }
 0x5b9   :  { %v2691_v7 = vadd.f32 %v6026_v41, %v2690_v28 }
 0x5bb   :  { %2734 = vst [vmem:[#allocation2 + $0xd0] sm:$0xff] %v2691_v7 }
 0x5c0   :  { %v2693_v26 = vpop.f32.mrf.mxu0 }
 0x5c1   :  { %v2694_v39 = vadd.f32 %v6026_v41, %v2693_v26 }
 0x5c3   :  { %2735 = vst [vmem:[#allocation2 + $0xd8] sm:$0xff] %v2694_v39 }
 0x5c8   :  { %v2696_v34 = vpop.f32.mrf.mxu0 }
 0x5c9   :  { %v2697_v42 = vadd.f32 %v6026_v41, %v2696_v34 }
 0x5cb   :  { %2736 = vst [vmem:[#allocation2 + $0xe0] sm:$0xff] %v2697_v42 }
 0x5d0   :  { %v2699_v1 = vpop.f32.mrf.mxu0 }
 0x5d1   :  { %v2700_v17 = vadd.f32 %v6026_v41, %v2699_v1 }
 0x5d3   :  { %2737 = vst [vmem:[#allocation2 + $0xe8] sm:$0xff] %v2700_v17 }
 0x5d8   :  { %v2702_v9 = vpop.f32.mrf.mxu0 }
 0x5d9   :  { %v2703_v13 = vadd.f32 %v6026_v41, %v2702_v9 }
 0x5db   :  { %2738 = vst [vmem:[#allocation2 + $0xf0] sm:$0xff] %v2703_v13 }
 0x5e0   :  { %v2705_v38 = vpop.f32.mrf.mxu0 }
 0x5e1   :  { %v2706_v53 = vadd.f32 %v6026_v41, %v2705_v38 }
 0x5e3   :  { %2739 = vst [vmem:[#allocation2 + $0xf8] sm:$0xff] %v2706_v53 }
 0x5e4   :  { %2752 = dma.vmem_to_hbm [thread:$0]  %s2745_s26, 4096, %s2747_s29, [#allocation3], %s3152_s30, %s3152_s30, %s3153_s1  }
 0x5e5   :  { %3149 = dma.done.wait [#allocation3], 4096  }
 0x5e6   :  { %3150 = vsyncadd [#allocation3], 4294963200 }
 0x5e7   :  { %2757 = vsyncpa [#allocation3], 1 }

</bundles_post_ra>
